<compile_context>
chip_gen: v5e
topology: v5e:2x2
jax: 0.10.0
libtpu: 0.0.40
codegen_flags: <defaults>
</compile_context>

<pallas_src>
import functools

import jax
import jax.numpy as jnp
from jax.experimental import pallas as pl
from jax.experimental.pallas import tpu as pltpu

NEG_SLOPE = 0.2  # LeakyReLU slope


# ---------------------------------------------------------------------------
# Pallas kernels
# ---------------------------------------------------------------------------
def _conv4x4_s2_bn_lrelu_kernel(ho, wo, xs_ref, w_ref, shift_ref, o_ref):
    """Fused Conv2d(k=4, s=2, p=1, bias=False) + BN affine + LeakyReLU(0.2).

    The stride-2 4x4 conv is expressed over the space-to-depth(2) input as a
    2x2 stride-1 conv: 4 tap matmuls accumulated in f32 on the MXU.

    xs_ref:    (1, Ho+1, Wo+1, 4*Cin)  bf16  s2d input incl. +1 halo row/col
    w_ref:     (4, 4*Cin, Cout)        bf16  per-tap weights (BN scale folded)
    shift_ref: (1, Cout)               f32   BN shift (beta); zeros if no BN
    o_ref:     (1, Ho, Wo, Cout)       bf16  output
    """
    cout = o_ref.shape[-1]
    k = w_ref.shape[1]                      # 4 * Cin
    xs = xs_ref[0]                          # (Ho+1, Wo+1, 4*Cin)

    acc = jnp.zeros((ho * wo, cout), jnp.float32)
    for t, (ty, tx) in enumerate(((0, 0), (0, 1), (1, 0), (1, 1))):
        x_tap = xs[ty:ty + ho, tx:tx + wo, :].reshape(ho * wo, k)
        acc = acc + jnp.dot(x_tap, w_ref[t],
                            preferred_element_type=jnp.float32)

    y = acc + shift_ref[...]                                    # BN shift
    y = jnp.where(y > 0, y, jnp.float32(NEG_SLOPE) * y)         # LeakyReLU
    o_ref[0] = y.reshape(ho, wo, cout).astype(o_ref.dtype)


def _final_conv_kernel(x_ref, w_ref, o_ref):
    """Final Conv2d(k=4, s=1, p=0, Cout=1) on a 4x4 map == one dot product."""
    o_ref[...] = jnp.dot(x_ref[...], w_ref[...],
                         preferred_element_type=jnp.float32)


# ---------------------------------------------------------------------------
# Layer wrappers
# ---------------------------------------------------------------------------
def conv4x4_s2_bn_lrelu(x, w_taps, shift):
    """x: (N, H, W, Cin) bf16 NHWC (H, W even). Returns (N, H/2, W/2, Cout) bf16."""
    n, h, w, cin = x.shape
    assert h % 2 == 0 and w % 2 == 0, (h, w)
    ho, wo = h // 2, w // 2
    hs, ws = ho + 1, wo + 1
    cout = w_taps.shape[-1]

    # pad by the conv padding (1) and space-to-depth by the stride (2):
    # xs[n, i, j, (2*py+px)*Cin + c] == x_pad[n, 2i+py, 2j+px, c]
    xp = jnp.pad(x, ((0, 0), (1, 1), (1, 1), (0, 0)))
    xs = xp.reshape(n, hs, 2, ws, 2, cin)
    xs = jnp.transpose(xs, (0, 1, 3, 2, 4, 5)).reshape(n, hs, ws, 4 * cin)

    kernel = functools.partial(_conv4x4_s2_bn_lrelu_kernel, ho, wo)
    return pl.pallas_call(
        kernel,
        out_shape=jax.ShapeDtypeStruct((n, ho, wo, cout), jnp.bfloat16),
        grid_spec=pltpu.PrefetchScalarGridSpec(
            num_scalar_prefetch=0,
            grid=(n,),                      # one image per grid step
            in_specs=[
                pl.BlockSpec((1, hs, ws, 4 * cin), lambda i: (i, 0, 0, 0)),
                pl.BlockSpec((4, 4 * cin, cout), lambda i: (0, 0, 0)),
                pl.BlockSpec((1, cout), lambda i: (0, 0)),
            ],
            out_specs=pl.BlockSpec((1, ho, wo, cout), lambda i: (i, 0, 0, 0)),
        ),
        compiler_params=pltpu.CompilerParams(
            dimension_semantics=("parallel",),
        ),
    )(xs, w_taps, shift)


def final_conv(x, w_mat):
    """x: (N, 4, 4, C) bf16; w_mat: (16*C, 1) bf16. Returns (N,) f32."""
    n, h, w, c = x.shape
    assert h == 4 and w == 4, (h, w)
    x2 = x.reshape(n, h * w * c)
    k = x2.shape[1]
    out = pl.pallas_call(
        _final_conv_kernel,
        out_shape=jax.ShapeDtypeStruct((n, 1), jnp.float32),
        grid_spec=pltpu.PrefetchScalarGridSpec(
            num_scalar_prefetch=0,
            grid=(1,),
            in_specs=[
                pl.BlockSpec((n, k), lambda i: (0, 0)),
                pl.BlockSpec((k, 1), lambda i: (0, 0)),
            ],
            out_specs=pl.BlockSpec((n, 1), lambda i: (0, 0)),
        ),
    )(x2, w_mat)
    return out.reshape(-1)


# ---------------------------------------------------------------------------
# Parameter preparation (plain JAX glue)
# ---------------------------------------------------------------------------
def _spectral_normalize(w, key, n_iter=8, eps=1e-12):
    """Approximate nn.utils.spectral_norm: W / sigma_max(W.reshape(Cout, -1))."""
    cout = w.shape[0]
    w_mat = w.reshape(cout, -1)
    u = jax.random.normal(key, (cout,), jnp.float32)
    u = u / (jnp.linalg.norm(u) + eps)
    v = None
    for _ in range(n_iter):
        v = w_mat.T @ u
        v = v / (jnp.linalg.norm(v) + eps)
        u = w_mat @ v
        u = u / (jnp.linalg.norm(u) + eps)
    sigma = u @ (w_mat @ v)
    return w / sigma


def _prep_conv_weight(w, scale):
    """(Cout, Cin, 4, 4) f32 -> (4, 4*Cin, Cout) bf16 per-tap weights with the
    BN per-channel scale folded into the output columns."""
    cout, cin = w.shape[0], w.shape[1]
    wt = jnp.transpose(w, (2, 3, 1, 0))        # (kh, kw, Cin, Cout)
    taps = []
    for ty in range(2):
        for tx in range(2):
            taps.append(
                wt[2 * ty:2 * ty + 2, 2 * tx:2 * tx + 2, :, :]
                .reshape(4 * cin, cout))
    w4 = jnp.stack(taps, axis=0)               # (4, 4*Cin, Cout)
    w4 = w4 * scale.reshape(1, 1, cout)
    return w4.astype(jnp.bfloat16)


def init_discriminator_params(key, image_channels, hidden_size):
    """Matches weights_init: Conv ~ N(0, .02); BN gamma ~ N(1, .02), beta = 0."""
    hs = hidden_size
    eps = 1e-5
    # (Cin, Cout, has_bn) for the four stride-2 conv blocks
    layer_defs = [
        (image_channels, hs, False),
        (hs, hs * 2, True),
        (hs * 2, hs * 4, True),
        (hs * 4, hs * 8, True),
    ]
    layers = []
    for cin, cout, has_bn in layer_defs:
        key, kw, ku, kg = jax.random.split(key, 4)
        w = 0.02 * jax.random.normal(kw, (cout, cin, 4, 4), jnp.float32)
        w = _spectral_normalize(w, ku)
        if has_bn:
            gamma = 1.0 + 0.02 * jax.random.normal(kg, (cout,), jnp.float32)
            beta = jnp.zeros((cout,), jnp.float32)
            scale = gamma / jnp.sqrt(1.0 + eps)   # eval-mode BN (mean=0, var=1)
            shift = beta
        else:
            scale = jnp.ones((cout,), jnp.float32)
            shift = jnp.zeros((cout,), jnp.float32)
        layers.append((_prep_conv_weight(w, scale),
                       shift.reshape(1, cout).astype(jnp.float32)))

    # Final Conv2d(hs*8, 1, 4, 1, 0, bias=False) with spectral norm.
    key, kw, ku = jax.random.split(key, 3)
    wf = 0.02 * jax.random.normal(kw, (1, hs * 8, 4, 4), jnp.float32)
    wf = _spectral_normalize(wf, ku)
    wf_mat = (jnp.transpose(wf, (2, 3, 1, 0))            # (4, 4, C, 1)
              .reshape(16 * hs * 8, 1).astype(jnp.bfloat16))
    return (layers, wf_mat), key


def discriminator_forward(params, x_nchw):
    layers, wf_mat = params
    # PyTorch input is NCHW -> NHWC, bf16 activations between layers.
    x = jnp.transpose(x_nchw, (0, 2, 3, 1)).astype(jnp.bfloat16)
    for w4, shift in layers:
        x = conv4x4_s2_bn_lrelu(x, w4, shift)
    return final_conv(x, wf_mat)                          # (N,) f32, == view(-1)


# ---------------------------------------------------------------------------
if __name__ == "__main__":
    # Small, structure-preserving configuration (64x64 input -> 1 logit).
    hidden_size = 16
    image_channels = 3
    batch = 2
    spatial = 64

    key = jax.random.PRNGKey(0)
    params, key = init_discriminator_params(key, image_channels, hidden_size)

    key, kx = jax.random.split(key)
    x = jax.random.normal(kx, (batch, image_channels, spatial, spatial),
                          jnp.float32)

    out = discriminator_forward(params, x)
    out = jax.block_until_ready(out)

    # Spatial shrink: 64 -> 32 -> 16 -> 8 -> 4 -> 1; view(-1) -> (N,)
    assert out.shape == (batch,), out.shape
    assert out.dtype == jnp.float32
    assert bool(jnp.all(jnp.isfinite(out)))

    print("KERNEL_OK")
</pallas_src>

<mosaic_0001>
module attributes {stable_mosaic.version = 11 : i64} {
  func.func @_conv4x4_s2_bn_lrelu_kernel(%arg0: i32, %arg1: memref<1x33x33x12xbf16, #tpu.memory_space<vmem>>, %arg2: memref<4x12x16xbf16, #tpu.memory_space<vmem>>, %arg3: memref<1x16xf32, #tpu.memory_space<vmem>>, %arg4: memref<1x32x32x16xbf16, #tpu.memory_space<vmem>>) attributes {dimension_semantics = [#tpu.dimension_semantics<parallel>], iteration_bounds = array<i64: 2>, scalar_prefetch = 0 : i64, scratch_operands = 0 : i64, tpu.core_type = #tpu.core_type<tc>, window_params = [{transform_indices = @transform_0, window_bounds = array<i64: 1, 33, 33, 12>}, {pipeline_mode = #tpu.pipeline_mode<synchronous>, transform_indices = @transform_1, window_bounds = array<i64: 4, 12, 16>}, {pipeline_mode = #tpu.pipeline_mode<synchronous>, transform_indices = @transform_2, window_bounds = array<i64: 1, 16>}, {transform_indices = @transform_3, window_bounds = array<i64: 1, 32, 32, 16>}]} {
    %c0 = arith.constant 0 : index
    %c0_0 = arith.constant 0 : index
    %c0_1 = arith.constant 0 : index
    %c0_2 = arith.constant 0 : index
    %0 = vector.load %arg1[%c0, %c0_0, %c0_1, %c0_2] : memref<1x33x33x12xbf16, #tpu.memory_space<vmem>>, vector<1x33x33x12xbf16>
    %1 = vector.shape_cast %0 : vector<1x33x33x12xbf16> to vector<33x33x12xbf16>
    %cst = arith.constant 0.000000e+00 : f32
    %2 = vector.broadcast %cst : f32 to vector<1024x16xf32>
    %3 = vector.extract_strided_slice %1 {offsets = [0, 0, 0], sizes = [32, 32, 12], strides = [1, 1, 1]} : vector<33x33x12xbf16> to vector<32x32x12xbf16>
    %4 = vector.shape_cast %3 : vector<32x32x12xbf16> to vector<1024x12xbf16>
    %c0_3 = arith.constant 0 : index
    %c0_4 = arith.constant 0 : index
    %c0_5 = arith.constant 0 : index
    %5 = vector.load %arg2[%c0_3, %c0_4, %c0_5] : memref<4x12x16xbf16, #tpu.memory_space<vmem>>, vector<1x12x16xbf16>
    %6 = vector.shape_cast %5 : vector<1x12x16xbf16> to vector<12x16xbf16>
    %cst_6 = arith.constant dense<0.000000e+00> : vector<1024x16xf32>
    %7 = tpu.matmul %4, %6, %cst_6 {dimension_numbers = #tpu.dot_dimension_numbers<[1], [0], [0], [1], [0, 0, 1, 1], [], []>} : vector<1024x12xbf16>, vector<12x16xbf16>, vector<1024x16xf32> -> vector<1024x16xf32>
    %8 = arith.addf %2, %7 : vector<1024x16xf32>
    %9 = vector.extract_strided_slice %1 {offsets = [0, 1, 0], sizes = [32, 32, 12], strides = [1, 1, 1]} : vector<33x33x12xbf16> to vector<32x32x12xbf16>
    %10 = vector.shape_cast %9 : vector<32x32x12xbf16> to vector<1024x12xbf16>
    %c1 = arith.constant 1 : index
    %c0_7 = arith.constant 0 : index
    %c0_8 = arith.constant 0 : index
    %11 = vector.load %arg2[%c1, %c0_7, %c0_8] : memref<4x12x16xbf16, #tpu.memory_space<vmem>>, vector<1x12x16xbf16>
    %12 = vector.shape_cast %11 : vector<1x12x16xbf16> to vector<12x16xbf16>
    %cst_9 = arith.constant dense<0.000000e+00> : vector<1024x16xf32>
    %13 = tpu.matmul %10, %12, %cst_9 {dimension_numbers = #tpu.dot_dimension_numbers<[1], [0], [0], [1], [0, 0, 1, 1], [], []>} : vector<1024x12xbf16>, vector<12x16xbf16>, vector<1024x16xf32> -> vector<1024x16xf32>
    %14 = arith.addf %8, %13 : vector<1024x16xf32>
    %15 = vector.extract_strided_slice %1 {offsets = [1, 0, 0], sizes = [32, 32, 12], strides = [1, 1, 1]} : vector<33x33x12xbf16> to vector<32x32x12xbf16>
    %16 = vector.shape_cast %15 : vector<32x32x12xbf16> to vector<1024x12xbf16>
    %c2 = arith.constant 2 : index
    %c0_10 = arith.constant 0 : index
    %c0_11 = arith.constant 0 : index
    %17 = vector.load %arg2[%c2, %c0_10, %c0_11] : memref<4x12x16xbf16, #tpu.memory_space<vmem>>, vector<1x12x16xbf16>
    %18 = vector.shape_cast %17 : vector<1x12x16xbf16> to vector<12x16xbf16>
    %cst_12 = arith.constant dense<0.000000e+00> : vector<1024x16xf32>
    %19 = tpu.matmul %16, %18, %cst_12 {dimension_numbers = #tpu.dot_dimension_numbers<[1], [0], [0], [1], [0, 0, 1, 1], [], []>} : vector<1024x12xbf16>, vector<12x16xbf16>, vector<1024x16xf32> -> vector<1024x16xf32>
    %20 = arith.addf %14, %19 : vector<1024x16xf32>
    %21 = vector.extract_strided_slice %1 {offsets = [1, 1, 0], sizes = [32, 32, 12], strides = [1, 1, 1]} : vector<33x33x12xbf16> to vector<32x32x12xbf16>
    %22 = vector.shape_cast %21 : vector<32x32x12xbf16> to vector<1024x12xbf16>
    %c3 = arith.constant 3 : index
    %c0_13 = arith.constant 0 : index
    %c0_14 = arith.constant 0 : index
    %23 = vector.load %arg2[%c3, %c0_13, %c0_14] : memref<4x12x16xbf16, #tpu.memory_space<vmem>>, vector<1x12x16xbf16>
    %24 = vector.shape_cast %23 : vector<1x12x16xbf16> to vector<12x16xbf16>
    %cst_15 = arith.constant dense<0.000000e+00> : vector<1024x16xf32>
    %25 = tpu.matmul %22, %24, %cst_15 {dimension_numbers = #tpu.dot_dimension_numbers<[1], [0], [0], [1], [0, 0, 1, 1], [], []>} : vector<1024x12xbf16>, vector<12x16xbf16>, vector<1024x16xf32> -> vector<1024x16xf32>
    %26 = arith.addf %20, %25 : vector<1024x16xf32>
    %c0_16 = arith.constant 0 : index
    %c0_17 = arith.constant 0 : index
    %27 = vector.load %arg3[%c0_16, %c0_17] : memref<1x16xf32, #tpu.memory_space<vmem>>, vector<1x16xf32>
    %28 = vector.broadcast %27 : vector<1x16xf32> to vector<1024x16xf32>
    %29 = arith.addf %26, %28 : vector<1024x16xf32>
    %cst_18 = arith.constant 0.000000e+00 : f32
    %30 = vector.broadcast %cst_18 : f32 to vector<1024x16xf32>
    %31 = arith.cmpf ogt, %29, %30 : vector<1024x16xf32>
    %cst_19 = arith.constant 2.000000e-01 : f32
    %32 = vector.broadcast %cst_19 : f32 to vector<1024x16xf32>
    %33 = arith.mulf %32, %29 : vector<1024x16xf32>
    %34 = arith.select %31, %29, %33 : vector<1024x16xi1>, vector<1024x16xf32>
    %35 = vector.shape_cast %34 : vector<1024x16xf32> to vector<32x32x16xf32>
    %36 = arith.truncf %35 : vector<32x32x16xf32> to vector<32x32x16xbf16>
    %c0_20 = arith.constant 0 : index
    %c0_21 = arith.constant 0 : index
    %c0_22 = arith.constant 0 : index
    %c0_23 = arith.constant 0 : index
    %37 = vector.load %arg4[%c0_20, %c0_21, %c0_22, %c0_23] : memref<1x32x32x16xbf16, #tpu.memory_space<vmem>>, vector<1x32x32x16xbf16>
    %38 = vector.shape_cast %37 : vector<1x32x32x16xbf16> to vector<32x32x16xbf16>
    %39 = vector.shape_cast %36 : vector<32x32x16xbf16> to vector<1x32x32x16xbf16>
    tpu.vector_store %arg4[%c0_20, %c0_21, %c0_22, %c0_23], %39 {strides = array<i32>} : memref<1x32x32x16xbf16, #tpu.memory_space<vmem>>, vector<1x32x32x16xbf16>,
    return
  }
  func.func @transform_0(%arg0: i32) -> (i32, i32, i32, i32) {
    %c0_i32 = arith.constant 0 : i32
    %c0_i32_0 = arith.constant 0 : i32
    %c0_i32_1 = arith.constant 0 : i32
    %c0_i32_2 = arith.constant 0 : i32
    return %arg0, %c0_i32, %c0_i32_0, %c0_i32_1 : i32, i32, i32, i32
  }
  func.func @transform_1(%arg0: i32) -> (i32, i32, i32) {
    %c0_i32 = arith.constant 0 : i32
    %c0_i32_0 = arith.constant 0 : i32
    %c0_i32_1 = arith.constant 0 : i32
    %c0_i32_2 = arith.constant 0 : i32
    return %c0_i32, %c0_i32_0, %c0_i32_1 : i32, i32, i32
  }
  func.func @transform_2(%arg0: i32) -> (i32, i32) {
    %c0_i32 = arith.constant 0 : i32
    %c0_i32_0 = arith.constant 0 : i32
    %c0_i32_1 = arith.constant 0 : i32
    return %c0_i32, %c0_i32_0 : i32, i32
  }
  func.func @transform_3(%arg0: i32) -> (i32, i32, i32, i32) {
    %c0_i32 = arith.constant 0 : i32
    %c0_i32_0 = arith.constant 0 : i32
    %c0_i32_1 = arith.constant 0 : i32
    %c0_i32_2 = arith.constant 0 : i32
    return %arg0, %c0_i32, %c0_i32_0, %c0_i32_1 : i32, i32, i32, i32
  }
}

</mosaic_0001>

<bundles_post_ra>
// kernel: tpu_custom_call.1
= control target key start
LH: loop header
LB: loop body
LE: loop exit
PB: predicated region body
PF: predicated region fallthrough
CT: control target
= control target key end

     0   :  { %s5827_s12 = smov 0   ;;  %s7499_s0 = inlined_call_operand.vmem [shape: bf16[2,33,33,12], index: 0, kind: input, shape index: {}]   ;;  %s7500_s1 = inlined_call_operand.vmem [shape: bf16[4,12,16], index: 1, kind: input, shape index: {}]   ;;  %s7501_s2 = inlined_call_operand.vmem [shape: f32[1,16], index: 2, kind: input, shape index: {}]   ;;  %s7502_s3 = inlined_call_operand.vmem [shape: bf16[2,32,32,16], index: 3, kind: output, shape index: {}]  }
   0x1 LB: > { %s5161_s13 = sadd.s32 4294967295, %s5805_s12   ;;  %p5165_p0 = scmp.ge.s32.totalorder %s5805_s12, 1  ;;  %s5805_s12 = sphi %s5827_s12, %s13_s12  }
   0x2   : > { %p137_p1 = scmp.lt.s32.totalorder %s5805_s12, 3 }
   0x4   : > { %p138_p2 = pnand %p5165_p0, %p137_p1 }
   0x5   : > { %p161_p3 = scmp.lt.s32.totalorder (!%p138_p2), %s5161_s13, 1 }
   0x6   : > { %141 = sbr.rel (%p138_p2) target bundleno = 1193 (0x4a9), region = 32 }
   0xb   : > { %vm2143_vm0 = vcmask 1045504   ;;  %v5575_v0 = vld [vmem:[%s7500_s1 + $0x10] sm:$0xf]  ;;  %v5782_v1 = vld [vmem:[%s7500_s1 + $0x10] sm:$0x30]  ;;  %s7506_s13 = smov (!%p161_p3, %s5161_s13), 1 }
   0xc   : > { %v5576_v2 = vor.u32 %v5782_v1, %v5575_v0  ;;  %v5497_v3 = vld [vmem:[%s7500_s1] sm:$0xf]  ;;  %v5780_v4 = vld [vmem:[%s7500_s1] sm:$0x30]  ;;  %v5173_v6 = vld [vmem:[%s7500_s1 + $0x8] sm:$0xf] }
   0xd   : > { %v5498_v5 = vor.u32 %v5780_v4, %v5497_v3  ;;  %v5781_v7 = vld [vmem:[%s7500_s1 + $0x8] sm:$0x30]  ;;  %v5645_v10 = vld [vmem:[%s7500_s1 + $0x18] sm:$0xf]  ;;  %v5783_v11 = vld [vmem:[%s7500_s1 + $0x18] sm:$0x30] }
   0xe   : > { %v3350_v8 = vsel %vm2143_vm0, %v5576_v2, 0  ;;  %v5174_v9 = vor.u32 %v5781_v7, %v5173_v6  ;;  %s5784_s30 = smul.u32 660, %s7506_s13  ;;  %v5646_v13 = vor.u32 %v5783_v11, %v5645_v10  ;;  %vm1950_vm1 = vcmask 97280   ;;  %s5713_s9 = sshll.u32 %s7506_s13, 9 }
   0xf   : > { %3359 = vmatpush.bf16.msra.mxu2 %v3350_v8  ;;  %v2994_v12 = vsel %vm2143_vm0, %v5498_v5, 0  ;;  %vm339_vm2 = vsmask.f32 3328  ;;  %vm340_vm3 = vsmask.f32 7440  ;;  %s6041_s14 = scalar_lea.vmem %s7502_s3, %s5713_s9  ;;  %vm4977_vm6 = vcmask 125952  }
  0x10   : > { %3003 = vmatpush.bf16.msra.mxu1 %v2994_v12  ;;  %v2145_v14 = vsel %vm2143_vm0, %v5174_v9, 0  ;;  %s5868_s6 = scalar_lea.vmem %s7499_s0, %s5784_s30  ;;  %v3874_v15 = vsel %vm2143_vm0, %v5646_v13, 0  ;;  %vm5887_vm4 = vmor %vm339_vm2, %vm340_vm3 }
  0x11   : > { %2154 = vmatpush.bf16.msra.mxu0 %v2145_v14  ;;  %v5872_v16 = vld [vmem:[%s5868_s6 + $0x14] sm:$0xff]  ;;  %v5714_v17 = vld [vmem:[%s5868_s6] sm:$0xff]  ;;  %3883 = vmatpush.bf16.msra.mxu3 %v3874_v15  ;;  %v174_v20 = vld [vmem:[%s5868_s6 + $0x8] sm:$0xf] }
  0x12   : > { %v172_v18 = vld [vmem:[%s5868_s6] sm:$0xf]  ;;  %v173_v19 = vld [vmem:[%s5868_s6 + $0x4] sm:$0xf]  ;;  %5577 = vmatmul.msk.bf16.vlgmr.msra.gmra.mxu2 %vm1950_vm1, %v5872_v16  ;;  %v362_v25 = vshll.u32 %v174_v20, 16  ;;  %v366_v26 = vshrl.u32 %v174_v20, 16 }
  0x13   : > { %v343_v21 = vshrl.u32 %v172_v18, 16  ;;  %v346_v22 = vshll.u32 %v172_v18, 16  ;;  %5499 = vmatmul.msk.bf16.vlgmr.msra.gmra.mxu1 %vm1950_vm1, %v5714_v17  ;;  %v352_v23 = vshll.u32 %v173_v19, 16  ;;  %v356_v24 = vshrl.u32 %v173_v19, 16  ;;  %v177_v27 = vld [vmem:[%s5868_s6 + $0x14] sm:$0xf] }
  0x14   : > { %v178_v30 = vld [vmem:[%s5868_s6 + $0x18] sm:$0xf]  ;;  %v179_v31 = vld [vmem:[%s5868_s6 + $0x1c] sm:$0xf]  ;;  %v364_v34 = vrot.slane %v362_v25, 5  ;;  %v387_v35 = vshrl.u32 %v177_v27, 16 }
  0x15   : > { %v345_v28 = vrot.slane %v343_v21, 4  ;;  %v348_v29 = vrot.slane %v346_v22, 5  ;;  %v354_v32 = vrot.slane %v352_v23, 5  ;;  %v358_v33 = vrot.slane %v356_v24, 4  ;;  %v175_v40 = vld [vmem:[%s5868_s6 + $0xc] sm:$0xf] }
  0x16   : > { %v390_v37 = vshll.u32 %v177_v27, 16  ;;  %v396_v38 = vshll.u32 %v178_v30, 16  ;;  %v400_v39 = vshrl.u32 %v178_v30, 16  ;;  %v389_v43 = vrot.slane %v387_v35, 4  ;;  %v176_v57 = vld [vmem:[%s5868_s6 + $0x10] sm:$0x1] }
  0x17   : > { %v349_v36 = vor.u32 %v348_v29, %v345_v28  ;;  %v359_v42 = vor.u32 %v358_v33, %v354_v32  ;;  %v406_v44 = vshll.u32 %v179_v31, 16  ;;  %v410_v45 = vshrl.u32 %v179_v31, 16  ;;  %v180_v59 = vld [vmem:[%s5868_s6 + $0x20] sm:$0xf]  ;;  %v181_v11 = vld [vmem:[%s5868_s6 + $0x24] sm:$0x1] }
  0x18   : > { %v392_v47 = vrot.slane %v390_v37, 5  ;;  %v398_v48 = vrot.slane %v396_v38, 5  ;;  %v402_v49 = vrot.slane %v400_v39, 4  ;;  %v368_v52 = vrot.slane %v366_v26, 4  ;;  %v5903_v14 = vld [vmem:[%s5868_s6 + $0x1c] sm:$0xff]  ;;  %v5715_v15 = vld [vmem:[%s5868_s6 + $0x8] sm:$0xff] }
  0x19   : > { %v350_v46 = vrot.slane %v349_v36, 4  ;;  %v360_v50 = vrot.slane %v359_v42, 4  ;;  %v408_v51 = vrot.slane %v406_v44, 5  ;;  %v372_v53 = vshll.u32 %v175_v40, 16  ;;  %v182_v28 = vld [vmem:[%s5868_s6 + $0x28] sm:$0xf] }
  0x1a   : > { %v393_v55 = vor.u32 %v392_v47, %v389_v43  ;;  %v403_v56 = vor.u32 %v402_v49, %v398_v48  ;;  %v376_v58 = vshrl.u32 %v175_v40, 16  ;;  %v369_v62 = vor.u32 %v368_v52, %v364_v34  ;;  %v5718_v52 = vld [vmem:[%s5868_s6 + $0x28] sm:$0xff] }
  0x1b   : > { %v355_v54 = vsel %vm5887_vm4, %v350_v46, %v354_v32  ;;  %v365_v60 = vsel %vm5887_vm4, %v360_v50, %v364_v34  ;;  %v374_v63 = vrot.slane %v372_v53, 5  ;;  %v382_v4 = vshll.u32 %v176_v57, 16  ;;  %v183_v32 = vld [vmem:[%s5868_s6 + $0x2c] sm:$0xf]  ;;  %v184_v50 = vld [vmem:[%s5868_s6 + $0x30] sm:$0xf] }
  0x1c   : > { %v1753_v61 = vunpack.c.l.b16 %v355_v54  ;;  %v1754_v0 = vunpack.c.l.b16 %v365_v60  ;;  %v394_v1 = vrot.slane %v393_v55, 4  ;;  %v404_v2 = vrot.slane %v403_v56, 4 }
  0x1d   : > { %v378_v3 = vrot.slane %v376_v58, 4  ;;  %v412_v5 = vrot.slane %v410_v45, 4  ;;  %v416_v6 = vshll.u32 %v180_v59, 16  ;;  %v370_v17 = vrot.slane %v369_v62, 4 }
  0x1e   : > { %v1881_v7 = vpack.c.b16 %v1754_v0, %v1753_v61  ;;  %v399_v8 = vsel %vm5887_vm4, %v394_v1, %v398_v48  ;;  %v409_v9 = vsel %vm5887_vm4, %v404_v2, %v408_v51  ;;  %v384_v19 = vrot.slane %v382_v4, 5 }
  0x1f   : > { %v379_v10 = vor.u32 %v378_v3, %v374_v63  ;;  %v1757_v12 = vunpack.c.l.b16 %v399_v8  ;;  %v1758_v13 = vunpack.c.l.b16 %v409_v9  ;;  %v413_v20 = vor.u32 %v412_v5, %v408_v51  ;;  %v186_v5 = vld [vmem:[%s5868_s6 + $0x38] sm:$0x1] }
  0x20   : > { %5175 = vmatmul.msk.bf16.vlgmr.msra.gmra.mxu0 %vm1950_vm1, %v1881_v7  ;;  %v418_v22 = vrot.slane %v416_v6, 5  ;;  %v420_v23 = vshrl.u32 %v180_v59, 16  ;;  %v426_v24 = vshll.u32 %v181_v11, 16  ;;  %v375_v26 = vsel %vm5887_vm4, %v370_v17, %v374_v63  ;;  %v185_v59 = vld [vmem:[%s5868_s6 + $0x34] sm:$0xf] }
  0x21   : > { %v380_v18 = vrot.slane %v379_v10, 4  ;;  %v1883_v21 = vpack.c.b16 %v1758_v13, %v1757_v12  ;;  %v414_v27 = vrot.slane %v413_v20, 4  ;;  %v1755_v33 = vunpack.c.l.b16 %v375_v26  ;;  %v5719_v7 = vld [vmem:[%s5868_s6 + $0x30] sm:$0xff]  ;;  %v188_v17 = vld [vmem:[%s5868_s6 + $0x40] sm:$0xf] }
  0x22   : > { %5578 = vmatmul.msk.bf16.gmra.mxu2 %vm1950_vm1, %v5903_v14  ;;  %v422_v25 = vrot.slane %v420_v23, 4  ;;  %v428_v31 = vrot.slane %v426_v24, 5  ;;  %v431_v35 = vshrl.u32 %v182_v28, 16  ;;  %v434_v36 = vshll.u32 %v182_v28, 16 }
  0x23   : > { %5647 = vmatmul.msk.bf16.vlgmr.msra.gmra.mxu3 %vm1950_vm1, %v1883_v21  ;;  %5500 = vmatmul.msk.bf16.gmra.mxu1 %vm1950_vm1, %v5715_v15  ;;  %v385_v29 = vsel %vm5887_vm4, %v380_v18, %v384_v19  ;;  %v419_v38 = vsel %vm5887_vm4, %v414_v27, %v418_v22  ;;  %v440_v39 = vshll.u32 %v183_v32, 16  ;;  %v444_v40 = vshrl.u32 %v183_v32, 16  ;;  %v187_v15 = vld [vmem:[%s5868_s6 + $0x3c] sm:$0xf] }
  0x24   : > { %v423_v30 = vor.u32 %v422_v25, %v418_v22  ;;  %v1756_v37 = vunpack.c.l.b16 %v385_v29  ;;  %v1759_v43 = vunpack.c.l.b16 %v419_v38  ;;  %v433_v45 = vrot.slane %v431_v35, 4  ;;  %v189_v29 = vld [vmem:[%s5868_s6 + $0x44] sm:$0xf]  ;;  %v190_v38 = vld [vmem:[%s5868_s6 + $0x48] sm:$0xf] }
  0x25   : > { %v436_v47 = vrot.slane %v434_v36, 5  ;;  %v442_v48 = vrot.slane %v440_v39, 5  ;;  %v446_v49 = vrot.slane %v444_v40, 4  ;;  %v450_v55 = vshll.u32 %v184_v50, 16 }
  0x26   : > { %v424_v34 = vrot.slane %v423_v30, 4  ;;  %v1882_v46 = vpack.c.b16 %v1756_v37, %v1755_v33  ;;  %v454_v60 = vshrl.u32 %v184_v50, 16  ;;  %v460_v63 = vshll.u32 %v185_v59, 16  ;;  %v191_v50 = vld [vmem:[%s5868_s6 + $0x4c] sm:$0x1] }
  0x27   : > { %v437_v53 = vor.u32 %v436_v47, %v433_v45  ;;  %v447_v54 = vor.u32 %v446_v49, %v442_v48  ;;  %v452_v58 = vrot.slane %v450_v55, 5  ;;  %v464_v0 = vshrl.u32 %v185_v59, 16  ;;  %v192_v59 = vld [vmem:[%s5868_s6 + $0x50] sm:$0xf] }
  0x28   : > { %v429_v42 = vsel %vm5887_vm4, %v424_v34, %v428_v31  ;;  %v456_v3 = vrot.slane %v454_v60, 4  ;;  %v462_v4 = vrot.slane %v460_v63, 5  ;;  %v470_v10 = vshll.u32 %v186_v5, 16  ;;  %v5720_v31 = vld [vmem:[%s5868_s6 + $0x3c] sm:$0xff]  ;;  %v193_v60 = vld [vmem:[%s5868_s6 + $0x54] sm:$0xf] }
  0x29   : > { %v1760_v44 = vunpack.c.l.b16 %v429_v42  ;;  %v438_v56 = vrot.slane %v437_v53, 4  ;;  %v448_v57 = vrot.slane %v447_v54, 4  ;;  %v475_v18 = vshrl.u32 %v187_v15, 16 }
  0x2a   : > { %v457_v8 = vor.u32 %v456_v3, %v452_v58  ;;  %v472_v13 = vrot.slane %v470_v10, 5  ;;  %v478_v19 = vshll.u32 %v187_v15, 16  ;;  %v484_v22 = vshll.u32 %v188_v17, 16  ;;  %v5722_v10 = vld [vmem:[%s5868_s6 + $0x50] sm:$0xff] }
  0x2b   : > { %v1884_v51 = vpack.c.b16 %v1760_v44, %v1759_v43  ;;  %v443_v61 = vsel %vm5887_vm4, %v438_v56, %v442_v48  ;;  %v453_v62 = vsel %vm5887_vm4, %v448_v57, %v452_v58  ;;  %v488_v23 = vshrl.u32 %v188_v17, 16 }
  0x2c   : > { %v1761_v1 = vunpack.c.l.b16 %v443_v61  ;;  %v1762_v2 = vunpack.c.l.b16 %v453_v62  ;;  %v458_v11 = vrot.slane %v457_v8, 4  ;;  %v480_v26 = vrot.slane %v478_v19, 5  ;;  %v194_v8 = vld [vmem:[%s5868_s6 + $0x58] sm:$0xf]  ;;  %v195_v19 = vld [vmem:[%s5868_s6 + $0x5c] sm:$0xf] }
  0x2d   : > { %v486_v27 = vrot.slane %v484_v22, 5  ;;  %v490_v28 = vrot.slane %v488_v23, 4  ;;  %v494_v34 = vshll.u32 %v189_v29, 16  ;;  %v498_v42 = vshrl.u32 %v189_v29, 16  ;;  %v196_v29 = vld [vmem:[%s5868_s6 + $0x60] sm:$0x1] }
  0x2e   : > { %v1885_v6 = vpack.c.b16 %v1762_v2, %v1761_v1  ;;  %v463_v20 = vsel %vm5887_vm4, %v458_v11, %v462_v4  ;;  %v504_v43 = vshll.u32 %v190_v38, 16  ;;  %v508_v44 = vshrl.u32 %v190_v38, 16 }
  0x2f   : > { %v1763_v24 = vunpack.c.l.b16 %v463_v20  ;;  %v491_v33 = vor.u32 %v490_v28, %v486_v27  ;;  %v496_v37 = vrot.slane %v494_v34, 5  ;;  %v500_v47 = vrot.slane %v498_v42, 4 }
  0x30   : > { %5176 = vmatmul.msk.bf16.gmra.mxu0 %vm1950_vm1, %v1882_v46  ;;  %v506_v48 = vrot.slane %v504_v43, 5  ;;  %v510_v49 = vrot.slane %v508_v44, 4  ;;  %v514_v55 = vshll.u32 %v191_v50, 16  ;;  %v519_v61 = vshrl.u32 %v192_v59, 16 }
  0x31   : > { %v492_v36 = vrot.slane %v491_v33, 4  ;;  %v501_v53 = vor.u32 %v500_v47, %v496_v37  ;;  %v522_v62 = vshll.u32 %v192_v59, 16  ;;  %v528_v1 = vshll.u32 %v193_v60, 16 }
  0x32   : > { %5579 = vmatmul.msk.bf16.gmra.mxu2 %vm1950_vm1, %v5718_v52  ;;  %v511_v54 = vor.u32 %v510_v49, %v506_v48  ;;  %v516_v58 = vrot.slane %v514_v55, 5  ;;  %v532_v2 = vshrl.u32 %v193_v60, 16  ;;  %v542_v22 = vshrl.u32 %v194_v8, 16 }
  0x33   : > { %5648 = vmatmul.msk.bf16.gmra.mxu3 %vm1950_vm1, %v1884_v51  ;;  %5501 = vmatmul.msk.bf16.gmra.mxu1 %vm1950_vm1, %v5872_v16  ;;  %v466_v16 = vrot.slane %v464_v0, 4  ;;  %v497_v40 = vsel %vm5887_vm4, %v492_v36, %v496_v37  ;;  %v502_v56 = vrot.slane %v501_v53, 4  ;;  %v524_v5 = vrot.slane %v522_v62, 5  ;;  %v199_v53 = vld [vmem:[%s5868_s6 + $0x6c] sm:$0xf] }
  0x34   : > { %v1766_v46 = vunpack.c.l.b16 %v497_v40  ;;  %v512_v57 = vrot.slane %v511_v54, 4  ;;  %v548_v23 = vshll.u32 %v195_v19, 16  ;;  %v558_v34 = vshll.u32 %v196_v29, 16  ;;  %v203_v29 = vld [vmem:[%s5868_s6 + $0x7c] sm:$0xf] }
  0x35   : > { %v467_v9 = vor.u32 %v466_v16, %v462_v4  ;;  %v507_v63 = vsel %vm5887_vm4, %v502_v56, %v506_v48  ;;  %v521_v16 = vrot.slane %v519_v61, 4  ;;  %v5999_v56 = vld [vmem:[%s5868_s6 + $0x64] sm:$0xff] }
  0x36   : > { %v517_v0 = vsel %vm5887_vm4, %v512_v57, %v516_v58  ;;  %v1767_v3 = vunpack.c.l.b16 %v507_v63  ;;  %v560_v38 = vrot.slane %v558_v34, 5  ;;  %v582_v58 = vshll.u32 %v199_v53, 16  ;;  %v200_v63 = vld [vmem:[%s5868_s6 + $0x70] sm:$0xf] }
  0x37   : > { %v468_v12 = vrot.slane %v467_v9, 4  ;;  %v1768_v4 = vunpack.c.l.b16 %v517_v0  ;;  %v525_v11 = vor.u32 %v524_v5, %v521_v16  ;;  %v596_v16 = vshrl.u32 %v200_v63, 16 }
  0x38   : > { %v584_v62 = vrot.slane %v582_v58, 5 }
  0x39   : > { %v1888_v9 = vpack.c.b16 %v1768_v4, %v1767_v3  ;;  %v526_v15 = vrot.slane %v525_v11, 4  ;;  %v586_v3 = vshrl.u32 %v199_v53, 16  ;;  %v592_v4 = vshll.u32 %v200_v63, 16  ;;  %v204_v53 = vld [vmem:[%s5868_s6 + $0x80] sm:$0xf] }
  0x3a   : > { %v598_v11 = vrot.slane %v596_v16, 4 }
  0x40   : > { %5177 = vmatmul.msk.bf16.gmra.mxu0 %vm1950_vm1, %v1883_v21  ;;  %v473_v21 = vsel %vm5887_vm4, %v468_v12, %v472_v13  ;;  %v538_v13 = vshll.u32 %v194_v8, 16  ;;  %v588_v8 = vrot.slane %v586_v3, 4 }
  0x41   : > { %v1764_v25 = vunpack.c.l.b16 %v473_v21 }
  0x42   : > { %5580 = vmatmul.msk.bf16.gmra.mxu2 %vm1950_vm1, %v5719_v7 }
  0x43   : > { %5649 = vmatmul.msk.bf16.gmra.mxu3 %vm1950_vm1, %v1885_v6  ;;  %5502 = vmatmul.msk.bf16.gmra.mxu1 %vm1950_vm1, %v5903_v14  ;;  %v477_v14 = vrot.slane %v475_v18, 4  ;;  %v1886_v30 = vpack.c.b16 %v1764_v25, %v1763_v24  ;;  %v540_v18 = vrot.slane %v538_v13, 5  ;;  %v552_v24 = vshrl.u32 %v195_v19, 16 }
  0x44   : > { %v589_v19 = vor.u32 %v588_v8, %v584_v62 }
  0x45   : > { %v481_v32 = vor.u32 %v480_v26, %v477_v14  ;;  %v544_v26 = vrot.slane %v542_v22, 4  ;;  %v554_v28 = vrot.slane %v552_v24, 4 }
  0x46   : > { %v590_v24 = vrot.slane %v589_v19, 4 }
  0x47   : > { %v482_v35 = vrot.slane %v481_v32, 4  ;;  %v545_v32 = vor.u32 %v544_v26, %v540_v18  ;;  %v6028_v26 = vld [vmem:[%s7501_s2] ss:$0 sm:$0xff] }
  0x49   : > { %v487_v39 = vsel %vm5887_vm4, %v482_v35, %v486_v27  ;;  %v550_v27 = vrot.slane %v548_v23, 5  ;;  %v197_v35 = vld [vmem:[%s5868_s6 + $0x64] sm:$0xf]  ;;  %v546_v36 = vrot.slane %v545_v32, 4 }
  0x4a   : > { %v1765_v45 = vunpack.c.l.b16 %v487_v39  ;;  %v198_v39 = vld [vmem:[%s5868_s6 + $0x68] sm:$0xf]  ;;  %v563_v40 = vshrl.u32 %v197_v35, 16  ;;  %v566_v42 = vshll.u32 %v197_v35, 16 }
  0x4b   : > { %v555_v33 = vor.u32 %v554_v28, %v550_v27  ;;  %v572_v43 = vshll.u32 %v198_v39, 16  ;;  %v576_v44 = vshrl.u32 %v198_v39, 16  ;;  %v202_v28 = vld [vmem:[%s5868_s6 + $0x78] sm:$0xf] }
  0x4c   : > { %v565_v47 = vrot.slane %v563_v40, 4  ;;  %v568_v48 = vrot.slane %v566_v42, 5 }
  0x4d   : > { %v556_v37 = vrot.slane %v555_v33, 4 }
  0x4e   : > { %v569_v54 = vor.u32 %v568_v48, %v565_v47 }
  0x50   : > { %5178 = vmatmul.msk.bf16.gmra.mxu0 %vm1950_vm1, %v1884_v51  ;;  %v1887_v51 = vpack.c.b16 %v1766_v46, %v1765_v45  ;;  %v551_v45 = vsel %vm5887_vm4, %v546_v36, %v550_v27  ;;  %v561_v46 = vsel %vm5887_vm4, %v556_v37, %v560_v38  ;;  %v570_v60 = vrot.slane %v569_v54, 4 }
  0x51   : > { %v1771_v49 = vunpack.c.l.b16 %v551_v45  ;;  %v1772_v50 = vunpack.c.l.b16 %v561_v46  ;;  %v607_v36 = vshrl.u32 %v202_v28, 16  ;;  %v616_v37 = vshll.u32 %v203_v29, 16 }
  0x52   : > { %5581 = vmatmul.msk.bf16.gmra.mxu2 %vm1950_vm1, %v5720_v31  ;;  %v620_v38 = vshrl.u32 %v203_v29, 16 }
  0x53   : > { %5650 = vmatmul.msk.bf16.gmra.mxu3 %vm1950_vm1, %v1886_v30  ;;  %5503 = vmatmul.msk.bf16.gmra.mxu1 %vm1950_vm1, %v5718_v52  ;;  %v5721_v52 = vld [vmem:[%s5868_s6 + $0x44] sm:$0xff]  ;;  %v5996_v55 = vpack.c.b16 %v1772_v50, %v1771_v49  ;;  %v609_v46 = vrot.slane %v607_v36, 4  ;;  %v618_v48 = vrot.slane %v616_v37, 5 }
  0x54   : > { %v622_v49 = vrot.slane %v620_v38, 4 }
  0x60   : > { %5179 = vmatmul.msk.bf16.gmra.mxu0 %vm1950_vm1, %v1885_v6  ;;  %v530_v6 = vrot.slane %v528_v1, 5 }
  0x62   : > { %5582 = vmatmul.msk.bf16.gmra.mxu2 %vm1950_vm1, %v5721_v52  ;;  %v531_v20 = vsel %vm5887_vm4, %v526_v15, %v530_v6 }
  0x63   : > { %5651 = vmatmul.msk.bf16.gmra.mxu3 %vm1950_vm1, %v1887_v51  ;;  %5504 = vmatmul.msk.bf16.gmra.mxu1 %vm1950_vm1, %v5719_v7  ;;  %v534_v7 = vrot.slane %v532_v2, 4  ;;  %v1769_v25 = vunpack.c.l.b16 %v531_v20 }
  0x65   : > { %v535_v12 = vor.u32 %v534_v7, %v530_v6 }
  0x67   : > { %v536_v17 = vrot.slane %v535_v12, 4  ;;  %v201_v12 = vld [vmem:[%s5868_s6 + $0x74] sm:$0x1] }
  0x69   : > { %v541_v21 = vsel %vm5887_vm4, %v536_v17, %v540_v18  ;;  %v6016_v18 = vld [vmem:[%s5868_s6 + $0x6c] sm:$0xff] }
  0x6a   : > { %v1770_v14 = vunpack.c.l.b16 %v541_v21  ;;  %v602_v21 = vshll.u32 %v201_v12, 16 }
  0x70   : > { %5180 = vmatmul.msk.bf16.gmra.mxu0 %vm1950_vm1, %v1886_v30  ;;  %v1889_v30 = vpack.c.b16 %v1770_v14, %v1769_v25  ;;  %v604_v14 = vrot.slane %v602_v21, 5 }
  0x72   : > { %5583 = vmatmul.msk.bf16.gmra.mxu2 %vm1950_vm1, %v5722_v10 }
  0x73   : > { %5652 = vmatmul.msk.bf16.gmra.mxu3 %vm1950_vm1, %v1888_v9  ;;  %5505 = vmatmul.msk.bf16.gmra.mxu1 %vm1950_vm1, %v5720_v31  ;;  %v5982_v31 = vld [vmem:[%s5868_s6 + $0x58] sm:$0xff] }
  0x80   : > { %5181 = vmatmul.msk.bf16.gmra.mxu0 %vm1950_vm1, %v1887_v51  ;;  %v574_v51 = vrot.slane %v572_v43, 5 }
  0x82   : > { %5584 = vmatmul.msk.bf16.gmra.mxu2 %vm1950_vm1, %v5982_v31  ;;  %v575_v1 = vsel %vm5887_vm4, %v570_v60, %v574_v51 }
  0x83   : > { %5653 = vmatmul.msk.bf16.gmra.mxu3 %vm1950_vm1, %v1889_v30  ;;  %5506 = vmatmul.msk.bf16.gmra.mxu1 %vm1950_vm1, %v5721_v52  ;;  %v578_v52 = vrot.slane %v576_v44, 4  ;;  %v1773_v6 = vunpack.c.l.b16 %v575_v1  ;;  %v626_v1 = vshll.u32 %v204_v53, 16 }
  0x85   : > { %v579_v57 = vor.u32 %v578_v52, %v574_v51 }
  0x87   : > { %v580_v61 = vrot.slane %v579_v57, 4 }
  0x89   : > { %v585_v2 = vsel %vm5887_vm4, %v580_v61, %v584_v62  ;;  %v6047_v62 = vld [vmem:[%s5868_s6 + $0x78] sm:$0xff] }
  0x8a   : > { %v1774_v7 = vunpack.c.l.b16 %v585_v2 }
  0x8c   : > { %v6013_v13 = vpack.c.b16 %v1774_v7, %v1773_v6  ;;  %v628_v7 = vrot.slane %v626_v1, 5 }
  0x90   : > { %5182 = vmatmul.msk.bf16.gmra.mxu0 %vm1950_vm1, %v1888_v9  ;;  %v3005_v59 = vpop.f32.mrf.mxu1  ;;  %v594_v9 = vrot.slane %v592_v4, 5 }
  0x92   : > { %5585 = vmatmul.msk.bf16.gmra.mxu2 %vm1950_vm1, %v5999_v56  ;;  %v599_v20 = vor.u32 %v598_v11, %v594_v9  ;;  %v595_v34 = vsel %vm5887_vm4, %v590_v24, %v594_v9 }
  0x93   : > { %5654 = vmatmul.msk.bf16.gmra.mxu3 %vm1950_vm1, %v5996_v55  ;;  %5507 = vmatmul.msk.bf16.gmra.mxu1 %vm1950_vm1, %v5722_v10  ;;  %v1775_v44 = vunpack.c.l.b16 %v595_v34 }
  0x94   : > { %v600_v25 = vrot.slane %v599_v20, 4 }
  0x95   : > { %v3361_v0 = vpop.f32.mrf.mxu2 }
  0x96   : > { %v605_v35 = vsel %vm5887_vm4, %v600_v25, %v604_v14 }
  0x97   : > { %v1776_v45 = vunpack.c.l.b16 %v605_v35 }
  0x98   : > { %v3007_v5 = vpop.f32.mrf.mxu1 }
  0x99   : > { %v6044_v61 = vpack.c.b16 %v1776_v45, %v1775_v44  ;;  %v6072_v44 = vld [vmem:[%s5868_s6 + $0x80] sm:$0xff] }
  0x9d   : > { %v2156_v10 = vpop.f32.mrf.mxu0  ;;  %v3363_v15 = vpop.f32.mrf.mxu2 }
  0x9e   : > { %v3006_v17 = vadd.f32 %v3005_v59, %v2156_v10 }
  0xa0   : > { %5183 = vmatmul.msk.bf16.gmra.mxu0 %vm1950_vm1, %v1889_v30  ;;  %v3010_v22 = vpop.f32.mrf.mxu1  ;;  %v3681_v23 = vadd.f32 %v3361_v0, %v3006_v17  ;;  %v623_v0 = vor.u32 %v622_v49, %v618_v48 }
  0xa2   : > { %5586 = vmatmul.msk.bf16.gmra.mxu2 %vm1950_vm1, %v6016_v18  ;;  %v624_v6 = vrot.slane %v623_v0, 4 }
  0xa3   : > { %5655 = vmatmul.msk.bf16.gmra.mxu3 %vm1950_vm1, %v6013_v13  ;;  %5508 = vmatmul.msk.bf16.gmra.mxu1 %vm1950_vm1, %v5982_v31  ;;  %v610_v31 = vshll.u32 %v202_v28, 16 }
  0xa5   : > { %v2158_v27 = vpop.f32.mrf.mxu0  ;;  %v3366_v32 = vpop.f32.mrf.mxu2  ;;  %v612_v47 = vrot.slane %v610_v31, 5 }
  0xa6   : > { %v3885_v30 = vpop.f32.mrf.mxu3  ;;  %v3008_v40 = vadd.f32 %v3007_v5, %v2158_v27  ;;  %v205_v5 = vld [vmem:[%s5868_s6 + $0x84] sm:$0xf] }
  0xa7   : > { %v4205_v33 = vadd.f32 %v3885_v30, %v3681_v23  ;;  %v613_v63 = vor.u32 %v612_v47, %v609_v46  ;;  %v636_v17 = vshll.u32 %v205_v5, 16  ;;  %v640_v19 = vshrl.u32 %v205_v5, 16 }
  0xa8   : > { %v3012_v42 = vpop.f32.mrf.mxu1  ;;  %v3682_v51 = vadd.f32 %v3363_v15, %v3008_v40  ;;  %v630_v15 = vshrl.u32 %v204_v53, 16 }
  0xa9   : > { %v4337_v39 = vadd.f32 %v6028_v26, %v4205_v33  ;;  %v638_v14 = vrot.slane %v636_v17, 5  ;;  %v642_v27 = vrot.slane %v640_v19, 4 }
  0xaa   : > { %v632_v25 = vrot.slane %v630_v15, 4 }
  0xab   : > { %vm4465_vm5 = vcmp.gt.f32.partialorder %v4337_v39, 0.0  ;;  %v4593_v43 = vmul.f32 0.2, %v4337_v39 }
  0xac   : > { %v633_v38 = vor.u32 %v632_v25, %v628_v7 }
  0xad   : > { %v4721_v50 = vsel %vm4465_vm5, %v4337_v39, %v4593_v43  ;;  %v2161_v52 = vpop.f32.mrf.mxu0  ;;  %v3368_v58 = vpop.f32.mrf.mxu2  ;;  %v643_v39 = vor.u32 %v642_v27, %v638_v14 }
  0xae   : > { %v4849_v54 = vpack.c.bf16 %v4721_v50, %v4721_v50  ;;  %v3887_v57 = vpop.f32.mrf.mxu3  ;;  %v3011_v60 = vadd.f32 %v3010_v22, %v2161_v52 }
  0xaf   : > { %v4206_v59 = vadd.f32 %v3887_v57, %v3682_v51  ;;  %v644_v49 = vrot.slane %v643_v39, 4  ;;  %v208_v57 = vld [vmem:[%s5868_s6 + $0x90] sm:$0xf] }
  0xb0   : > { %4978 = vst.msk [vmem:[%s6041_s14] sm:$0xf] %vm4977_vm6, %v4849_v54  ;;  %5184 = vmatmul.msk.bf16.gmra.mxu0 %vm1950_vm1, %v5996_v55  ;;  %v3015_v3 = vpop.f32.mrf.mxu1  ;;  %v3683_v16 = vadd.f32 %v3366_v32, %v3011_v60  ;;  %v614_v55 = vrot.slane %v613_v63, 4  ;;  %v206_v32 = vld [vmem:[%s5868_s6 + $0x88] sm:$0x1] }
  0xb1   : > { %v4338_v2 = vadd.f32 %v6028_v26, %v4206_v59  ;;  %v646_v45 = vshll.u32 %v206_v32, 16 }
  0xb2   : > { %5587 = vmatmul.msk.bf16.gmra.mxu2 %vm1950_vm1, %v6047_v62  ;;  %v619_v21 = vsel %vm5887_vm4, %v614_v55, %v618_v48  ;;  %v634_v48 = vrot.slane %v633_v38, 4 }
  0xb3   : > { %vm4466_vm7 = vcmp.gt.f32.partialorder %v4338_v2, 0.0  ;;  %v4594_v4 = vmul.f32 0.2, %v4338_v2  ;;  %5656 = vmatmul.msk.bf16.gmra.mxu3 %vm1950_vm1, %v6044_v61  ;;  %5509 = vmatmul.msk.bf16.gmra.mxu1 %vm1950_vm1, %v5999_v56  ;;  %v629_v56 = vsel %vm5887_vm4, %v624_v6, %v628_v7  ;;  %v1777_v29 = vunpack.c.l.b16 %v619_v21 }
  0xb4   : > { %v1778_v30 = vunpack.c.l.b16 %v629_v56  ;;  %v648_v52 = vrot.slane %v646_v45, 5  ;;  %v639_v63 = vsel %vm5887_vm4, %v634_v48, %v638_v14  ;;  %v6098_v14 = vld [vmem:[%s5868_s6 + $0x8c] sm:$0xff] }
  0xb5   : > { %v4722_v8 = vsel %vm4466_vm7, %v4338_v2, %v4594_v4  ;;  %v2163_v9 = vpop.f32.mrf.mxu0  ;;  %v3371_v10 = vpop.f32.mrf.mxu2  ;;  %v660_v4 = vshll.u32 %v208_v57, 16  ;;  %v1779_v6 = vunpack.c.l.b16 %v639_v63 }
  0xb6   : > { %v4850_v11 = vpack.c.bf16 %v4722_v8, %v4722_v8  ;;  %v3890_v12 = vpop.f32.mrf.mxu3  ;;  %v3013_v23 = vadd.f32 %v3012_v42, %v2163_v9  ;;  %v6069_v43 = vpack.c.b16 %v1778_v30, %v1777_v29  ;;  %v649_v1 = vsel %vm5887_vm4, %v644_v49, %v648_v52 }
  0xb7   : > { %v4207_v20 = vadd.f32 %v3890_v12, %v3683_v16  ;;  %v1780_v7 = vunpack.c.l.b16 %v649_v1  ;;  %v662_v12 = vrot.slane %v660_v4, 5 }
  0xb8   : > { %4979 = vst.msk [vmem:[%s6041_s14 + $0x4] sm:$0xf] %vm4977_vm6, %v4850_v11  ;;  %v3017_v24 = vpop.f32.mrf.mxu1  ;;  %v3684_v34 = vadd.f32 %v3368_v58, %v3013_v23 }
  0xb9   : > { %v4339_v22 = vadd.f32 %v6028_v26, %v4207_v20  ;;  %v209_v20 = vld [vmem:[%s5868_s6 + $0x94] sm:$0xf]  ;;  %v6095_v25 = vpack.c.b16 %v1780_v7, %v1779_v6 }
  0xba   : > { %v670_v29 = vshll.u32 %v209_v20, 16  ;;  %v674_v45 = vshrl.u32 %v209_v20, 16  ;;  %v6123_v7 = vld [vmem:[%s5868_s6 + $0x94] sm:$0xff] }
  0xbb   : > { %vm4467_vm8 = vcmp.gt.f32.partialorder %v4339_v22, 0.0  ;;  %v4595_v28 = vmul.f32 0.2, %v4339_v22 }
  0xbd   : > { %v4723_v33 = vsel %vm4467_vm8, %v4339_v22, %v4595_v28  ;;  %v2166_v35 = vpop.f32.mrf.mxu0  ;;  %v3373_v37 = vpop.f32.mrf.mxu2 }
  0xbe   : > { %v4851_v36 = vpack.c.bf16 %v4723_v33, %v4723_v33  ;;  %v3892_v31 = vpop.f32.mrf.mxu3  ;;  %v3016_v42 = vadd.f32 %v3015_v3, %v2166_v35 }
  0xbf   : > { %v4208_v40 = vadd.f32 %v3892_v31, %v3684_v34  ;;  %v672_v31 = vrot.slane %v670_v29, 5 }
  0xc0   : > { %4980 = vst.msk [vmem:[%s6041_s14 + $0x8] sm:$0xf] %vm4977_vm6, %v4851_v36  ;;  %5185 = vmatmul.msk.bf16.gmra.mxu0 %vm1950_vm1, %v6013_v13  ;;  %v3020_v47 = vpop.f32.mrf.mxu1  ;;  %v3685_v51 = vadd.f32 %v3371_v10, %v3016_v42  ;;  %v207_v13 = vld [vmem:[%s5868_s6 + $0x8c] sm:$0xf]  ;;  %v210_v36 = vld [vmem:[%s5868_s6 + $0x98] sm:$0xf] }
  0xc1   : > { %v4340_v46 = vadd.f32 %v6028_v26, %v4208_v40  ;;  %v651_v2 = vshrl.u32 %v207_v13, 16  ;;  %v654_v3 = vshll.u32 %v207_v13, 16  ;;  %v684_v49 = vshrl.u32 %v210_v36, 16 }
  0xc2   : > { %5588 = vmatmul.msk.bf16.gmra.mxu2 %vm1950_vm1, %v6072_v44 }
  0xc3   : > { %vm4468_vm9 = vcmp.gt.f32.partialorder %v4340_v46, 0.0  ;;  %v4596_v50 = vmul.f32 0.2, %v4340_v46  ;;  %5657 = vmatmul.msk.bf16.gmra.mxu3 %vm1950_vm1, %v6069_v43  ;;  %5510 = vmatmul.msk.bf16.gmra.mxu1 %vm1950_vm1, %v6016_v18  ;;  %v664_v18 = vshrl.u32 %v208_v57, 16  ;;  %v653_v9 = vrot.slane %v651_v2, 4 }
  0xc4   : > { %v656_v11 = vrot.slane %v654_v3, 5 }
  0xc5   : > { %v4724_v53 = vsel %vm4468_vm9, %v4340_v46, %v4596_v50  ;;  %v2168_v54 = vpop.f32.mrf.mxu0  ;;  %v3376_v60 = vpop.f32.mrf.mxu2  ;;  %v666_v10 = vrot.slane %v664_v18, 4  ;;  %v680_v46 = vshll.u32 %v210_v36, 16 }
  0xc6   : > { %v4852_v58 = vpack.c.bf16 %v4724_v53, %v4724_v53  ;;  %v3895_v59 = vpop.f32.mrf.mxu3  ;;  %v3018_v5 = vadd.f32 %v3017_v24, %v2168_v54  ;;  %v657_v27 = vor.u32 %v656_v11, %v653_v9  ;;  %v676_v53 = vrot.slane %v674_v45, 4 }
  0xc7   : > { %v4209_v0 = vadd.f32 %v3895_v59, %v3685_v51  ;;  %v667_v28 = vor.u32 %v666_v10, %v662_v12  ;;  %v682_v54 = vrot.slane %v680_v46, 5  ;;  %v211_v59 = vld [vmem:[%s5868_s6 + $0x9c] sm:$0x1] }
  0xc8   : > { %4981 = vst.msk [vmem:[%s6041_s14 + $0xc] sm:$0xf] %vm4977_vm6, %v4852_v58  ;;  %v3022_v55 = vpop.f32.mrf.mxu1  ;;  %v3686_v17 = vadd.f32 %v3373_v37, %v3018_v5  ;;  %v658_v35 = vrot.slane %v657_v27, 4  ;;  %v677_v18 = vor.u32 %v676_v53, %v672_v31  ;;  %v6149_v53 = vld [vmem:[%s5868_s6 + $0xa0] sm:$0xff] }
  0xc9   : > { %v4341_v16 = vadd.f32 %v6028_v26, %v4209_v0 }
  0xca   : > { %v663_v48 = vsel %vm5887_vm4, %v658_v35, %v662_v12  ;;  %v678_v12 = vrot.slane %v677_v18, 4 }
  0xcb   : > { %vm4469_vm10 = vcmp.gt.f32.partialorder %v4341_v16, 0.0  ;;  %v4597_v8 = vmul.f32 0.2, %v4341_v16  ;;  %v1781_v13 = vunpack.c.l.b16 %v663_v48  ;;  %v214_v48 = vld [vmem:[%s5868_s6 + $0xa8] sm:$0xf] }
  0xcc   : > { %v683_v27 = vsel %vm5887_vm4, %v678_v12, %v682_v54 }
  0xcd   : > { %v4725_v15 = vsel %vm4469_vm10, %v4341_v16, %v4597_v8  ;;  %v2171_v19 = vpop.f32.mrf.mxu0  ;;  %v3378_v22 = vpop.f32.mrf.mxu2  ;;  %v690_v16 = vshll.u32 %v211_v59, 16 }
  0xce   : > { %v4853_v21 = vpack.c.bf16 %v4725_v15, %v4725_v15  ;;  %v3897_v56 = vpop.f32.mrf.mxu3  ;;  %v3021_v24 = vadd.f32 %v3020_v47, %v2171_v19 }
  0xcf   : > { %v4210_v23 = vadd.f32 %v3897_v56, %v3686_v17  ;;  %v692_v10 = vrot.slane %v690_v16, 5  ;;  %v213_v56 = vld [vmem:[%s5868_s6 + $0xa4] sm:$0xf] }
  0xd0   : > { %4982 = vst.msk [vmem:[%s6041_s14 + $0x10] sm:$0xf] %vm4977_vm6, %v4853_v21  ;;  %5186 = vmatmul.msk.bf16.gmra.mxu0 %vm1950_vm1, %v6044_v61  ;;  %v3025_v32 = vpop.f32.mrf.mxu1  ;;  %v3687_v34 = vadd.f32 %v3376_v60, %v3021_v24  ;;  %v668_v61 = vrot.slane %v667_v28, 4  ;;  %v686_v60 = vrot.slane %v684_v49, 4 }
  0xd1   : > { %v4342_v30 = vadd.f32 %v6028_v26, %v4210_v23 }
  0xd2   : > { %5589 = vmatmul.msk.bf16.gmra.mxu2 %vm1950_vm1, %v6098_v14  ;;  %v687_v8 = vor.u32 %v686_v60, %v682_v54 }
  0xd3   : > { %vm4470_vm11 = vcmp.gt.f32.partialorder %v4342_v30, 0.0  ;;  %v4598_v33 = vmul.f32 0.2, %v4342_v30  ;;  %5658 = vmatmul.msk.bf16.gmra.mxu3 %vm1950_vm1, %v6095_v25  ;;  %5511 = vmatmul.msk.bf16.gmra.mxu1 %vm1950_vm1, %v6047_v62  ;;  %v673_v62 = vsel %vm5887_vm4, %v668_v61, %v672_v31  ;;  %v1783_v61 = vunpack.c.l.b16 %v683_v27 }
  0xd4   : > { %v1782_v58 = vunpack.c.l.b16 %v673_v62  ;;  %v688_v19 = vrot.slane %v687_v8, 4  ;;  %v718_v8 = vshrl.u32 %v214_v48, 16 }
  0xd5   : > { %v4726_v37 = vsel %vm4470_vm11, %v4342_v30, %v4598_v33  ;;  %v2173_v38 = vpop.f32.mrf.mxu0  ;;  %v3381_v42 = vpop.f32.mrf.mxu2  ;;  %v704_v33 = vshll.u32 %v213_v56, 16 }
  0xd6   : > { %v4854_v39 = vpack.c.bf16 %v4726_v37, %v4726_v37  ;;  %v3900_v40 = vpop.f32.mrf.mxu3  ;;  %v3023_v51 = vadd.f32 %v3022_v55, %v2173_v38  ;;  %v6120_v6 = vpack.c.b16 %v1782_v58, %v1781_v13  ;;  %v693_v29 = vsel %vm5887_vm4, %v688_v19, %v692_v10 }
  0xd7   : > { %v4211_v47 = vadd.f32 %v3900_v40, %v3687_v34  ;;  %v1784_v31 = vunpack.c.l.b16 %v693_v29  ;;  %v706_v40 = vrot.slane %v704_v33, 5  ;;  %v714_v58 = vshll.u32 %v214_v48, 16 }
  0xd8   : > { %4983 = vst.msk [vmem:[%s6041_s14 + $0x14] sm:$0xf] %vm4977_vm6, %v4854_v39  ;;  %v3027_v52 = vpop.f32.mrf.mxu1  ;;  %v3688_v0 = vadd.f32 %v3378_v22, %v3023_v51 }
  0xd9   : > { %v4343_v50 = vadd.f32 %v6028_v26, %v4211_v47  ;;  %v6146_v13 = vpack.c.b16 %v1784_v31, %v1783_v61  ;;  %v6174_v31 = vld [vmem:[%s5868_s6 + $0xa8] sm:$0xff] }
  0xdb   : > { %vm4471_vm12 = vcmp.gt.f32.partialorder %v4343_v50, 0.0  ;;  %v4599_v57 = vmul.f32 0.2, %v4343_v50 }
  0xdd   : > { %v4727_v63 = vsel %vm4471_vm12, %v4343_v50, %v4599_v57  ;;  %v2176_v1 = vpop.f32.mrf.mxu0  ;;  %v3383_v4 = vpop.f32.mrf.mxu2 }
  0xde   : > { %v4855_v2 = vpack.c.bf16 %v4727_v63, %v4727_v63  ;;  %v3902_v3 = vpop.f32.mrf.mxu3  ;;  %v3026_v55 = vadd.f32 %v3025_v32, %v2176_v1 }
  0xdf   : > { %v4212_v5 = vadd.f32 %v3902_v3, %v3688_v0  ;;  %v716_v3 = vrot.slane %v714_v58, 5 }
  0xe0   : > { %4984 = vst.msk [vmem:[%s6041_s14 + $0x18] sm:$0xf] %vm4977_vm6, %v4855_v2  ;;  %5187 = vmatmul.msk.bf16.gmra.mxu0 %vm1950_vm1, %v6069_v43  ;;  %v3030_v11 = vpop.f32.mrf.mxu1  ;;  %v3689_v17 = vadd.f32 %v3381_v42, %v3026_v55  ;;  %v212_v43 = vld [vmem:[%s5868_s6 + $0xa0] sm:$0xf]  ;;  %v215_v2 = vld [vmem:[%s5868_s6 + $0xac] sm:$0xf] }
  0xe1   : > { %v4344_v9 = vadd.f32 %v6028_v26, %v4212_v5  ;;  %v695_v30 = vshrl.u32 %v212_v43, 16  ;;  %v698_v32 = vshll.u32 %v212_v43, 16  ;;  %v728_v10 = vshrl.u32 %v215_v2, 16 }
  0xe2   : > { %5590 = vmatmul.msk.bf16.gmra.mxu2 %vm1950_vm1, %v6123_v7 }
  0xe3   : > { %vm4472_vm13 = vcmp.gt.f32.partialorder %v4344_v9, 0.0  ;;  %v4600_v15 = vmul.f32 0.2, %v4344_v9  ;;  %5659 = vmatmul.msk.bf16.gmra.mxu3 %vm1950_vm1, %v6120_v6  ;;  %5512 = vmatmul.msk.bf16.gmra.mxu1 %vm1950_vm1, %v6072_v44  ;;  %v708_v44 = vshrl.u32 %v213_v56, 16  ;;  %v697_v38 = vrot.slane %v695_v30, 4 }
  0xe4   : > { %v700_v39 = vrot.slane %v698_v32, 5 }
  0xe5   : > { %v4728_v20 = vsel %vm4472_vm13, %v4344_v9, %v4600_v15  ;;  %v2178_v21 = vpop.f32.mrf.mxu0  ;;  %v3386_v24 = vpop.f32.mrf.mxu2  ;;  %v710_v42 = vrot.slane %v708_v44, 4  ;;  %v724_v9 = vshll.u32 %v215_v2, 16 }
  0xe6   : > { %v4856_v22 = vpack.c.bf16 %v4728_v20, %v4728_v20  ;;  %v3905_v23 = vpop.f32.mrf.mxu3  ;;  %v3028_v35 = vadd.f32 %v3027_v52, %v2178_v21  ;;  %v701_v54 = vor.u32 %v700_v39, %v697_v38  ;;  %v720_v20 = vrot.slane %v718_v8, 4 }
  0xe7   : > { %v4213_v28 = vadd.f32 %v3905_v23, %v3689_v17  ;;  %v711_v57 = vor.u32 %v710_v42, %v706_v40  ;;  %v726_v21 = vrot.slane %v724_v9, 5  ;;  %v216_v23 = vld [vmem:[%s5868_s6 + $0xb0] sm:$0x1] }
  0xe8   : > { %4985 = vst.msk [vmem:[%s6041_s14 + $0x1c] sm:$0xf] %vm4977_vm6, %v4856_v22  ;;  %v3032_v36 = vpop.f32.mrf.mxu1  ;;  %v3690_v46 = vadd.f32 %v3383_v4, %v3028_v35  ;;  %v702_v1 = vrot.slane %v701_v54, 4  ;;  %v721_v44 = vor.u32 %v720_v20, %v716_v3  ;;  %v6200_v20 = vld [vmem:[%s5868_s6 + $0xb4] sm:$0xff] }
  0xe9   : > { %v4345_v34 = vadd.f32 %v6028_v26, %v4213_v28 }
  0xea   : > { %v707_v12 = vsel %vm5887_vm4, %v702_v1, %v706_v40  ;;  %v722_v40 = vrot.slane %v721_v44, 4 }
  0xeb   : > { %vm4473_vm14 = vcmp.gt.f32.partialorder %v4345_v34, 0.0  ;;  %v4601_v37 = vmul.f32 0.2, %v4345_v34  ;;  %v1785_v43 = vunpack.c.l.b16 %v707_v12  ;;  %v219_v12 = vld [vmem:[%s5868_s6 + $0xbc] sm:$0xf] }
  0xec   : > { %v727_v54 = vsel %vm5887_vm4, %v722_v40, %v726_v21 }
  0xed   : > { %v4729_v45 = vsel %vm4473_vm14, %v4345_v34, %v4601_v37  ;;  %v2181_v47 = vpop.f32.mrf.mxu0  ;;  %v3388_v50 = vpop.f32.mrf.mxu2  ;;  %v734_v34 = vshll.u32 %v216_v23, 16 }
  0xee   : > { %v4857_v49 = vpack.c.bf16 %v4729_v45, %v4729_v45  ;;  %v3907_v62 = vpop.f32.mrf.mxu3  ;;  %v3031_v52 = vadd.f32 %v3030_v11, %v2181_v47 }
  0xef   : > { %v4214_v51 = vadd.f32 %v3907_v62, %v3690_v46  ;;  %v736_v42 = vrot.slane %v734_v34, 5  ;;  %v218_v62 = vld [vmem:[%s5868_s6 + $0xb8] sm:$0xf] }
  0xf0   : > { %4986 = vst.msk [vmem:[%s6041_s14 + $0x20] sm:$0xf] %vm4977_vm6, %v4857_v49  ;;  %5188 = vmatmul.msk.bf16.gmra.mxu0 %vm1950_vm1, %v6095_v25  ;;  %v3035_v60 = vpop.f32.mrf.mxu1  ;;  %v3691_v0 = vadd.f32 %v3386_v24, %v3031_v52  ;;  %v712_v25 = vrot.slane %v711_v57, 4  ;;  %v730_v24 = vrot.slane %v728_v10, 4 }
  0xf1   : > { %v4346_v59 = vadd.f32 %v6028_v26, %v4214_v51 }
  0xf2   : > { %5591 = vmatmul.msk.bf16.gmra.mxu2 %vm1950_vm1, %v6149_v53  ;;  %v731_v37 = vor.u32 %v730_v24, %v726_v21 }
  0xf3   : > { %vm4474_vm15 = vcmp.gt.f32.partialorder %v4346_v59, 0.0  ;;  %v4602_v63 = vmul.f32 0.2, %v4346_v59  ;;  %5660 = vmatmul.msk.bf16.gmra.mxu3 %vm1950_vm1, %v6146_v13  ;;  %5513 = vmatmul.msk.bf16.gmra.mxu1 %vm1950_vm1, %v6098_v14  ;;  %v717_v14 = vsel %vm5887_vm4, %v712_v25, %v716_v3  ;;  %v1787_v25 = vunpack.c.l.b16 %v727_v54 }
  0xf4   : > { %v1786_v22 = vunpack.c.l.b16 %v717_v14  ;;  %v732_v47 = vrot.slane %v731_v37, 4  ;;  %v762_v37 = vshrl.u32 %v219_v12, 16 }
  0xf5   : > { %v4730_v4 = vsel %vm4474_vm15, %v4346_v59, %v4602_v63  ;;  %v2183_v18 = vpop.f32.mrf.mxu0  ;;  %v3391_v55 = vpop.f32.mrf.mxu2  ;;  %v748_v63 = vshll.u32 %v218_v62, 16 }
  0xf6   : > { %v4858_v16 = vpack.c.bf16 %v4730_v4, %v4730_v4  ;;  %v3910_v5 = vpop.f32.mrf.mxu3  ;;  %v3033_v17 = vadd.f32 %v3032_v36, %v2183_v18  ;;  %v6171_v61 = vpack.c.b16 %v1786_v22, %v1785_v43  ;;  %v737_v58 = vsel %vm5887_vm4, %v732_v47, %v736_v42 }
  0xf7   : > { %v4215_v11 = vadd.f32 %v3910_v5, %v3691_v0  ;;  %v1788_v3 = vunpack.c.l.b16 %v737_v58  ;;  %v750_v5 = vrot.slane %v748_v63, 5  ;;  %v758_v22 = vshll.u32 %v219_v12, 16 }
  0xf8   : > { %4987 = vst.msk [vmem:[%s6041_s14 + $0x24] sm:$0xf] %vm4977_vm6, %v4858_v16  ;;  %v3037_v19 = vpop.f32.mrf.mxu1  ;;  %v3692_v28 = vadd.f32 %v3388_v50, %v3033_v17 }
  0xf9   : > { %v4347_v15 = vadd.f32 %v6028_v26, %v4215_v11  ;;  %v6197_v43 = vpack.c.b16 %v1788_v3, %v1787_v25  ;;  %v6225_v3 = vld [vmem:[%s5868_s6 + $0xbc] sm:$0xff] }
  0xfb   : > { %vm4475_vm0 = vcmp.gt.f32.partialorder %v4347_v15, 0.0  ;;  %v4603_v56 = vmul.f32 0.2, %v4347_v15 }
  0xfd   : > { %v4731_v27 = vsel %vm4475_vm0, %v4347_v15, %v4603_v56  ;;  %v2186_v29 = vpop.f32.mrf.mxu0  ;;  %v3393_v33 = vpop.f32.mrf.mxu2 }
  0xfe   : > { %v4859_v30 = vpack.c.bf16 %v4731_v27, %v4731_v27  ;;  %v3912_v32 = vpop.f32.mrf.mxu3  ;;  %v3036_v36 = vadd.f32 %v3035_v60, %v2186_v29 }
  0xff   : > { %v4216_v35 = vadd.f32 %v3912_v32, %v3692_v28  ;;  %v760_v32 = vrot.slane %v758_v22, 5 }
 0x100   : > { %4988 = vst.msk [vmem:[%s6041_s14 + $0x28] sm:$0xf] %vm4977_vm6, %v4859_v30  ;;  %5189 = vmatmul.msk.bf16.gmra.mxu0 %vm1950_vm1, %v6120_v6  ;;  %v3040_v39 = vpop.f32.mrf.mxu1  ;;  %v3693_v46 = vadd.f32 %v3391_v55, %v3036_v36  ;;  %v217_v6 = vld [vmem:[%s5868_s6 + $0xb4] sm:$0xf]  ;;  %v220_v30 = vld [vmem:[%s5868_s6 + $0xc0] sm:$0xf] }
 0x101   : > { %v4348_v38 = vadd.f32 %v6028_v26, %v4216_v35  ;;  %v739_v59 = vshrl.u32 %v217_v6, 16  ;;  %v742_v60 = vshll.u32 %v217_v6, 16  ;;  %v772_v42 = vshrl.u32 %v220_v30, 16 }
 0x102   : > { %5592 = vmatmul.msk.bf16.gmra.mxu2 %vm1950_vm1, %v6174_v31 }
 0x103   : > { %vm4476_vm2 = vcmp.gt.f32.partialorder %v4348_v38, 0.0  ;;  %v4604_v45 = vmul.f32 0.2, %v4348_v38  ;;  %5661 = vmatmul.msk.bf16.gmra.mxu3 %vm1950_vm1, %v6171_v61  ;;  %5514 = vmatmul.msk.bf16.gmra.mxu1 %vm1950_vm1, %v6123_v7  ;;  %v752_v7 = vshrl.u32 %v218_v62, 16  ;;  %v741_v18 = vrot.slane %v739_v59, 4 }
 0x104   : > { %v744_v16 = vrot.slane %v742_v60, 5 }
 0x105   : > { %v4732_v48 = vsel %vm4476_vm2, %v4348_v38, %v4604_v45  ;;  %v2188_v49 = vpop.f32.mrf.mxu0  ;;  %v3396_v52 = vpop.f32.mrf.mxu2  ;;  %v754_v55 = vrot.slane %v752_v7, 4  ;;  %v768_v38 = vshll.u32 %v220_v30, 16 }
 0x106   : > { %v4860_v50 = vpack.c.bf16 %v4732_v48, %v4732_v48  ;;  %v3915_v51 = vpop.f32.mrf.mxu3  ;;  %v3038_v1 = vadd.f32 %v3037_v19, %v2188_v49  ;;  %v745_v21 = vor.u32 %v744_v16, %v741_v18  ;;  %v764_v48 = vrot.slane %v762_v37, 4 }
 0x107   : > { %v4217_v57 = vadd.f32 %v3915_v51, %v3693_v46  ;;  %v755_v56 = vor.u32 %v754_v55, %v750_v5  ;;  %v770_v49 = vrot.slane %v768_v38, 5  ;;  %v221_v51 = vld [vmem:[%s5868_s6 + $0xc4] sm:$0x1] }
 0x108   : > { %4989 = vst.msk [vmem:[%s6041_s14 + $0x2c] sm:$0xf] %vm4977_vm6, %v4860_v50  ;;  %v3042_v2 = vpop.f32.mrf.mxu1  ;;  %v3694_v9 = vadd.f32 %v3393_v33, %v3038_v1  ;;  %v746_v29 = vrot.slane %v745_v21, 4  ;;  %v765_v7 = vor.u32 %v764_v48, %v760_v32  ;;  %v6251_v48 = vld [vmem:[%s5868_s6 + $0xc8] sm:$0xff] }
 0x109   : > { %v4349_v0 = vadd.f32 %v6028_v26, %v4217_v57 }
 0x10a   : > { %v751_v40 = vsel %vm5887_vm4, %v746_v29, %v750_v5  ;;  %v766_v5 = vrot.slane %v765_v7, 4 }
 0x10b   : > { %vm4477_vm3 = vcmp.gt.f32.partialorder %v4349_v0, 0.0  ;;  %v4605_v4 = vmul.f32 0.2, %v4349_v0  ;;  %v1789_v6 = vunpack.c.l.b16 %v751_v40  ;;  %v224_v40 = vld [vmem:[%s5868_s6 + $0xd0] sm:$0xf] }
 0x10c   : > { %v771_v21 = vsel %vm5887_vm4, %v766_v5, %v770_v49 }
 0x10d   : > { %v4733_v8 = vsel %vm4477_vm3, %v4349_v0, %v4605_v4  ;;  %v2191_v11 = vpop.f32.mrf.mxu0  ;;  %v3398_v15 = vpop.f32.mrf.mxu2  ;;  %v778_v0 = vshll.u32 %v221_v51, 16 }
 0x10e   : > { %v4861_v10 = vpack.c.bf16 %v4733_v8, %v4733_v8  ;;  %v3917_v14 = vpop.f32.mrf.mxu3  ;;  %v3041_v19 = vadd.f32 %v3040_v39, %v2191_v11 }
 0x10f   : > { %v4218_v17 = vadd.f32 %v3917_v14, %v3694_v9  ;;  %v780_v55 = vrot.slane %v778_v0, 5  ;;  %v223_v14 = vld [vmem:[%s5868_s6 + $0xcc] sm:$0xf] }
 0x110   : > { %4990 = vst.msk [vmem:[%s6041_s14 + $0x30] sm:$0xf] %vm4977_vm6, %v4861_v10  ;;  %5190 = vmatmul.msk.bf16.gmra.mxu0 %vm1950_vm1, %v6146_v13  ;;  %v3045_v24 = vpop.f32.mrf.mxu1  ;;  %v3695_v28 = vadd.f32 %v3396_v52, %v3041_v19  ;;  %v756_v13 = vrot.slane %v755_v56, 4  ;;  %v774_v52 = vrot.slane %v772_v42, 4 }
 0x111   : > { %v4350_v23 = vadd.f32 %v6028_v26, %v4218_v17 }
 0x112   : > { %5593 = vmatmul.msk.bf16.gmra.mxu2 %vm1950_vm1, %v6200_v20  ;;  %v775_v4 = vor.u32 %v774_v52, %v770_v49 }
 0x113   : > { %vm4478_vm5 = vcmp.gt.f32.partialorder %v4350_v23, 0.0  ;;  %v4606_v27 = vmul.f32 0.2, %v4350_v23  ;;  %5662 = vmatmul.msk.bf16.gmra.mxu3 %vm1950_vm1, %v6197_v43  ;;  %5515 = vmatmul.msk.bf16.gmra.mxu1 %vm1950_vm1, %v6149_v53  ;;  %v761_v53 = vsel %vm5887_vm4, %v756_v13, %v760_v32  ;;  %v1791_v13 = vunpack.c.l.b16 %v771_v21 }
 0x114   : > { %v1790_v50 = vunpack.c.l.b16 %v761_v53  ;;  %v776_v11 = vrot.slane %v775_v4, 4  ;;  %v806_v4 = vshrl.u32 %v224_v40, 16 }
 0x115   : > { %v4734_v33 = vsel %vm4478_vm5, %v4350_v23, %v4606_v27  ;;  %v2193_v44 = vpop.f32.mrf.mxu0  ;;  %v3401_v36 = vpop.f32.mrf.mxu2  ;;  %v792_v27 = vshll.u32 %v223_v14, 16 }
 0x116   : > { %v4862_v34 = vpack.c.bf16 %v4734_v33, %v4734_v33  ;;  %v3920_v35 = vpop.f32.mrf.mxu3  ;;  %v3043_v46 = vadd.f32 %v3042_v2, %v2193_v44  ;;  %v6222_v25 = vpack.c.b16 %v1790_v50, %v1789_v6  ;;  %v781_v22 = vsel %vm5887_vm4, %v776_v11, %v780_v55 }
 0x117   : > { %v4219_v39 = vadd.f32 %v3920_v35, %v3695_v28  ;;  %v1792_v32 = vunpack.c.l.b16 %v781_v22  ;;  %v794_v35 = vrot.slane %v792_v27, 5  ;;  %v802_v50 = vshll.u32 %v224_v40, 16 }
 0x118   : > { %4991 = vst.msk [vmem:[%s6041_s14 + $0x34] sm:$0xf] %vm4977_vm6, %v4862_v34  ;;  %v3047_v47 = vpop.f32.mrf.mxu1  ;;  %v3696_v57 = vadd.f32 %v3398_v15, %v3043_v46 }
 0x119   : > { %v4351_v45 = vadd.f32 %v6028_v26, %v4219_v39  ;;  %v6248_v6 = vpack.c.b16 %v1792_v32, %v1791_v13  ;;  %v6276_v32 = vld [vmem:[%s5868_s6 + $0xd0] sm:$0xff] }
 0x11b   : > { %vm4479_vm7 = vcmp.gt.f32.partialorder %v4351_v45, 0.0  ;;  %v4607_v62 = vmul.f32 0.2, %v4351_v45 }
 0x11d   : > { %v4735_v54 = vsel %vm4479_vm7, %v4351_v45, %v4607_v62  ;;  %v2196_v58 = vpop.f32.mrf.mxu0  ;;  %v3403_v63 = vpop.f32.mrf.mxu2 }
 0x11e   : > { %v4863_v59 = vpack.c.bf16 %v4735_v54, %v4735_v54  ;;  %v3922_v60 = vpop.f32.mrf.mxu3  ;;  %v3046_v2 = vadd.f32 %v3045_v24, %v2196_v58 }
 0x11f   : > { %v4220_v1 = vadd.f32 %v3922_v60, %v3696_v57  ;;  %v804_v60 = vrot.slane %v802_v50, 5 }
 0x120   : > { %4992 = vst.msk [vmem:[%s6041_s14 + $0x38] sm:$0xf] %vm4977_vm6, %v4863_v59  ;;  %5191 = vmatmul.msk.bf16.gmra.mxu0 %vm1950_vm1, %v6171_v61  ;;  %v3050_v16 = vpop.f32.mrf.mxu1  ;;  %v3697_v9 = vadd.f32 %v3401_v36, %v3046_v2  ;;  %v222_v61 = vld [vmem:[%s5868_s6 + $0xc8] sm:$0xf]  ;;  %v225_v59 = vld [vmem:[%s5868_s6 + $0xd4] sm:$0xf] }
 0x121   : > { %v4352_v18 = vadd.f32 %v6028_v26, %v4220_v1  ;;  %v783_v23 = vshrl.u32 %v222_v61, 16  ;;  %v786_v24 = vshll.u32 %v222_v61, 16  ;;  %v816_v55 = vshrl.u32 %v225_v59, 16 }
 0x122   : > { %5594 = vmatmul.msk.bf16.gmra.mxu2 %vm1950_vm1, %v6225_v3 }
 0x123   : > { %vm4480_vm8 = vcmp.gt.f32.partialorder %v4352_v18, 0.0  ;;  %v4608_v8 = vmul.f32 0.2, %v4352_v18  ;;  %5663 = vmatmul.msk.bf16.gmra.mxu3 %vm1950_vm1, %v6222_v25  ;;  %5516 = vmatmul.msk.bf16.gmra.mxu1 %vm1950_vm1, %v6174_v31  ;;  %v796_v31 = vshrl.u32 %v223_v14, 16  ;;  %v785_v44 = vrot.slane %v783_v23, 4 }
 0x124   : > { %v788_v34 = vrot.slane %v786_v24, 5 }
 0x125   : > { %v4736_v12 = vsel %vm4480_vm8, %v4352_v18, %v4608_v8  ;;  %v2198_v10 = vpop.f32.mrf.mxu0  ;;  %v3406_v19 = vpop.f32.mrf.mxu2  ;;  %v798_v36 = vrot.slane %v796_v31, 4  ;;  %v812_v18 = vshll.u32 %v225_v59, 16 }
 0x126   : > { %v4864_v15 = vpack.c.bf16 %v4736_v12, %v4736_v12  ;;  %v3925_v17 = vpop.f32.mrf.mxu3  ;;  %v3048_v29 = vadd.f32 %v3047_v47, %v2198_v10  ;;  %v789_v49 = vor.u32 %v788_v34, %v785_v44  ;;  %v808_v12 = vrot.slane %v806_v4, 4 }
 0x127   : > { %v4221_v56 = vadd.f32 %v3925_v17, %v3697_v9  ;;  %v799_v62 = vor.u32 %v798_v36, %v794_v35  ;;  %v814_v10 = vrot.slane %v812_v18, 5  ;;  %v226_v17 = vld [vmem:[%s5868_s6 + $0xd8] sm:$0x1] }
 0x128   : > { %4993 = vst.msk [vmem:[%s6041_s14 + $0x3c] sm:$0xf] %vm4977_vm6, %v4864_v15  ;;  %v3052_v30 = vpop.f32.mrf.mxu1  ;;  %v3698_v38 = vadd.f32 %v3403_v63, %v3048_v29  ;;  %v790_v58 = vrot.slane %v789_v49, 4  ;;  %v809_v31 = vor.u32 %v808_v12, %v804_v60  ;;  %v6307_v12 = vld [vmem:[%s5868_s6 + $0xdc] sm:$0xff] }
 0x129   : > { %v4353_v28 = vadd.f32 %v6028_v26, %v4221_v56 }
 0x12a   : > { %v795_v5 = vsel %vm5887_vm4, %v790_v58, %v794_v35  ;;  %v810_v35 = vrot.slane %v809_v31, 4 }
 0x12b   : > { %vm4481_vm9 = vcmp.gt.f32.partialorder %v4353_v28, 0.0  ;;  %v4609_v33 = vmul.f32 0.2, %v4353_v28  ;;  %v1793_v61 = vunpack.c.l.b16 %v795_v5  ;;  %v229_v5 = vld [vmem:[%s5868_s6 + $0xe4] sm:$0xf] }
 0x12d   : > { %v4737_v37 = vsel %vm4481_vm9, %v4353_v28, %v4609_v33  ;;  %v2201_v39 = vpop.f32.mrf.mxu0  ;;  %v3408_v45 = vpop.f32.mrf.mxu2  ;;  %v822_v28 = vshll.u32 %v226_v17, 16 }
 0x12e   : > { %v4865_v42 = vpack.c.bf16 %v4737_v37, %v4737_v37  ;;  %v3927_v53 = vpop.f32.mrf.mxu3  ;;  %v3051_v47 = vadd.f32 %v3050_v16, %v2201_v39 }
 0x12f   : > { %v4222_v46 = vadd.f32 %v3927_v53, %v3698_v38  ;;  %v824_v36 = vrot.slane %v822_v28, 5 }
 0x130   : > { %4994 = vst.msk [vmem:[%s6041_s14 + $0x40] sm:$0xf] %vm4977_vm6, %v4865_v42  ;;  %5192 = vmatmul.msk.bf16.gmra.mxu0 %vm1950_vm1, %v6197_v43  ;;  %v3055_v52 = vpop.f32.mrf.mxu1  ;;  %v3699_v57 = vadd.f32 %v3406_v19, %v3051_v47  ;;  %v800_v43 = vrot.slane %v799_v62, 4  ;;  %v818_v19 = vrot.slane %v816_v55, 4  ;;  %v228_v42 = vld [vmem:[%s5868_s6 + $0xe0] sm:$0xf]  ;;  %v815_v47 = vsel %vm5887_vm4, %v810_v35, %v814_v10 }
 0x131   : > { %v4354_v51 = vadd.f32 %v6028_v26, %v4222_v46 }
 0x132   : > { %5595 = vmatmul.msk.bf16.gmra.mxu2 %vm1950_vm1, %v6251_v48  ;;  %v819_v33 = vor.u32 %v818_v19, %v814_v10 }
 0x133   : > { %vm4482_vm10 = vcmp.gt.f32.partialorder %v4354_v51, 0.0  ;;  %v4610_v54 = vmul.f32 0.2, %v4354_v51  ;;  %5664 = vmatmul.msk.bf16.gmra.mxu3 %vm1950_vm1, %v6248_v6  ;;  %5517 = vmatmul.msk.bf16.gmra.mxu1 %vm1950_vm1, %v6200_v20  ;;  %v805_v20 = vsel %vm5887_vm4, %v800_v43, %v804_v60  ;;  %v1795_v43 = vunpack.c.l.b16 %v815_v47 }
 0x134   : > { %v1794_v15 = vunpack.c.l.b16 %v805_v20  ;;  %v820_v39 = vrot.slane %v819_v33, 4  ;;  %v850_v33 = vshrl.u32 %v229_v5, 16 }
 0x135   : > { %v4738_v63 = vsel %vm4482_vm10, %v4354_v51, %v4610_v54  ;;  %v2203_v7 = vpop.f32.mrf.mxu0  ;;  %v3411_v2 = vpop.f32.mrf.mxu2  ;;  %v6300_v54 = vld [vmem:[%s7501_s2] ss:$0 sm:$0xff] }
 0x136   : > { %v4866_v0 = vpack.c.bf16 %v4738_v63, %v4738_v63  ;;  %v3930_v1 = vpop.f32.mrf.mxu3  ;;  %v3053_v9 = vadd.f32 %v3052_v30, %v2203_v7  ;;  %v6273_v13 = vpack.c.b16 %v1794_v15, %v1793_v61  ;;  %v825_v62 = vsel %vm5887_vm4, %v820_v39, %v824_v36 }
 0x137   : > { %v4223_v16 = vadd.f32 %v3930_v1, %v3699_v57  ;;  %v1796_v60 = vunpack.c.l.b16 %v825_v62  ;;  %v846_v15 = vshll.u32 %v229_v5, 16 }
 0x138   : > { %4995 = vst.msk [vmem:[%s6041_s14 + $0x44] sm:$0xf] %vm4977_vm6, %v4866_v0  ;;  %v3057_v11 = vpop.f32.mrf.mxu1  ;;  %v3700_v56 = vadd.f32 %v3408_v45, %v3053_v9 }
 0x139   : > { %v4355_v8 = vadd.f32 %v6028_v26, %v4223_v16  ;;  %v6304_v61 = vpack.c.b16 %v1796_v60, %v1795_v43  ;;  %v6332_v60 = vld [vmem:[%s5868_s6 + $0xe4] sm:$0xff] }
 0x13b   : > { %vm4483_vm11 = vcmp.gt.f32.partialorder %v4355_v8, 0.0  ;;  %v4611_v14 = vmul.f32 0.2, %v4355_v8 }
 0x13d   : > { %v4739_v21 = vsel %vm4483_vm11, %v4355_v8, %v4611_v14  ;;  %v2206_v22 = vpop.f32.mrf.mxu0  ;;  %v3413_v27 = vpop.f32.mrf.mxu2 }
 0x13e   : > { %v4867_v23 = vpack.c.bf16 %v4739_v21, %v4739_v21  ;;  %v3932_v24 = vpop.f32.mrf.mxu3  ;;  %v3056_v30 = vadd.f32 %v3055_v52, %v2206_v22  ;;  %v836_v52 = vshll.u32 %v228_v42, 16 }
 0x13f   : > { %v4224_v29 = vadd.f32 %v3932_v24, %v3700_v56  ;;  %v848_v24 = vrot.slane %v846_v15, 5 }
 0x140   : > { %4996 = vst.msk [vmem:[%s6041_s14 + $0x48] sm:$0xf] %vm4977_vm6, %v4867_v23  ;;  %5193 = vmatmul.msk.bf16.gmra.mxu0 %vm1950_vm1, %v6222_v25  ;;  %v3060_v34 = vpop.f32.mrf.mxu1  ;;  %v3701_v38 = vadd.f32 %v3411_v2, %v3056_v30  ;;  %v227_v25 = vld [vmem:[%s5868_s6 + $0xdc] sm:$0xf]  ;;  %v838_v1 = vrot.slane %v836_v52, 5 }
 0x141   : > { %v4356_v44 = vadd.f32 %v6028_v26, %v4224_v29  ;;  %v827_v50 = vshrl.u32 %v227_v25, 16  ;;  %v830_v51 = vshll.u32 %v227_v25, 16  ;;  %v230_v23 = vld [vmem:[%s5868_s6 + $0xe8] sm:$0xf] }
 0x142   : > { %5596 = vmatmul.msk.bf16.gmra.mxu2 %vm1950_vm1, %v6276_v32  ;;  %v860_v36 = vshrl.u32 %v230_v23, 16 }
 0x143   : > { %vm4484_vm12 = vcmp.gt.f32.partialorder %v4356_v44, 0.0  ;;  %v4612_v37 = vmul.f32 0.2, %v4356_v44  ;;  %5665 = vmatmul.msk.bf16.gmra.mxu3 %vm1950_vm1, %v6273_v13  ;;  %5518 = vmatmul.msk.bf16.gmra.mxu1 %vm1950_vm1, %v6225_v3  ;;  %v840_v3 = vshrl.u32 %v228_v42, 16  ;;  %v829_v7 = vrot.slane %v827_v50, 4 }
 0x144   : > { %v832_v0 = vrot.slane %v830_v51, 5 }
 0x145   : > { %v4740_v40 = vsel %vm4484_vm12, %v4356_v44, %v4612_v37  ;;  %v2208_v26 = vpop.f32.mrf.mxu0  ;;  %v3416_v46 = vpop.f32.mrf.mxu2  ;;  %v842_v2 = vrot.slane %v840_v3, 4  ;;  %v856_v44 = vshll.u32 %v230_v23, 16 }
 0x146   : > { %v4868_v53 = vpack.c.bf16 %v4740_v40, %v4740_v40  ;;  %v3935_v45 = vpop.f32.mrf.mxu3  ;;  %v3058_v58 = vadd.f32 %v3057_v11, %v2208_v26  ;;  %v833_v10 = vor.u32 %v832_v0, %v829_v7  ;;  %v852_v40 = vrot.slane %v850_v33, 4 }
 0x147   : > { %v4225_v49 = vadd.f32 %v3935_v45, %v3701_v38  ;;  %v843_v14 = vor.u32 %v842_v2, %v838_v1  ;;  %v858_v26 = vrot.slane %v856_v44, 5  ;;  %v231_v45 = vld [vmem:[%s5868_s6 + $0xec] sm:$0x1] }
 0x148   : > { %4997 = vst.msk [vmem:[%s6041_s14 + $0x4c] sm:$0xf] %vm4977_vm6, %v4868_v53  ;;  %v3062_v59 = vpop.f32.mrf.mxu1  ;;  %v3702_v18 = vadd.f32 %v3413_v27, %v3058_v58  ;;  %v834_v22 = vrot.slane %v833_v10, 4  ;;  %v853_v3 = vor.u32 %v852_v40, %v848_v24  ;;  %v6358_v40 = vld [vmem:[%s5868_s6 + $0xf0] sm:$0xff] }
 0x149   : > { %v4357_v57 = vadd.f32 %v6300_v54, %v4225_v49 }
 0x14a   : > { %v839_v35 = vsel %vm5887_vm4, %v834_v22, %v838_v1  ;;  %v854_v1 = vrot.slane %v853_v3, 4 }
 0x14b   : > { %vm4485_vm13 = vcmp.gt.f32.partialorder %v4357_v57, 0.0  ;;  %v4613_v63 = vmul.f32 0.2, %v4357_v57  ;;  %v1797_v25 = vunpack.c.l.b16 %v839_v35  ;;  %v234_v35 = vld [vmem:[%s5868_s6 + $0xf8] sm:$0xf] }
 0x14c   : > { %v859_v10 = vsel %vm5887_vm4, %v854_v1, %v858_v26 }
 0x14d   : > { %v4741_v4 = vsel %vm4485_vm13, %v4357_v57, %v4613_v63  ;;  %v2211_v16 = vpop.f32.mrf.mxu0  ;;  %v3418_v8 = vpop.f32.mrf.mxu2  ;;  %v866_v57 = vshll.u32 %v231_v45, 16 }
 0x14e   : > { %v4869_v55 = vpack.c.bf16 %v4741_v4, %v4741_v4  ;;  %v3937_v20 = vpop.f32.mrf.mxu3  ;;  %v3061_v11 = vadd.f32 %v3060_v34, %v2211_v16 }
 0x14f   : > { %v4226_v9 = vadd.f32 %v3937_v20, %v3702_v18  ;;  %v868_v2 = vrot.slane %v866_v57, 5  ;;  %v233_v20 = vld [vmem:[%s5868_s6 + $0xf4] sm:$0xf] }
 0x150   : > { %4998 = vst.msk [vmem:[%s6041_s14 + $0x50] sm:$0xf] %vm4977_vm6, %v4869_v55  ;;  %5194 = vmatmul.msk.bf16.gmra.mxu0 %vm1950_vm1, %v6248_v6  ;;  %v3065_v19 = vpop.f32.mrf.mxu1  ;;  %v3703_v56 = vadd.f32 %v3416_v46, %v3061_v11  ;;  %v844_v6 = vrot.slane %v843_v14, 4  ;;  %v862_v46 = vrot.slane %v860_v36, 4 }
 0x151   : > { %v4358_v17 = vadd.f32 %v6300_v54, %v4226_v9 }
 0x152   : > { %5597 = vmatmul.msk.bf16.gmra.mxu2 %vm1950_vm1, %v6307_v12  ;;  %v863_v63 = vor.u32 %v862_v46, %v858_v26 }
 0x153   : > { %vm4486_vm14 = vcmp.gt.f32.partialorder %v4358_v17, 0.0  ;;  %v4614_v21 = vmul.f32 0.2, %v4358_v17  ;;  %5666 = vmatmul.msk.bf16.gmra.mxu3 %vm1950_vm1, %v6304_v61  ;;  %5519 = vmatmul.msk.bf16.gmra.mxu1 %vm1950_vm1, %v6251_v48  ;;  %v849_v48 = vsel %vm5887_vm4, %v844_v6, %v848_v24  ;;  %v1799_v6 = vunpack.c.l.b16 %v859_v10 }
 0x154   : > { %v1798_v53 = vunpack.c.l.b16 %v849_v48  ;;  %v864_v16 = vrot.slane %v863_v63, 4  ;;  %v894_v63 = vshrl.u32 %v234_v35, 16 }
 0x155   : > { %v4742_v27 = vsel %vm4486_vm14, %v4358_v17, %v4614_v21  ;;  %v2213_v31 = vpop.f32.mrf.mxu0  ;;  %v3421_v30 = vpop.f32.mrf.mxu2  ;;  %v880_v21 = vshll.u32 %v233_v20, 16 }
 0x156   : > { %v4870_v28 = vpack.c.bf16 %v4742_v27, %v4742_v27  ;;  %v3940_v29 = vpop.f32.mrf.mxu3  ;;  %v3063_v38 = vadd.f32 %v3062_v59, %v2213_v31  ;;  %v6329_v43 = vpack.c.b16 %v1798_v53, %v1797_v25  ;;  %v869_v15 = vsel %vm5887_vm4, %v864_v16, %v868_v2 }
 0x157   : > { %v4227_v34 = vadd.f32 %v3940_v29, %v3703_v56  ;;  %v1800_v24 = vunpack.c.l.b16 %v869_v15  ;;  %v882_v29 = vrot.slane %v880_v21, 5  ;;  %v890_v53 = vshll.u32 %v234_v35, 16 }
 0x158   : > { %4999 = vst.msk [vmem:[%s6041_s14 + $0x54] sm:$0xf] %vm4977_vm6, %v4870_v28  ;;  %v3067_v39 = vpop.f32.mrf.mxu1  ;;  %v3704_v49 = vadd.f32 %v3418_v8, %v3063_v38 }
 0x159   : > { %v4359_v37 = vadd.f32 %v6300_v54, %v4227_v34  ;;  %v6355_v25 = vpack.c.b16 %v1800_v24, %v1799_v6  ;;  %v6383_v24 = vld [vmem:[%s5868_s6 + $0xf8] sm:$0xff] }
 0x15b   : > { %vm4487_vm15 = vcmp.gt.f32.partialorder %v4359_v37, 0.0  ;;  %v4615_v42 = vmul.f32 0.2, %v4359_v37 }
 0x15d   : > { %v4743_v47 = vsel %vm4487_vm15, %v4359_v37, %v4615_v42  ;;  %v2216_v62 = vpop.f32.mrf.mxu0  ;;  %v3423_v52 = vpop.f32.mrf.mxu2 }
 0x15e   : > { %v4871_v50 = vpack.c.bf16 %v4743_v47, %v4743_v47  ;;  %v3942_v51 = vpop.f32.mrf.mxu3  ;;  %v3066_v59 = vadd.f32 %v3065_v19, %v2216_v62 }
 0x15f   : > { %v4228_v58 = vadd.f32 %v3942_v51, %v3704_v49  ;;  %v892_v51 = vrot.slane %v890_v53, 5 }
 0x160   : > { %5000 = vst.msk [vmem:[%s6041_s14 + $0x58] sm:$0xf] %vm4977_vm6, %v4871_v50  ;;  %5195 = vmatmul.msk.bf16.gmra.mxu0 %vm1950_vm1, %v6273_v13  ;;  %v3070_v0 = vpop.f32.mrf.mxu1  ;;  %v3705_v18 = vadd.f32 %v3421_v30, %v3066_v59  ;;  %v232_v13 = vld [vmem:[%s5868_s6 + $0xf0] sm:$0xf]  ;;  %v235_v50 = vld [vmem:[%s5868_s6 + $0xfc] sm:$0xf] }
 0x161   : > { %v4360_v7 = vadd.f32 %v6300_v54, %v4228_v58  ;;  %v871_v17 = vshrl.u32 %v232_v13, 16  ;;  %v874_v19 = vshll.u32 %v232_v13, 16  ;;  %v904_v2 = vshrl.u32 %v235_v50, 16 }
 0x162   : > { %5598 = vmatmul.msk.bf16.gmra.mxu2 %vm1950_vm1, %v6332_v60 }
 0x163   : > { %vm4488_vm0 = vcmp.gt.f32.partialorder %v4360_v7, 0.0  ;;  %v4616_v4 = vmul.f32 0.2, %v4360_v7  ;;  %5667 = vmatmul.msk.bf16.gmra.mxu3 %vm1950_vm1, %v6329_v43  ;;  %5520 = vmatmul.msk.bf16.gmra.mxu1 %vm1950_vm1, %v6276_v32  ;;  %v884_v32 = vshrl.u32 %v233_v20, 16  ;;  %v873_v31 = vrot.slane %v871_v17, 4 }
 0x164   : > { %v876_v28 = vrot.slane %v874_v19, 5 }
 0x165   : > { %v4744_v5 = vsel %vm4488_vm0, %v4360_v7, %v4616_v4  ;;  %v2218_v55 = vpop.f32.mrf.mxu0  ;;  %v3426_v11 = vpop.f32.mrf.mxu2  ;;  %v886_v30 = vrot.slane %v884_v32, 4  ;;  %v900_v7 = vshll.u32 %v235_v50, 16 }
 0x166   : > { %v4872_v8 = vpack.c.bf16 %v4744_v5, %v4744_v5  ;;  %v3945_v9 = vpop.f32.mrf.mxu3  ;;  %v3068_v22 = vadd.f32 %v3067_v39, %v2218_v55  ;;  %v877_v26 = vor.u32 %v876_v28, %v873_v31  ;;  %v896_v5 = vrot.slane %v894_v63, 4 }
 0x167   : > { %v4229_v14 = vadd.f32 %v3945_v9, %v3705_v18  ;;  %v887_v42 = vor.u32 %v886_v30, %v882_v29  ;;  %v902_v55 = vrot.slane %v900_v7, 5  ;;  %v236_v9 = vld [vmem:[%s5868_s6 + $0x100] sm:$0x1] }
 0x168   : > { %5001 = vst.msk [vmem:[%s6041_s14 + $0x5c] sm:$0xf] %vm4977_vm6, %v4872_v8  ;;  %v3072_v23 = vpop.f32.mrf.mxu1  ;;  %v3706_v44 = vadd.f32 %v3423_v52, %v3068_v22  ;;  %v878_v62 = vrot.slane %v877_v26, 4  ;;  %v897_v32 = vor.u32 %v896_v5, %v892_v51  ;;  %v6409_v5 = vld [vmem:[%s5868_s6 + $0x104] sm:$0xff] }
 0x169   : > { %v4361_v56 = vadd.f32 %v6300_v54, %v4229_v14 }
 0x16a   : > { %v883_v1 = vsel %vm5887_vm4, %v878_v62, %v882_v29  ;;  %v898_v29 = vrot.slane %v897_v32, 4 }
 0x16b   : > { %vm4489_vm2 = vcmp.gt.f32.partialorder %v4361_v56, 0.0  ;;  %v4617_v27 = vmul.f32 0.2, %v4361_v56  ;;  %v1801_v13 = vunpack.c.l.b16 %v883_v1  ;;  %v239_v1 = vld [vmem:[%s5868_s6 + $0x10c] sm:$0xf] }
 0x16c   : > { %v903_v26 = vsel %vm5887_vm4, %v898_v29, %v902_v55 }
 0x16d   : > { %v4745_v33 = vsel %vm4489_vm2, %v4361_v56, %v4617_v27  ;;  %v2221_v34 = vpop.f32.mrf.mxu0  ;;  %v3428_v37 = vpop.f32.mrf.mxu2  ;;  %v910_v56 = vshll.u32 %v236_v9, 16 }
 0x16e   : > { %v4873_v36 = vpack.c.bf16 %v4745_v33, %v4745_v33  ;;  %v3947_v48 = vpop.f32.mrf.mxu3  ;;  %v3071_v39 = vadd.f32 %v3070_v0, %v2221_v34 }
 0x16f   : > { %v4230_v38 = vadd.f32 %v3947_v48, %v3706_v44  ;;  %v912_v30 = vrot.slane %v910_v56, 5  ;;  %v238_v48 = vld [vmem:[%s5868_s6 + $0x108] sm:$0xf] }
 0x170   : > { %5002 = vst.msk [vmem:[%s6041_s14 + $0x60] sm:$0xf] %vm4977_vm6, %v4873_v36  ;;  %5196 = vmatmul.msk.bf16.gmra.mxu0 %vm1950_vm1, %v6304_v61  ;;  %v3075_v46 = vpop.f32.mrf.mxu1  ;;  %v3707_v49 = vadd.f32 %v3426_v11, %v3071_v39  ;;  %v888_v61 = vrot.slane %v887_v42, 4  ;;  %v906_v11 = vrot.slane %v904_v2, 4 }
 0x171   : > { %v4362_v45 = vadd.f32 %v6300_v54, %v4230_v38 }
 0x172   : > { %5599 = vmatmul.msk.bf16.gmra.mxu2 %vm1950_vm1, %v6358_v40  ;;  %v907_v27 = vor.u32 %v906_v11, %v902_v55 }
 0x173   : > { %vm4490_vm3 = vcmp.gt.f32.partialorder %v4362_v45, 0.0  ;;  %v4618_v47 = vmul.f32 0.2, %v4362_v45  ;;  %5668 = vmatmul.msk.bf16.gmra.mxu3 %vm1950_vm1, %v6355_v25  ;;  %5521 = vmatmul.msk.bf16.gmra.mxu1 %vm1950_vm1, %v6307_v12  ;;  %v893_v12 = vsel %vm5887_vm4, %v888_v61, %v892_v51  ;;  %v1803_v61 = vunpack.c.l.b16 %v903_v26 }
 0x174   : > { %v1802_v8 = vunpack.c.l.b16 %v893_v12  ;;  %v908_v34 = vrot.slane %v907_v27, 4  ;;  %v938_v27 = vshrl.u32 %v239_v1, 16 }
 0x175   : > { %v4746_v52 = vsel %vm4490_vm3, %v4362_v45, %v4618_v47  ;;  %v2223_v3 = vpop.f32.mrf.mxu0  ;;  %v3431_v59 = vpop.f32.mrf.mxu2  ;;  %v924_v47 = vshll.u32 %v238_v48, 16 }
 0x176   : > { %v4874_v57 = vpack.c.bf16 %v4746_v52, %v4746_v52  ;;  %v3950_v58 = vpop.f32.mrf.mxu3  ;;  %v3073_v18 = vadd.f32 %v3072_v23, %v2223_v3  ;;  %v6380_v6 = vpack.c.b16 %v1802_v8, %v1801_v13  ;;  %v913_v53 = vsel %vm5887_vm4, %v908_v34, %v912_v30 }
 0x177   : > { %v4231_v0 = vadd.f32 %v3950_v58, %v3707_v49  ;;  %v1804_v51 = vunpack.c.l.b16 %v913_v53  ;;  %v926_v58 = vrot.slane %v924_v47, 5  ;;  %v934_v8 = vshll.u32 %v239_v1, 16 }
 0x178   : > { %5003 = vst.msk [vmem:[%s6041_s14 + $0x64] sm:$0xf] %vm4977_vm6, %v4874_v57  ;;  %v3077_v16 = vpop.f32.mrf.mxu1  ;;  %v3708_v14 = vadd.f32 %v3428_v37, %v3073_v18 }
 0x179   : > { %v4363_v4 = vadd.f32 %v6300_v54, %v4231_v0  ;;  %v6406_v13 = vpack.c.b16 %v1804_v51, %v1803_v61  ;;  %v6434_v51 = vld [vmem:[%s5868_s6 + $0x10c] sm:$0xff] }
 0x17b   : > { %vm4491_vm5 = vcmp.gt.f32.partialorder %v4363_v4, 0.0  ;;  %v4619_v20 = vmul.f32 0.2, %v4363_v4 }
 0x17d   : > { %v4747_v10 = vsel %vm4491_vm5, %v4363_v4, %v4619_v20  ;;  %v2226_v15 = vpop.f32.mrf.mxu0  ;;  %v3433_v21 = vpop.f32.mrf.mxu2 }
 0x17e   : > { %v4875_v17 = vpack.c.bf16 %v4747_v10, %v4747_v10  ;;  %v3952_v19 = vpop.f32.mrf.mxu3  ;;  %v3076_v23 = vadd.f32 %v3075_v46, %v2226_v15 }
 0x17f   : > { %v4232_v22 = vadd.f32 %v3952_v19, %v3708_v14  ;;  %v936_v19 = vrot.slane %v934_v8, 5 }
 0x180   : > { %5004 = vst.msk [vmem:[%s6041_s14 + $0x68] sm:$0xf] %vm4977_vm6, %v4875_v17  ;;  %5197 = vmatmul.msk.bf16.gmra.mxu0 %vm1950_vm1, %v6329_v43  ;;  %v3080_v28 = vpop.f32.mrf.mxu1  ;;  %v3709_v44 = vadd.f32 %v3431_v59, %v3076_v23  ;;  %v237_v43 = vld [vmem:[%s5868_s6 + $0x104] sm:$0xf]  ;;  %v240_v17 = vld [vmem:[%s5868_s6 + $0x110] sm:$0xf] }
 0x181   : > { %v4364_v31 = vadd.f32 %v6300_v54, %v4232_v22  ;;  %v915_v45 = vshrl.u32 %v237_v43, 16  ;;  %v918_v46 = vshll.u32 %v237_v43, 16  ;;  %v948_v30 = vshrl.u32 %v240_v17, 16 }
 0x182   : > { %5600 = vmatmul.msk.bf16.gmra.mxu2 %vm1950_vm1, %v6383_v24 }
 0x183   : > { %vm4492_vm7 = vcmp.gt.f32.partialorder %v4364_v31, 0.0  ;;  %v4620_v33 = vmul.f32 0.2, %v4364_v31  ;;  %5669 = vmatmul.msk.bf16.gmra.mxu3 %vm1950_vm1, %v6380_v6  ;;  %5522 = vmatmul.msk.bf16.gmra.mxu1 %vm1950_vm1, %v6332_v60  ;;  %v928_v60 = vshrl.u32 %v238_v48, 16  ;;  %v917_v3 = vrot.slane %v915_v45, 4 }
 0x184   : > { %v920_v57 = vrot.slane %v918_v46, 5 }
 0x185   : > { %v4748_v35 = vsel %vm4492_vm7, %v4364_v31, %v4620_v33  ;;  %v2228_v36 = vpop.f32.mrf.mxu0  ;;  %v3436_v39 = vpop.f32.mrf.mxu2  ;;  %v930_v59 = vrot.slane %v928_v60, 4  ;;  %v944_v31 = vshll.u32 %v240_v17, 16 }
 0x186   : > { %v4876_v37 = vpack.c.bf16 %v4748_v35, %v4748_v35  ;;  %v3955_v38 = vpop.f32.mrf.mxu3  ;;  %v3078_v62 = vadd.f32 %v3077_v16, %v2228_v36  ;;  %v921_v55 = vor.u32 %v920_v57, %v917_v3  ;;  %v940_v35 = vrot.slane %v938_v27, 4 }
 0x187   : > { %v4233_v42 = vadd.f32 %v3955_v38, %v3709_v44  ;;  %v931_v20 = vor.u32 %v930_v59, %v926_v58  ;;  %v946_v36 = vrot.slane %v944_v31, 5  ;;  %v241_v38 = vld [vmem:[%s5868_s6 + $0x114] sm:$0x1] }
 0x188   : > { %5005 = vst.msk [vmem:[%s6041_s14 + $0x6c] sm:$0xf] %vm4977_vm6, %v4876_v37  ;;  %v3082_v50 = vpop.f32.mrf.mxu1  ;;  %v3710_v7 = vadd.f32 %v3433_v21, %v3078_v62  ;;  %v922_v15 = vrot.slane %v921_v55, 4  ;;  %v941_v60 = vor.u32 %v940_v35, %v936_v19  ;;  %v6460_v35 = vld [vmem:[%s5868_s6 + $0x118] sm:$0xff] }
 0x189   : > { %v4365_v49 = vadd.f32 %v6300_v54, %v4233_v42 }
 0x18a   : > { %v927_v29 = vsel %vm5887_vm4, %v922_v15, %v926_v58  ;;  %v942_v58 = vrot.slane %v941_v60, 4 }
 0x18b   : > { %vm4493_vm8 = vcmp.gt.f32.partialorder %v4365_v49, 0.0  ;;  %v4621_v52 = vmul.f32 0.2, %v4365_v49  ;;  %v1805_v43 = vunpack.c.l.b16 %v927_v29  ;;  %v244_v29 = vld [vmem:[%s5868_s6 + $0x120] sm:$0xf] }
 0x18c   : > { %v947_v55 = vsel %vm5887_vm4, %v942_v58, %v946_v36 }
 0x18d   : > { %v4749_v63 = vsel %vm4493_vm8, %v4365_v49, %v4621_v52  ;;  %v2231_v0 = vpop.f32.mrf.mxu0  ;;  %v3438_v4 = vpop.f32.mrf.mxu2  ;;  %v954_v49 = vshll.u32 %v241_v38, 16 }
 0x18e   : > { %v4877_v2 = vpack.c.bf16 %v4749_v63, %v4749_v63  ;;  %v3957_v12 = vpop.f32.mrf.mxu3  ;;  %v3081_v16 = vadd.f32 %v3080_v28, %v2231_v0 }
 0x18f   : > { %v4234_v18 = vadd.f32 %v3957_v12, %v3710_v7  ;;  %v956_v59 = vrot.slane %v954_v49, 5  ;;  %v243_v12 = vld [vmem:[%s5868_s6 + $0x11c] sm:$0xf] }
 0x190   : > { %5006 = vst.msk [vmem:[%s6041_s14 + $0x70] sm:$0xf] %vm4977_vm6, %v4877_v2  ;;  %5198 = vmatmul.msk.bf16.gmra.mxu0 %vm1950_vm1, %v6355_v25  ;;  %v3085_v11 = vpop.f32.mrf.mxu1  ;;  %v3711_v14 = vadd.f32 %v3436_v39, %v3081_v16  ;;  %v932_v25 = vrot.slane %v931_v20, 4  ;;  %v950_v39 = vrot.slane %v948_v30, 4 }
 0x191   : > { %v4366_v9 = vadd.f32 %v6300_v54, %v4234_v18 }
 0x192   : > { %5601 = vmatmul.msk.bf16.gmra.mxu2 %vm1950_vm1, %v6409_v5  ;;  %v951_v52 = vor.u32 %v950_v39, %v946_v36 }
 0x193   : > { %vm4494_vm9 = vcmp.gt.f32.partialorder %v4366_v9, 0.0  ;;  %v4622_v10 = vmul.f32 0.2, %v4366_v9  ;;  %5670 = vmatmul.msk.bf16.gmra.mxu3 %vm1950_vm1, %v6406_v13  ;;  %5523 = vmatmul.msk.bf16.gmra.mxu1 %vm1950_vm1, %v6358_v40  ;;  %v937_v40 = vsel %vm5887_vm4, %v932_v25, %v936_v19  ;;  %v1807_v25 = vunpack.c.l.b16 %v947_v55 }
 0x194   : > { %v1806_v37 = vunpack.c.l.b16 %v937_v40  ;;  %v952_v0 = vrot.slane %v951_v52, 4  ;;  %v982_v52 = vshrl.u32 %v244_v29, 16 }
 0x195   : > { %v4750_v21 = vsel %vm4494_vm9, %v4366_v9, %v4622_v10  ;;  %v2233_v32 = vpop.f32.mrf.mxu0  ;;  %v3441_v23 = vpop.f32.mrf.mxu2  ;;  %v968_v10 = vshll.u32 %v243_v12, 16 }
 0x196   : > { %v4878_v56 = vpack.c.bf16 %v4750_v21, %v4750_v21  ;;  %v3960_v22 = vpop.f32.mrf.mxu3  ;;  %v3083_v44 = vadd.f32 %v3082_v50, %v2233_v32  ;;  %v6431_v61 = vpack.c.b16 %v1806_v37, %v1805_v43  ;;  %v957_v8 = vsel %vm5887_vm4, %v952_v0, %v956_v59 }
 0x197   : > { %v4235_v28 = vadd.f32 %v3960_v22, %v3711_v14  ;;  %v1808_v19 = vunpack.c.l.b16 %v957_v8  ;;  %v970_v22 = vrot.slane %v968_v10, 5  ;;  %v978_v37 = vshll.u32 %v244_v29, 16 }
 0x198   : > { %5007 = vst.msk [vmem:[%s6041_s14 + $0x74] sm:$0xf] %vm4977_vm6, %v4878_v56  ;;  %v3087_v34 = vpop.f32.mrf.mxu1  ;;  %v3712_v42 = vadd.f32 %v3438_v4, %v3083_v44 }
 0x199   : > { %v4367_v33 = vadd.f32 %v6300_v54, %v4235_v28  ;;  %v6457_v43 = vpack.c.b16 %v1808_v19, %v1807_v25  ;;  %v6485_v19 = vld [vmem:[%s5868_s6 + $0x120] sm:$0xff] }
 0x19b   : > { %vm4495_vm10 = vcmp.gt.f32.partialorder %v4367_v33, 0.0  ;;  %v4623_v48 = vmul.f32 0.2, %v4367_v33 }
 0x19d   : > { %v4751_v26 = vsel %vm4495_vm10, %v4367_v33, %v4623_v48  ;;  %v2236_v53 = vpop.f32.mrf.mxu0  ;;  %v3443_v47 = vpop.f32.mrf.mxu2 }
 0x19e   : > { %v4879_v45 = vpack.c.bf16 %v4751_v26, %v4751_v26  ;;  %v3962_v46 = vpop.f32.mrf.mxu3  ;;  %v3086_v50 = vadd.f32 %v3085_v11, %v2236_v53 }
 0x19f   : > { %v4236_v62 = vadd.f32 %v3962_v46, %v3712_v42  ;;  %v980_v46 = vrot.slane %v978_v37, 5 }
 0x1a0   : > { %5008 = vst.msk [vmem:[%s6041_s14 + $0x78] sm:$0xf] %vm4977_vm6, %v4879_v45  ;;  %5199 = vmatmul.msk.bf16.gmra.mxu0 %vm1950_vm1, %v6380_v6  ;;  %v3090_v57 = vpop.f32.mrf.mxu1  ;;  %v3713_v7 = vadd.f32 %v3441_v23, %v3086_v50  ;;  %v242_v6 = vld [vmem:[%s5868_s6 + $0x118] sm:$0xf]  ;;  %v245_v45 = vld [vmem:[%s5868_s6 + $0x124] sm:$0xf] }
 0x1a1   : > { %v4368_v3 = vadd.f32 %v6300_v54, %v4236_v62  ;;  %v959_v9 = vshrl.u32 %v242_v6, 16  ;;  %v962_v11 = vshll.u32 %v242_v6, 16  ;;  %v992_v59 = vshrl.u32 %v245_v45, 16 }
 0x1a2   : > { %5602 = vmatmul.msk.bf16.gmra.mxu2 %vm1950_vm1, %v6434_v51 }
 0x1a3   : > { %vm4496_vm11 = vcmp.gt.f32.partialorder %v4368_v3, 0.0  ;;  %v4624_v63 = vmul.f32 0.2, %v4368_v3  ;;  %5671 = vmatmul.msk.bf16.gmra.mxu3 %vm1950_vm1, %v6431_v61  ;;  %5524 = vmatmul.msk.bf16.gmra.mxu1 %vm1950_vm1, %v6383_v24  ;;  %v972_v24 = vshrl.u32 %v243_v12, 16  ;;  %v961_v32 = vrot.slane %v959_v9, 4 }
 0x1a4   : > { %v964_v56 = vrot.slane %v962_v11, 5 }
 0x1a5   : > { %v4752_v1 = vsel %vm4496_vm11, %v4368_v3, %v4624_v63  ;;  %v2238_v2 = vpop.f32.mrf.mxu0  ;;  %v3446_v16 = vpop.f32.mrf.mxu2  ;;  %v974_v23 = vrot.slane %v972_v24, 4  ;;  %v988_v3 = vshll.u32 %v245_v45, 16 }
 0x1a6   : > { %v4880_v4 = vpack.c.bf16 %v4752_v1, %v4752_v1  ;;  %v3965_v18 = vpop.f32.mrf.mxu3  ;;  %v3088_v15 = vadd.f32 %v3087_v34, %v2238_v2  ;;  %v965_v36 = vor.u32 %v964_v56, %v961_v32  ;;  %v984_v1 = vrot.slane %v982_v52, 4 }
 0x1a7   : > { %v4237_v20 = vadd.f32 %v3965_v18, %v3713_v7  ;;  %v975_v48 = vor.u32 %v974_v23, %v970_v22  ;;  %v990_v2 = vrot.slane %v988_v3, 5  ;;  %v246_v18 = vld [vmem:[%s5868_s6 + $0x128] sm:$0x1] }
 0x1a8   : > { %5009 = vst.msk [vmem:[%s6041_s14 + $0x7c] sm:$0xf] %vm4977_vm6, %v4880_v4  ;;  %v3092_v17 = vpop.f32.mrf.mxu1  ;;  %v3714_v31 = vadd.f32 %v3443_v47, %v3088_v15  ;;  %v966_v53 = vrot.slane %v965_v36, 4  ;;  %v985_v24 = vor.u32 %v984_v1, %v980_v46  ;;  %v6511_v1 = vld [vmem:[%s5868_s6 + $0x12c] sm:$0xff] }
 0x1a9   : > { %v4369_v14 = vadd.f32 %v6300_v54, %v4237_v20 }
 0x1aa   : > { %v971_v58 = vsel %vm5887_vm4, %v966_v53, %v970_v22  ;;  %v986_v22 = vrot.slane %v985_v24, 4 }
 0x1ab   : > { %vm4497_vm12 = vcmp.gt.f32.partialorder %v4369_v14, 0.0  ;;  %v4625_v21 = vmul.f32 0.2, %v4369_v14  ;;  %v1809_v6 = vunpack.c.l.b16 %v971_v58  ;;  %v249_v58 = vld [vmem:[%s5868_s6 + $0x134] sm:$0xf] }
 0x1ac   : > { %v991_v36 = vsel %vm5887_vm4, %v986_v22, %v990_v2 }
 0x1ad   : > { %v4753_v27 = vsel %vm4497_vm12, %v4369_v14, %v4625_v21  ;;  %v2241_v28 = vpop.f32.mrf.mxu0  ;;  %v3448_v33 = vpop.f32.mrf.mxu2  ;;  %v998_v14 = vshll.u32 %v246_v18, 16 }
 0x1ae   : > { %v4881_v30 = vpack.c.bf16 %v4753_v27, %v4753_v27  ;;  %v3967_v40 = vpop.f32.mrf.mxu3  ;;  %v3091_v34 = vadd.f32 %v3090_v57, %v2241_v28 }
 0x1af   : > { %v4238_v44 = vadd.f32 %v3967_v40, %v3714_v31  ;;  %v1000_v23 = vrot.slane %v998_v14, 5  ;;  %v248_v40 = vld [vmem:[%s5868_s6 + $0x130] sm:$0xf] }
 0x1b0   : > { %5010 = vst.msk [vmem:[%s6041_s14 + $0x80] sm:$0xf] %vm4977_vm6, %v4881_v30  ;;  %5200 = vmatmul.msk.bf16.gmra.mxu0 %vm1950_vm1, %v6406_v13  ;;  %v3095_v39 = vpop.f32.mrf.mxu1  ;;  %v3715_v42 = vadd.f32 %v3446_v16, %v3091_v34  ;;  %v976_v13 = vrot.slane %v975_v48, 4  ;;  %v994_v16 = vrot.slane %v992_v59, 4 }
 0x1b1   : > { %v4370_v38 = vadd.f32 %v6300_v54, %v4238_v44 }
 0x1b2   : > { %5603 = vmatmul.msk.bf16.gmra.mxu2 %vm1950_vm1, %v6460_v35  ;;  %v995_v21 = vor.u32 %v994_v16, %v990_v2 }
 0x1b3   : > { %vm4498_vm13 = vcmp.gt.f32.partialorder %v4370_v38, 0.0  ;;  %v4626_v26 = vmul.f32 0.2, %v4370_v38  ;;  %5672 = vmatmul.msk.bf16.gmra.mxu3 %vm1950_vm1, %v6457_v43  ;;  %5525 = vmatmul.msk.bf16.gmra.mxu1 %vm1950_vm1, %v6409_v5  ;;  %v981_v5 = vsel %vm5887_vm4, %v976_v13, %v980_v46  ;;  %v1811_v13 = vunpack.c.l.b16 %v991_v36 }
 0x1b4   : > { %v1810_v4 = vunpack.c.l.b16 %v981_v5  ;;  %v996_v28 = vrot.slane %v995_v21, 4  ;;  %v1026_v21 = vshrl.u32 %v249_v58, 16 }
 0x1b5   : > { %v4754_v47 = vsel %vm4498_vm13, %v4370_v38, %v4626_v26  ;;  %v2243_v60 = vpop.f32.mrf.mxu0  ;;  %v3451_v50 = vpop.f32.mrf.mxu2  ;;  %v1012_v26 = vshll.u32 %v248_v40, 16 }
 0x1b6   : > { %v4882_v49 = vpack.c.bf16 %v4754_v47, %v4754_v47  ;;  %v3970_v62 = vpop.f32.mrf.mxu3  ;;  %v3093_v7 = vadd.f32 %v3092_v17, %v2243_v60  ;;  %v6482_v25 = vpack.c.b16 %v1810_v4, %v1809_v6  ;;  %v1001_v37 = vsel %vm5887_vm4, %v996_v28, %v1000_v23 }
 0x1b7   : > { %v4239_v57 = vadd.f32 %v3970_v62, %v3715_v42  ;;  %v1812_v46 = vunpack.c.l.b16 %v1001_v37  ;;  %v1014_v62 = vrot.slane %v1012_v26, 5  ;;  %v1022_v4 = vshll.u32 %v249_v58, 16 }
 0x1b8   : > { %5011 = vst.msk [vmem:[%s6041_s14 + $0x84] sm:$0xf] %vm4977_vm6, %v4882_v49  ;;  %v3097_v0 = vpop.f32.mrf.mxu1  ;;  %v3716_v20 = vadd.f32 %v3448_v33, %v3093_v7 }
 0x1b9   : > { %v4371_v63 = vadd.f32 %v6300_v54, %v4239_v57  ;;  %v6508_v6 = vpack.c.b16 %v1812_v46, %v1811_v13  ;;  %v6536_v46 = vld [vmem:[%s5868_s6 + $0x134] sm:$0xff] }
 0x1bb   : > { %vm4499_vm14 = vcmp.gt.f32.partialorder %v4371_v63, 0.0  ;;  %v4627_v12 = vmul.f32 0.2, %v4371_v63 }
 0x1bd   : > { %v4755_v55 = vsel %vm4499_vm14, %v4371_v63, %v4627_v12  ;;  %v2246_v8 = vpop.f32.mrf.mxu0  ;;  %v3453_v10 = vpop.f32.mrf.mxu2 }
 0x1be   : > { %v4883_v9 = vpack.c.bf16 %v4755_v55, %v4755_v55  ;;  %v3972_v11 = vpop.f32.mrf.mxu3  ;;  %v3096_v17 = vadd.f32 %v3095_v39, %v2246_v8 }
 0x1bf   : > { %v4240_v15 = vadd.f32 %v3972_v11, %v3716_v20  ;;  %v1024_v11 = vrot.slane %v1022_v4, 5 }
 0x1c0   : > { %5012 = vst.msk [vmem:[%s6041_s14 + $0x88] sm:$0xf] %vm4977_vm6, %v4883_v9  ;;  %5201 = vmatmul.msk.bf16.gmra.mxu0 %vm1950_vm1, %v6431_v61  ;;  %v3100_v56 = vpop.f32.mrf.mxu1  ;;  %v3717_v31 = vadd.f32 %v3451_v50, %v3096_v17  ;;  %v247_v61 = vld [vmem:[%s5868_s6 + $0x12c] sm:$0xf]  ;;  %v250_v9 = vld [vmem:[%s5868_s6 + $0x138] sm:$0xf] }
 0x1c1   : > { %v4372_v32 = vadd.f32 %v6300_v54, %v4240_v15  ;;  %v1003_v38 = vshrl.u32 %v247_v61, 16  ;;  %v1006_v39 = vshll.u32 %v247_v61, 16  ;;  %v1036_v23 = vshrl.u32 %v250_v9, 16 }
 0x1c2   : > { %5604 = vmatmul.msk.bf16.gmra.mxu2 %vm1950_vm1, %v6485_v19 }
 0x1c3   : > { %vm4500_vm15 = vcmp.gt.f32.partialorder %v4372_v32, 0.0  ;;  %v4628_v27 = vmul.f32 0.2, %v4372_v32  ;;  %5673 = vmatmul.msk.bf16.gmra.mxu3 %vm1950_vm1, %v6482_v25  ;;  %5526 = vmatmul.msk.bf16.gmra.mxu1 %vm1950_vm1, %v6434_v51  ;;  %v1016_v51 = vshrl.u32 %v248_v40, 16  ;;  %v1005_v60 = vrot.slane %v1003_v38, 4 }
 0x1c4   : > { %v1008_v49 = vrot.slane %v1006_v39, 5 }
 0x1c5   : > { %v4756_v29 = vsel %vm4500_vm15, %v4372_v32, %v4628_v27  ;;  %v2248_v30 = vpop.f32.mrf.mxu0  ;;  %v3456_v34 = vpop.f32.mrf.mxu2  ;;  %v1018_v50 = vrot.slane %v1016_v51, 4  ;;  %v1032_v32 = vshll.u32 %v250_v9, 16 }
 0x1c6   : > { %v4884_v33 = vpack.c.bf16 %v4756_v29, %v4756_v29  ;;  %v3975_v44 = vpop.f32.mrf.mxu3  ;;  %v3098_v53 = vadd.f32 %v3097_v0, %v2248_v30  ;;  %v1009_v2 = vor.u32 %v1008_v49, %v1005_v60  ;;  %v1028_v29 = vrot.slane %v1026_v21, 4 }
 0x1c7   : > { %v4241_v48 = vadd.f32 %v3975_v44, %v3717_v31  ;;  %v1019_v12 = vor.u32 %v1018_v50, %v1014_v62  ;;  %v1034_v30 = vrot.slane %v1032_v32, 5  ;;  %v251_v44 = vld [vmem:[%s5868_s6 + $0x13c] sm:$0x1] }
 0x1c8   : > { %5013 = vst.msk [vmem:[%s6041_s14 + $0x8c] sm:$0xf] %vm4977_vm6, %v4884_v33  ;;  %v3102_v45 = vpop.f32.mrf.mxu1  ;;  %v3718_v3 = vadd.f32 %v3453_v10, %v3098_v53  ;;  %v1010_v8 = vrot.slane %v1009_v2, 4  ;;  %v1029_v51 = vor.u32 %v1028_v29, %v1024_v11  ;;  %v6567_v29 = vld [vmem:[%s5868_s6 + $0x140] sm:$0xff] }
 0x1c9   : > { %v4373_v42 = vadd.f32 %v6300_v54, %v4241_v48 }
 0x1ca   : > { %v1015_v22 = vsel %vm5887_vm4, %v1010_v8, %v1014_v62  ;;  %v1030_v62 = vrot.slane %v1029_v51, 4 }
 0x1cb   : > { %vm4501_vm0 = vcmp.gt.f32.partialorder %v4373_v42, 0.0  ;;  %v4629_v47 = vmul.f32 0.2, %v4373_v42  ;;  %v1813_v61 = vunpack.c.l.b16 %v1015_v22  ;;  %v254_v22 = vld [vmem:[%s5868_s6 + $0x148] sm:$0xf] }
 0x1cd   : > { %v4757_v52 = vsel %vm4501_vm0, %v4373_v42, %v4629_v47  ;;  %v2251_v57 = vpop.f32.mrf.mxu0  ;;  %v3458_v63 = vpop.f32.mrf.mxu2  ;;  %v1042_v42 = vshll.u32 %v251_v44, 16 }
 0x1ce   : > { %v4885_v59 = vpack.c.bf16 %v4757_v52, %v4757_v52  ;;  %v3977_v5 = vpop.f32.mrf.mxu3  ;;  %v3101_v0 = vadd.f32 %v3100_v56, %v2251_v57 }
 0x1cf   : > { %v4242_v7 = vadd.f32 %v3977_v5, %v3718_v3  ;;  %v1044_v50 = vrot.slane %v1042_v42, 5 }
 0x1d0   : > { %5014 = vst.msk [vmem:[%s6041_s14 + $0x90] sm:$0xf] %vm4977_vm6, %v4885_v59  ;;  %5202 = vmatmul.msk.bf16.gmra.mxu0 %vm1950_vm1, %v6457_v43  ;;  %v3105_v16 = vpop.f32.mrf.mxu1  ;;  %v3719_v20 = vadd.f32 %v3456_v34, %v3101_v0  ;;  %v1020_v43 = vrot.slane %v1019_v12, 4  ;;  %v1038_v34 = vrot.slane %v1036_v23, 4  ;;  %v253_v59 = vld [vmem:[%s5868_s6 + $0x144] sm:$0xf]  ;;  %v1035_v0 = vsel %vm5887_vm4, %v1030_v62, %v1034_v30 }
 0x1d1   : > { %v4374_v18 = vadd.f32 %v6300_v54, %v4242_v7 }
 0x1d2   : > { %5605 = vmatmul.msk.bf16.gmra.mxu2 %vm1950_vm1, %v6511_v1  ;;  %v1039_v47 = vor.u32 %v1038_v34, %v1034_v30 }
 0x1d3   : > { %vm4502_vm2 = vcmp.gt.f32.partialorder %v4374_v18, 0.0  ;;  %v4630_v55 = vmul.f32 0.2, %v4374_v18  ;;  %5674 = vmatmul.msk.bf16.gmra.mxu3 %vm1950_vm1, %v6508_v6  ;;  %5527 = vmatmul.msk.bf16.gmra.mxu1 %vm1950_vm1, %v6460_v35  ;;  %v1025_v35 = vsel %vm5887_vm4, %v1020_v43, %v1024_v11  ;;  %v1815_v43 = vunpack.c.l.b16 %v1035_v0 }
 0x1d4   : > { %v1814_v33 = vunpack.c.l.b16 %v1025_v35  ;;  %v1040_v57 = vrot.slane %v1039_v47, 4  ;;  %v1070_v47 = vshrl.u32 %v254_v22, 16 }
 0x1d5   : > { %v4758_v10 = vsel %vm4502_vm2, %v4374_v18, %v4630_v55  ;;  %v2253_v24 = vpop.f32.mrf.mxu0  ;;  %v3461_v17 = vpop.f32.mrf.mxu2  ;;  %v6560_v55 = vld [vmem:[%s7501_s2] ss:$0 sm:$0xff] }
 0x1d6   : > { %v4886_v14 = vpack.c.bf16 %v4758_v10, %v4758_v10  ;;  %v3980_v15 = vpop.f32.mrf.mxu3  ;;  %v3103_v31 = vadd.f32 %v3102_v45, %v2253_v24  ;;  %v6533_v13 = vpack.c.b16 %v1814_v33, %v1813_v61  ;;  %v1045_v12 = vsel %vm5887_vm4, %v1040_v57, %v1044_v50 }
 0x1d7   : > { %v4243_v56 = vadd.f32 %v3980_v15, %v3719_v20  ;;  %v1816_v11 = vunpack.c.l.b16 %v1045_v12  ;;  %v1066_v33 = vshll.u32 %v254_v22, 16 }
 0x1d8   : > { %5015 = vst.msk [vmem:[%s6041_s14 + $0x94] sm:$0xf] %vm4977_vm6, %v4886_v14  ;;  %v3107_v28 = vpop.f32.mrf.mxu1  ;;  %v3720_v48 = vadd.f32 %v3458_v63, %v3103_v31 }
 0x1d9   : > { %v4375_v27 = vadd.f32 %v6300_v54, %v4243_v56  ;;  %v6564_v61 = vpack.c.b16 %v1816_v11, %v1815_v43  ;;  %v6592_v11 = vld [vmem:[%s5868_s6 + $0x148] sm:$0xff] }
 0x1db   : > { %vm4503_vm3 = vcmp.gt.f32.partialorder %v4375_v27, 0.0  ;;  %v4631_v40 = vmul.f32 0.2, %v4375_v27 }
 0x1dd   : > { %v4759_v36 = vsel %vm4503_vm3, %v4375_v27, %v4631_v40  ;;  %v2256_v37 = vpop.f32.mrf.mxu0  ;;  %v3463_v26 = vpop.f32.mrf.mxu2 }
 0x1de   : > { %v4887_v38 = vpack.c.bf16 %v4759_v36, %v4759_v36  ;;  %v3982_v39 = vpop.f32.mrf.mxu3  ;;  %v3106_v45 = vadd.f32 %v3105_v16, %v2256_v37  ;;  %v1056_v16 = vshll.u32 %v253_v59, 16 }
 0x1df   : > { %v4244_v53 = vadd.f32 %v3982_v39, %v3720_v48  ;;  %v1068_v39 = vrot.slane %v1066_v33, 5 }
 0x1e0   : > { %5016 = vst.msk [vmem:[%s6041_s14 + $0x98] sm:$0xf] %vm4977_vm6, %v4887_v38  ;;  %5203 = vmatmul.msk.bf16.gmra.mxu0 %vm1950_vm1, %v6482_v25  ;;  %v3110_v49 = vpop.f32.mrf.mxu1  ;;  %v3721_v3 = vadd.f32 %v3461_v17, %v3106_v45  ;;  %v252_v25 = vld [vmem:[%s5868_s6 + $0x140] sm:$0xf]  ;;  %v1058_v15 = vrot.slane %v1056_v16, 5 }
 0x1e1   : > { %v4376_v60 = vadd.f32 %v6300_v54, %v4244_v53  ;;  %v1047_v4 = vshrl.u32 %v252_v25, 16  ;;  %v1050_v18 = vshll.u32 %v252_v25, 16  ;;  %v255_v38 = vld [vmem:[%s5868_s6 + $0x14c] sm:$0xf] }
 0x1e2   : > { %5606 = vmatmul.msk.bf16.gmra.mxu2 %vm1950_vm1, %v6536_v46  ;;  %v1080_v50 = vshrl.u32 %v255_v38, 16 }
 0x1e3   : > { %vm4504_vm5 = vcmp.gt.f32.partialorder %v4376_v60, 0.0  ;;  %v4632_v52 = vmul.f32 0.2, %v4376_v60  ;;  %5675 = vmatmul.msk.bf16.gmra.mxu3 %vm1950_vm1, %v6533_v13  ;;  %5528 = vmatmul.msk.bf16.gmra.mxu1 %vm1950_vm1, %v6485_v19  ;;  %v1060_v19 = vshrl.u32 %v253_v59, 16  ;;  %v1049_v24 = vrot.slane %v1047_v4, 4 }
 0x1e4   : > { %v1052_v14 = vrot.slane %v1050_v18, 5 }
 0x1e5   : > { %v4760_v58 = vsel %vm4504_vm5, %v4376_v60, %v4632_v52  ;;  %v2258_v54 = vpop.f32.mrf.mxu0  ;;  %v3466_v7 = vpop.f32.mrf.mxu2  ;;  %v1062_v17 = vrot.slane %v1060_v19, 4  ;;  %v1076_v60 = vshll.u32 %v255_v38, 16 }
 0x1e6   : > { %v4888_v5 = vpack.c.bf16 %v4760_v58, %v4760_v58  ;;  %v3985_v63 = vpop.f32.mrf.mxu3  ;;  %v3108_v8 = vadd.f32 %v3107_v28, %v2258_v54  ;;  %v1053_v30 = vor.u32 %v1052_v14, %v1049_v24  ;;  %v1072_v58 = vrot.slane %v1070_v47, 4 }
 0x1e7   : > { %v4245_v2 = vadd.f32 %v3985_v63, %v3721_v3  ;;  %v1063_v40 = vor.u32 %v1062_v17, %v1058_v15  ;;  %v1078_v54 = vrot.slane %v1076_v60, 5  ;;  %v256_v63 = vld [vmem:[%s5868_s6 + $0x150] sm:$0x1] }
 0x1e8   : > { %5017 = vst.msk [vmem:[%s6041_s14 + $0x9c] sm:$0xf] %vm4977_vm6, %v4888_v5  ;;  %v3112_v9 = vpop.f32.mrf.mxu1  ;;  %v3722_v32 = vadd.f32 %v3463_v26, %v3108_v8  ;;  %v1054_v37 = vrot.slane %v1053_v30, 4  ;;  %v1073_v19 = vor.u32 %v1072_v58, %v1068_v39  ;;  %v6618_v58 = vld [vmem:[%s5868_s6 + $0x154] sm:$0xff] }
 0x1e9   : > { %v4377_v20 = vadd.f32 %v6560_v55, %v4245_v2 }
 0x1ea   : > { %v1059_v62 = vsel %vm5887_vm4, %v1054_v37, %v1058_v15  ;;  %v1074_v15 = vrot.slane %v1073_v19, 4 }
 0x1eb   : > { %vm4505_vm7 = vcmp.gt.f32.partialorder %v4377_v20, 0.0  ;;  %v4633_v10 = vmul.f32 0.2, %v4377_v20  ;;  %v1817_v25 = vunpack.c.l.b16 %v1059_v62  ;;  %v259_v62 = vld [vmem:[%s5868_s6 + $0x15c] sm:$0xf] }
 0x1ec   : > { %v1079_v30 = vsel %vm5887_vm4, %v1074_v15, %v1078_v54 }
 0x1ed   : > { %v4761_v21 = vsel %vm4505_vm7, %v4377_v20, %v4633_v10  ;;  %v2261_v56 = vpop.f32.mrf.mxu0  ;;  %v3468_v27 = vpop.f32.mrf.mxu2  ;;  %v1086_v20 = vshll.u32 %v256_v63, 16 }
 0x1ee   : > { %v4889_v23 = vpack.c.bf16 %v4761_v21, %v4761_v21  ;;  %v3987_v35 = vpop.f32.mrf.mxu3  ;;  %v3111_v28 = vadd.f32 %v3110_v49, %v2261_v56 }
 0x1ef   : > { %v4246_v31 = vadd.f32 %v3987_v35, %v3722_v32  ;;  %v1088_v17 = vrot.slane %v1086_v20, 5  ;;  %v258_v35 = vld [vmem:[%s5868_s6 + $0x158] sm:$0xf] }
 0x1f0   : > { %5018 = vst.msk [vmem:[%s6041_s14 + $0xa0] sm:$0xf] %vm4977_vm6, %v4889_v23  ;;  %5204 = vmatmul.msk.bf16.gmra.mxu0 %vm1950_vm1, %v6508_v6  ;;  %v3115_v34 = vpop.f32.mrf.mxu1  ;;  %v3723_v48 = vadd.f32 %v3466_v7, %v3111_v28  ;;  %v1064_v6 = vrot.slane %v1063_v40, 4  ;;  %v1082_v7 = vrot.slane %v1080_v50, 4 }
 0x1f1   : > { %v4378_v44 = vadd.f32 %v6560_v55, %v4246_v31 }
 0x1f2   : > { %5607 = vmatmul.msk.bf16.gmra.mxu2 %vm1950_vm1, %v6567_v29  ;;  %v1083_v10 = vor.u32 %v1082_v7, %v1078_v54 }
 0x1f3   : > { %vm4506_vm8 = vcmp.gt.f32.partialorder %v4378_v44, 0.0  ;;  %v4634_v36 = vmul.f32 0.2, %v4378_v44  ;;  %5676 = vmatmul.msk.bf16.gmra.mxu3 %vm1950_vm1, %v6564_v61  ;;  %5529 = vmatmul.msk.bf16.gmra.mxu1 %vm1950_vm1, %v6511_v1  ;;  %v1069_v1 = vsel %vm5887_vm4, %v1064_v6, %v1068_v39  ;;  %v1819_v6 = vunpack.c.l.b16 %v1079_v30 }
 0x1f4   : > { %v1818_v5 = vunpack.c.l.b16 %v1069_v1  ;;  %v1084_v56 = vrot.slane %v1083_v10, 4  ;;  %v1114_v10 = vshrl.u32 %v259_v62, 16 }
 0x1f5   : > { %v4762_v26 = vsel %vm4506_vm8, %v4378_v44, %v4634_v36  ;;  %v2263_v51 = vpop.f32.mrf.mxu0  ;;  %v3471_v45 = vpop.f32.mrf.mxu2  ;;  %v1100_v36 = vshll.u32 %v258_v35, 16 }
 0x1f6   : > { %v4890_v42 = vpack.c.bf16 %v4762_v26, %v4762_v26  ;;  %v3990_v53 = vpop.f32.mrf.mxu3  ;;  %v3113_v3 = vadd.f32 %v3112_v9, %v2263_v51  ;;  %v6589_v43 = vpack.c.b16 %v1818_v5, %v1817_v25  ;;  %v1089_v33 = vsel %vm5887_vm4, %v1084_v56, %v1088_v17 }
 0x1f7   : > { %v4247_v49 = vadd.f32 %v3990_v53, %v3723_v48  ;;  %v1820_v39 = vunpack.c.l.b16 %v1089_v33  ;;  %v1102_v53 = vrot.slane %v1100_v36, 5  ;;  %v1110_v5 = vshll.u32 %v259_v62, 16 }
 0x1f8   : > { %5019 = vst.msk [vmem:[%s6041_s14 + $0xa4] sm:$0xf] %vm4977_vm6, %v4890_v42  ;;  %v3117_v57 = vpop.f32.mrf.mxu1  ;;  %v3724_v2 = vadd.f32 %v3468_v27, %v3113_v3 }
 0x1f9   : > { %v4379_v52 = vadd.f32 %v6560_v55, %v4247_v49  ;;  %v6615_v25 = vpack.c.b16 %v1820_v39, %v1819_v6  ;;  %v6643_v39 = vld [vmem:[%s5868_s6 + $0x15c] sm:$0xff] }
 0x1fb   : > { %vm4507_vm9 = vcmp.gt.f32.partialorder %v4379_v52, 0.0  ;;  %v4635_v59 = vmul.f32 0.2, %v4379_v52 }
 0x1fd   : > { %v4763_v0 = vsel %vm4507_vm9, %v4379_v52, %v4635_v59  ;;  %v2266_v12 = vpop.f32.mrf.mxu0  ;;  %v3473_v16 = vpop.f32.mrf.mxu2 }
 0x1fe   : > { %v4891_v4 = vpack.c.bf16 %v4763_v0, %v4763_v0  ;;  %v3992_v18 = vpop.f32.mrf.mxu3  ;;  %v3116_v9 = vadd.f32 %v3115_v34, %v2266_v12 }
 0x1ff   : > { %v4248_v8 = vadd.f32 %v3992_v18, %v3724_v2  ;;  %v1112_v18 = vrot.slane %v1110_v5, 5 }
 0x200   : > { %5020 = vst.msk [vmem:[%s6041_s14 + $0xa8] sm:$0xf] %vm4977_vm6, %v4891_v4  ;;  %5205 = vmatmul.msk.bf16.gmra.mxu0 %vm1950_vm1, %v6533_v13  ;;  %v3120_v14 = vpop.f32.mrf.mxu1  ;;  %v3725_v32 = vadd.f32 %v3471_v45, %v3116_v9  ;;  %v257_v13 = vld [vmem:[%s5868_s6 + $0x154] sm:$0xf]  ;;  %v260_v4 = vld [vmem:[%s5868_s6 + $0x160] sm:$0xf] }
 0x201   : > { %v4380_v24 = vadd.f32 %v6560_v55, %v4248_v8  ;;  %v1091_v44 = vshrl.u32 %v257_v13, 16  ;;  %v1094_v34 = vshll.u32 %v257_v13, 16  ;;  %v1124_v17 = vshrl.u32 %v260_v4, 16 }
 0x202   : > { %5608 = vmatmul.msk.bf16.gmra.mxu2 %vm1950_vm1, %v6592_v11 }
 0x203   : > { %vm4508_vm10 = vcmp.gt.f32.partialorder %v4380_v24, 0.0  ;;  %v4636_v21 = vmul.f32 0.2, %v4380_v24  ;;  %5677 = vmatmul.msk.bf16.gmra.mxu3 %vm1950_vm1, %v6589_v43  ;;  %5530 = vmatmul.msk.bf16.gmra.mxu1 %vm1950_vm1, %v6536_v46  ;;  %v1104_v46 = vshrl.u32 %v258_v35, 16  ;;  %v1093_v51 = vrot.slane %v1091_v44, 4 }
 0x204   : > { %v1096_v42 = vrot.slane %v1094_v34, 5 }
 0x205   : > { %v4764_v22 = vsel %vm4508_vm10, %v4380_v24, %v4636_v21  ;;  %v2268_v23 = vpop.f32.mrf.mxu0  ;;  %v3476_v28 = vpop.f32.mrf.mxu2  ;;  %v1106_v45 = vrot.slane %v1104_v46, 4  ;;  %v1120_v24 = vshll.u32 %v260_v4, 16 }
 0x206   : > { %v4892_v27 = vpack.c.bf16 %v4764_v22, %v4764_v22  ;;  %v3995_v31 = vpop.f32.mrf.mxu3  ;;  %v3118_v37 = vadd.f32 %v3117_v57, %v2268_v23  ;;  %v1097_v54 = vor.u32 %v1096_v42, %v1093_v51  ;;  %v1116_v22 = vrot.slane %v1114_v10, 4 }
 0x207   : > { %v4249_v40 = vadd.f32 %v3995_v31, %v3725_v32  ;;  %v1107_v59 = vor.u32 %v1106_v45, %v1102_v53  ;;  %v1122_v23 = vrot.slane %v1120_v24, 5  ;;  %v261_v31 = vld [vmem:[%s5868_s6 + $0x164] sm:$0x1] }
 0x208   : > { %5021 = vst.msk [vmem:[%s6041_s14 + $0xac] sm:$0xf] %vm4977_vm6, %v4892_v27  ;;  %v3122_v38 = vpop.f32.mrf.mxu1  ;;  %v3726_v60 = vadd.f32 %v3473_v16, %v3118_v37  ;;  %v1098_v12 = vrot.slane %v1097_v54, 4  ;;  %v1117_v46 = vor.u32 %v1116_v22, %v1112_v18  ;;  %v6669_v22 = vld [vmem:[%s5868_s6 + $0x168] sm:$0xff] }
 0x209   : > { %v4381_v48 = vadd.f32 %v6560_v55, %v4249_v40 }
 0x20a   : > { %v1103_v15 = vsel %vm5887_vm4, %v1098_v12, %v1102_v53  ;;  %v1118_v53 = vrot.slane %v1117_v46, 4 }
 0x20b   : > { %vm4509_vm11 = vcmp.gt.f32.partialorder %v4381_v48, 0.0  ;;  %v4637_v26 = vmul.f32 0.2, %v4381_v48  ;;  %v1821_v13 = vunpack.c.l.b16 %v1103_v15  ;;  %v264_v15 = vld [vmem:[%s5868_s6 + $0x170] sm:$0xf] }
 0x20c   : > { %v1123_v54 = vsel %vm5887_vm4, %v1118_v53, %v1122_v23 }
 0x20d   : > { %v4765_v47 = vsel %vm4509_vm11, %v4381_v48, %v4637_v26  ;;  %v2271_v49 = vpop.f32.mrf.mxu0  ;;  %v3478_v52 = vpop.f32.mrf.mxu2  ;;  %v1130_v48 = vshll.u32 %v261_v31, 16 }
 0x20e   : > { %v4893_v50 = vpack.c.bf16 %v4765_v47, %v4765_v47  ;;  %v3997_v1 = vpop.f32.mrf.mxu3  ;;  %v3121_v57 = vadd.f32 %v3120_v14, %v2271_v49 }
 0x20f   : > { %v4250_v3 = vadd.f32 %v3997_v1, %v3726_v60  ;;  %v1132_v45 = vrot.slane %v1130_v48, 5  ;;  %v263_v1 = vld [vmem:[%s5868_s6 + $0x16c] sm:$0xf] }
 0x210   : > { %5022 = vst.msk [vmem:[%s6041_s14 + $0xb0] sm:$0xf] %vm4977_vm6, %v4893_v50  ;;  %5206 = vmatmul.msk.bf16.gmra.mxu0 %vm1950_vm1, %v6564_v61  ;;  %v3125_v7 = vpop.f32.mrf.mxu1  ;;  %v3727_v2 = vadd.f32 %v3476_v28, %v3121_v57  ;;  %v1108_v61 = vrot.slane %v1107_v59, 4  ;;  %v1126_v28 = vrot.slane %v1124_v17, 4 }
 0x211   : > { %v4382_v63 = vadd.f32 %v6560_v55, %v4250_v3 }
 0x212   : > { %5609 = vmatmul.msk.bf16.gmra.mxu2 %vm1950_vm1, %v6618_v58  ;;  %v1127_v26 = vor.u32 %v1126_v28, %v1122_v23 }
 0x213   : > { %vm4510_vm12 = vcmp.gt.f32.partialorder %v4382_v63, 0.0  ;;  %v4638_v0 = vmul.f32 0.2, %v4382_v63  ;;  %5678 = vmatmul.msk.bf16.gmra.mxu3 %vm1950_vm1, %v6615_v25  ;;  %5531 = vmatmul.msk.bf16.gmra.mxu1 %vm1950_vm1, %v6567_v29  ;;  %v1113_v29 = vsel %vm5887_vm4, %v1108_v61, %v1112_v18  ;;  %v1823_v61 = vunpack.c.l.b16 %v1123_v54 }
 0x214   : > { %v1822_v27 = vunpack.c.l.b16 %v1113_v29  ;;  %v1128_v49 = vrot.slane %v1127_v26, 4  ;;  %v1158_v26 = vshrl.u32 %v264_v15, 16 }
 0x215   : > { %v4766_v16 = vsel %vm4510_vm12, %v4382_v63, %v4638_v0  ;;  %v2273_v19 = vpop.f32.mrf.mxu0  ;;  %v3481_v9 = vpop.f32.mrf.mxu2  ;;  %v1144_v0 = vshll.u32 %v263_v1, 16 }
 0x216   : > { %v4894_v20 = vpack.c.bf16 %v4766_v16, %v4766_v16  ;;  %v4000_v8 = vpop.f32.mrf.mxu3  ;;  %v3123_v32 = vadd.f32 %v3122_v38, %v2273_v19  ;;  %v6640_v6 = vpack.c.b16 %v1822_v27, %v1821_v13  ;;  %v1133_v5 = vsel %vm5887_vm4, %v1128_v49, %v1132_v45 }
 0x217   : > { %v4251_v14 = vadd.f32 %v4000_v8, %v3727_v2  ;;  %v1824_v18 = vunpack.c.l.b16 %v1133_v5  ;;  %v1146_v8 = vrot.slane %v1144_v0, 5  ;;  %v1154_v27 = vshll.u32 %v264_v15, 16 }
 0x218   : > { %5023 = vst.msk [vmem:[%s6041_s14 + $0xb4] sm:$0xf] %vm4977_vm6, %v4894_v20  ;;  %v3127_v56 = vpop.f32.mrf.mxu1  ;;  %v3728_v40 = vadd.f32 %v3478_v52, %v3123_v32 }
 0x219   : > { %v4383_v21 = vadd.f32 %v6560_v55, %v4251_v14  ;;  %v6666_v13 = vpack.c.b16 %v1824_v18, %v1823_v61  ;;  %v6694_v18 = vld [vmem:[%s5868_s6 + $0x170] sm:$0xff] }
 0x21b   : > { %vm4511_vm13 = vcmp.gt.f32.partialorder %v4383_v21, 0.0  ;;  %v4639_v35 = vmul.f32 0.2, %v4383_v21 }
 0x21d   : > { %v4767_v30 = vsel %vm4511_vm13, %v4383_v21, %v4639_v35  ;;  %v2276_v33 = vpop.f32.mrf.mxu0  ;;  %v3483_v36 = vpop.f32.mrf.mxu2 }
 0x21e   : > { %v4895_v44 = vpack.c.bf16 %v4767_v30, %v4767_v30  ;;  %v4002_v34 = vpop.f32.mrf.mxu3  ;;  %v3126_v38 = vadd.f32 %v3125_v7, %v2276_v33 }
 0x21f   : > { %v4252_v37 = vadd.f32 %v4002_v34, %v3728_v40  ;;  %v1156_v34 = vrot.slane %v1154_v27, 5 }
 0x220   : > { %5024 = vst.msk [vmem:[%s6041_s14 + $0xb8] sm:$0xf] %vm4977_vm6, %v4895_v44  ;;  %5207 = vmatmul.msk.bf16.gmra.mxu0 %vm1950_vm1, %v6589_v43  ;;  %v3130_v42 = vpop.f32.mrf.mxu1  ;;  %v3729_v60 = vadd.f32 %v3481_v9, %v3126_v38  ;;  %v262_v43 = vld [vmem:[%s5868_s6 + $0x168] sm:$0xf]  ;;  %v265_v44 = vld [vmem:[%s5868_s6 + $0x174] sm:$0xf] }
 0x221   : > { %v4384_v51 = vadd.f32 %v6560_v55, %v4252_v37  ;;  %v1135_v63 = vshrl.u32 %v262_v43, 16  ;;  %v1138_v7 = vshll.u32 %v262_v43, 16  ;;  %v1168_v45 = vshrl.u32 %v265_v44, 16 }
 0x222   : > { %5610 = vmatmul.msk.bf16.gmra.mxu2 %vm1950_vm1, %v6643_v39 }
 0x223   : > { %vm4512_vm14 = vcmp.gt.f32.partialorder %v4384_v51, 0.0  ;;  %v4640_v47 = vmul.f32 0.2, %v4384_v51  ;;  %5679 = vmatmul.msk.bf16.gmra.mxu3 %vm1950_vm1, %v6640_v6  ;;  %5532 = vmatmul.msk.bf16.gmra.mxu1 %vm1950_vm1, %v6592_v11  ;;  %v1148_v11 = vshrl.u32 %v263_v1, 16  ;;  %v1137_v19 = vrot.slane %v1135_v63, 4 }
 0x224   : > { %v1140_v20 = vrot.slane %v1138_v7, 5 }
 0x225   : > { %v4768_v62 = vsel %vm4512_vm14, %v4384_v51, %v4640_v47  ;;  %v2278_v50 = vpop.f32.mrf.mxu0  ;;  %v3486_v57 = vpop.f32.mrf.mxu2  ;;  %v1150_v9 = vrot.slane %v1148_v11, 4  ;;  %v1164_v51 = vshll.u32 %v265_v44, 16 }
 0x226   : > { %v4896_v52 = vpack.c.bf16 %v4768_v62, %v4768_v62  ;;  %v4005_v3 = vpop.f32.mrf.mxu3  ;;  %v3128_v12 = vadd.f32 %v3127_v56, %v2278_v50  ;;  %v1141_v23 = vor.u32 %v1140_v20, %v1137_v19  ;;  %v1160_v62 = vrot.slane %v1158_v26, 4 }
 0x227   : > { %v4253_v59 = vadd.f32 %v4005_v3, %v3729_v60  ;;  %v1151_v35 = vor.u32 %v1150_v9, %v1146_v8  ;;  %v1166_v50 = vrot.slane %v1164_v51, 5  ;;  %v266_v3 = vld [vmem:[%s5868_s6 + $0x178] sm:$0x1] }
 0x228   : > { %5025 = vst.msk [vmem:[%s6041_s14 + $0xbc] sm:$0xf] %vm4977_vm6, %v4896_v52  ;;  %v3132_v4 = vpop.f32.mrf.mxu1  ;;  %v3730_v24 = vadd.f32 %v3483_v36, %v3128_v12  ;;  %v1142_v33 = vrot.slane %v1141_v23, 4  ;;  %v1161_v11 = vor.u32 %v1160_v62, %v1156_v34  ;;  %v6720_v62 = vld [vmem:[%s5868_s6 + $0x17c] sm:$0xff] }
 0x229   : > { %v4385_v2 = vadd.f32 %v6560_v55, %v4253_v59 }
 0x22a   : > { %v1147_v53 = vsel %vm5887_vm4, %v1142_v33, %v1146_v8  ;;  %v1162_v8 = vrot.slane %v1161_v11, 4 }
 0x22b   : > { %vm4513_vm15 = vcmp.gt.f32.partialorder %v4385_v2, 0.0  ;;  %v4641_v16 = vmul.f32 0.2, %v4385_v2  ;;  %v1825_v43 = vunpack.c.l.b16 %v1147_v53  ;;  %v269_v53 = vld [vmem:[%s5868_s6 + $0x184] sm:$0xf] }
 0x22c   : > { %v1167_v23 = vsel %vm5887_vm4, %v1162_v8, %v1166_v50 }
 0x22d   : > { %v4769_v10 = vsel %vm4513_vm15, %v4385_v2, %v4641_v16  ;;  %v2281_v14 = vpop.f32.mrf.mxu0  ;;  %v3488_v21 = vpop.f32.mrf.mxu2  ;;  %v1174_v2 = vshll.u32 %v266_v3, 16 }
 0x22e   : > { %v4897_v17 = vpack.c.bf16 %v4769_v10, %v4769_v10  ;;  %v4007_v29 = vpop.f32.mrf.mxu3  ;;  %v3131_v56 = vadd.f32 %v3130_v42, %v2281_v14 }
 0x22f   : > { %v4254_v32 = vadd.f32 %v4007_v29, %v3730_v24  ;;  %v1176_v9 = vrot.slane %v1174_v2, 5  ;;  %v268_v29 = vld [vmem:[%s5868_s6 + $0x180] sm:$0xf] }
 0x230   : > { %5026 = vst.msk [vmem:[%s6041_s14 + $0xc0] sm:$0xf] %vm4977_vm6, %v4897_v17  ;;  %5208 = vmatmul.msk.bf16.gmra.mxu0 %vm1950_vm1, %v6615_v25  ;;  %v3135_v28 = vpop.f32.mrf.mxu1  ;;  %v3731_v40 = vadd.f32 %v3486_v57, %v3131_v56  ;;  %v1152_v25 = vrot.slane %v1151_v35, 4  ;;  %v1170_v57 = vrot.slane %v1168_v45, 4 }
 0x231   : > { %v4386_v31 = vadd.f32 %v6560_v55, %v4254_v32 }
 0x232   : > { %5611 = vmatmul.msk.bf16.gmra.mxu2 %vm1950_vm1, %v6669_v22  ;;  %v1171_v16 = vor.u32 %v1170_v57, %v1166_v50 }
 0x233   : > { %vm4514_vm0 = vcmp.gt.f32.partialorder %v4386_v31, 0.0  ;;  %v4642_v30 = vmul.f32 0.2, %v4386_v31  ;;  %5680 = vmatmul.msk.bf16.gmra.mxu3 %vm1950_vm1, %v6666_v13  ;;  %5533 = vmatmul.msk.bf16.gmra.mxu1 %vm1950_vm1, %v6618_v58  ;;  %v1157_v58 = vsel %vm5887_vm4, %v1152_v25, %v1156_v34  ;;  %v1827_v25 = vunpack.c.l.b16 %v1167_v23 }
 0x234   : > { %v1826_v52 = vunpack.c.l.b16 %v1157_v58  ;;  %v1172_v14 = vrot.slane %v1171_v16, 4  ;;  %v1202_v16 = vshrl.u32 %v269_v53, 16 }
 0x235   : > { %v4770_v36 = vsel %vm4514_vm0, %v4386_v31, %v4642_v30  ;;  %v2283_v46 = vpop.f32.mrf.mxu0  ;;  %v3491_v38 = vpop.f32.mrf.mxu2  ;;  %v1188_v30 = vshll.u32 %v268_v29, 16 }
 0x236   : > { %v4898_v48 = vpack.c.bf16 %v4770_v36, %v4770_v36  ;;  %v4010_v37 = vpop.f32.mrf.mxu3  ;;  %v3133_v60 = vadd.f32 %v3132_v4, %v2283_v46  ;;  %v6691_v61 = vpack.c.b16 %v1826_v52, %v1825_v43  ;;  %v1177_v27 = vsel %vm5887_vm4, %v1172_v14, %v1176_v9 }
 0x237   : > { %v4255_v42 = vadd.f32 %v4010_v37, %v3731_v40  ;;  %v1828_v34 = vunpack.c.l.b16 %v1177_v27  ;;  %v1190_v37 = vrot.slane %v1188_v30, 5  ;;  %v1198_v52 = vshll.u32 %v269_v53, 16 }
 0x238   : > { %5027 = vst.msk [vmem:[%s6041_s14 + $0xc4] sm:$0xf] %vm4977_vm6, %v4898_v48  ;;  %v3137_v49 = vpop.f32.mrf.mxu1  ;;  %v3732_v59 = vadd.f32 %v3488_v21, %v3133_v60 }
 0x239   : > { %v4387_v47 = vadd.f32 %v6560_v55, %v4255_v42  ;;  %v6717_v43 = vpack.c.b16 %v1828_v34, %v1827_v25  ;;  %v6745_v34 = vld [vmem:[%s5868_s6 + $0x184] sm:$0xff] }
 0x23b   : > { %vm4515_vm2 = vcmp.gt.f32.partialorder %v4387_v47, 0.0  ;;  %v4643_v1 = vmul.f32 0.2, %v4387_v47 }
 0x23d   : > { %v4771_v54 = vsel %vm4515_vm2, %v4387_v47, %v4643_v1  ;;  %v2286_v5 = vpop.f32.mrf.mxu0  ;;  %v3493_v0 = vpop.f32.mrf.mxu2 }
 0x23e   : > { %v4899_v63 = vpack.c.bf16 %v4771_v54, %v4771_v54  ;;  %v4012_v7 = vpop.f32.mrf.mxu3  ;;  %v3136_v4 = vadd.f32 %v3135_v28, %v2286_v5 }
 0x23f   : > { %v4256_v12 = vadd.f32 %v4012_v7, %v3732_v59  ;;  %v1200_v7 = vrot.slane %v1198_v52, 5 }
 0x240   : > { %5028 = vst.msk [vmem:[%s6041_s14 + $0xc8] sm:$0xf] %vm4977_vm6, %v4899_v63  ;;  %5209 = vmatmul.msk.bf16.gmra.mxu0 %vm1950_vm1, %v6640_v6  ;;  %v3140_v20 = vpop.f32.mrf.mxu1  ;;  %v3733_v24 = vadd.f32 %v3491_v38, %v3136_v4  ;;  %v267_v6 = vld [vmem:[%s5868_s6 + $0x17c] sm:$0xf]  ;;  %v270_v63 = vld [vmem:[%s5868_s6 + $0x188] sm:$0xf] }
 0x241   : > { %v4388_v19 = vadd.f32 %v6560_v55, %v4256_v12  ;;  %v1179_v31 = vshrl.u32 %v267_v6, 16  ;;  %v1182_v28 = vshll.u32 %v267_v6, 16  ;;  %v1212_v9 = vshrl.u32 %v270_v63, 16 }
 0x242   : > { %5612 = vmatmul.msk.bf16.gmra.mxu2 %vm1950_vm1, %v6694_v18 }
 0x243   : > { %vm4516_vm3 = vcmp.gt.f32.partialorder %v4388_v19, 0.0  ;;  %v4644_v10 = vmul.f32 0.2, %v4388_v19  ;;  %5681 = vmatmul.msk.bf16.gmra.mxu3 %vm1950_vm1, %v6691_v61  ;;  %5534 = vmatmul.msk.bf16.gmra.mxu1 %vm1950_vm1, %v6643_v39  ;;  %v1192_v39 = vshrl.u32 %v268_v29, 16  ;;  %v1181_v46 = vrot.slane %v1179_v31, 4 }
 0x244   : > { %v1184_v48 = vrot.slane %v1182_v28, 5 }
 0x245   : > { %v4772_v15 = vsel %vm4516_vm3, %v4388_v19, %v4644_v10  ;;  %v2288_v17 = vpop.f32.mrf.mxu0  ;;  %v3496_v56 = vpop.f32.mrf.mxu2  ;;  %v1194_v38 = vrot.slane %v1192_v39, 4  ;;  %v1208_v19 = vshll.u32 %v270_v63, 16 }
 0x246   : > { %v4900_v21 = vpack.c.bf16 %v4772_v15, %v4772_v15  ;;  %v4015_v32 = vpop.f32.mrf.mxu3  ;;  %v3138_v33 = vadd.f32 %v3137_v49, %v2288_v17  ;;  %v1185_v50 = vor.u32 %v1184_v48, %v1181_v46  ;;  %v1204_v15 = vrot.slane %v1202_v16, 4 }
 0x247   : > { %v4257_v35 = vadd.f32 %v4015_v32, %v3733_v24  ;;  %v1195_v1 = vor.u32 %v1194_v38, %v1190_v37  ;;  %v1210_v17 = vrot.slane %v1208_v19, 5  ;;  %v271_v32 = vld [vmem:[%s5868_s6 + $0x18c] sm:$0x1] }
 0x248   : > { %5029 = vst.msk [vmem:[%s6041_s14 + $0xcc] sm:$0xf] %vm4977_vm6, %v4900_v21  ;;  %v3142_v44 = vpop.f32.mrf.mxu1  ;;  %v3734_v51 = vadd.f32 %v3493_v0, %v3138_v33  ;;  %v1186_v5 = vrot.slane %v1185_v50, 4  ;;  %v1205_v39 = vor.u32 %v1204_v15, %v1200_v7  ;;  %v6771_v15 = vld [vmem:[%s5868_s6 + $0x190] sm:$0xff] }
 0x249   : > { %v4389_v40 = vadd.f32 %v6560_v55, %v4257_v35 }
 0x24a   : > { %v1191_v8 = vsel %vm5887_vm4, %v1186_v5, %v1190_v37  ;;  %v1206_v37 = vrot.slane %v1205_v39, 4 }
 0x24b   : > { %vm4517_vm5 = vcmp.gt.f32.partialorder %v4389_v40, 0.0  ;;  %v4645_v36 = vmul.f32 0.2, %v4389_v40  ;;  %v1829_v6 = vunpack.c.l.b16 %v1191_v8  ;;  %v274_v8 = vld [vmem:[%s5868_s6 + $0x198] sm:$0xf] }
 0x24c   : > { %v1211_v50 = vsel %vm5887_vm4, %v1206_v37, %v1210_v17 }
 0x24d   : > { %v4773_v26 = vsel %vm4517_vm5, %v4389_v40, %v4645_v36  ;;  %v2291_v42 = vpop.f32.mrf.mxu0  ;;  %v3498_v47 = vpop.f32.mrf.mxu2  ;;  %v1218_v40 = vshll.u32 %v271_v32, 16 }
 0x24e   : > { %v4901_v45 = vpack.c.bf16 %v4773_v26, %v4773_v26  ;;  %v4017_v58 = vpop.f32.mrf.mxu3  ;;  %v3141_v49 = vadd.f32 %v3140_v20, %v2291_v42 }
 0x24f   : > { %v4258_v60 = vadd.f32 %v4017_v58, %v3734_v51  ;;  %v1220_v38 = vrot.slane %v1218_v40, 5  ;;  %v273_v58 = vld [vmem:[%s5868_s6 + $0x194] sm:$0xf] }
 0x250   : > { %5030 = vst.msk [vmem:[%s6041_s14 + $0xd0] sm:$0xf] %vm4977_vm6, %v4901_v45  ;;  %5210 = vmatmul.msk.bf16.gmra.mxu0 %vm1950_vm1, %v6666_v13  ;;  %v3145_v57 = vpop.f32.mrf.mxu1  ;;  %v3735_v59 = vadd.f32 %v3496_v56, %v3141_v49  ;;  %v1196_v13 = vrot.slane %v1195_v1, 4  ;;  %v1214_v56 = vrot.slane %v1212_v9, 4 }
 0x251   : > { %v4390_v3 = vadd.f32 %v6560_v55, %v4258_v60 }
 0x252   : > { %5613 = vmatmul.msk.bf16.gmra.mxu2 %vm1950_vm1, %v6720_v62  ;;  %v1215_v36 = vor.u32 %v1214_v56, %v1210_v17 }
 0x253   : > { %vm4518_vm7 = vcmp.gt.f32.partialorder %v4390_v3, 0.0  ;;  %v4646_v54 = vmul.f32 0.2, %v4390_v3  ;;  %5682 = vmatmul.msk.bf16.gmra.mxu3 %vm1950_vm1, %v6717_v43  ;;  %5535 = vmatmul.msk.bf16.gmra.mxu1 %vm1950_vm1, %v6669_v22  ;;  %v1201_v22 = vsel %vm5887_vm4, %v1196_v13, %v1200_v7  ;;  %v1831_v13 = vunpack.c.l.b16 %v1211_v50 }
 0x254   : > { %v1830_v21 = vunpack.c.l.b16 %v1201_v22  ;;  %v1216_v42 = vrot.slane %v1215_v36, 4  ;;  %v1246_v36 = vshrl.u32 %v274_v8, 16 }
 0x255   : > { %v4774_v0 = vsel %vm4518_vm7, %v4390_v3, %v4646_v54  ;;  %v2293_v11 = vpop.f32.mrf.mxu0  ;;  %v3501_v4 = vpop.f32.mrf.mxu2  ;;  %v1232_v54 = vshll.u32 %v273_v58, 16 }
 0x256   : > { %v4902_v2 = vpack.c.bf16 %v4774_v0, %v4774_v0  ;;  %v4020_v12 = vpop.f32.mrf.mxu3  ;;  %v3143_v24 = vadd.f32 %v3142_v44, %v2293_v11  ;;  %v6742_v25 = vpack.c.b16 %v1830_v21, %v1829_v6  ;;  %v1221_v52 = vsel %vm5887_vm4, %v1216_v42, %v1220_v38 }
 0x257   : > { %v4259_v20 = vadd.f32 %v4020_v12, %v3735_v59  ;;  %v1832_v7 = vunpack.c.l.b16 %v1221_v52  ;;  %v1234_v12 = vrot.slane %v1232_v54, 5  ;;  %v1242_v21 = vshll.u32 %v274_v8, 16 }
 0x258   : > { %5031 = vst.msk [vmem:[%s6041_s14 + $0xd4] sm:$0xf] %vm4977_vm6, %v4902_v2  ;;  %v3147_v14 = vpop.f32.mrf.mxu1  ;;  %v3736_v35 = vadd.f32 %v3498_v47, %v3143_v24 }
 0x259   : > { %v4391_v10 = vadd.f32 %v6560_v55, %v4259_v20  ;;  %v6768_v6 = vpack.c.b16 %v1832_v7, %v1831_v13  ;;  %v6796_v7 = vld [vmem:[%s5868_s6 + $0x198] sm:$0xff] }
 0x25b   : > { %vm4519_vm8 = vcmp.gt.f32.partialorder %v4391_v10, 0.0  ;;  %v4647_v29 = vmul.f32 0.2, %v4391_v10 }
 0x25d   : > { %v4775_v23 = vsel %vm4519_vm8, %v4391_v10, %v4647_v29  ;;  %v2296_v27 = vpop.f32.mrf.mxu0  ;;  %v3503_v30 = vpop.f32.mrf.mxu2 }
 0x25e   : > { %v4903_v31 = vpack.c.bf16 %v4775_v23, %v4775_v23  ;;  %v4022_v28 = vpop.f32.mrf.mxu3  ;;  %v3146_v44 = vadd.f32 %v3145_v57, %v2296_v27 }
 0x25f   : > { %v4260_v33 = vadd.f32 %v4022_v28, %v3736_v35  ;;  %v1244_v28 = vrot.slane %v1242_v21, 5 }
 0x260   : > { %5032 = vst.msk [vmem:[%s6041_s14 + $0xd8] sm:$0xf] %vm4977_vm6, %v4903_v31  ;;  %5211 = vmatmul.msk.bf16.gmra.mxu0 %vm1950_vm1, %v6691_v61  ;;  %v3150_v48 = vpop.f32.mrf.mxu1  ;;  %v3737_v51 = vadd.f32 %v3501_v4, %v3146_v44  ;;  %v272_v61 = vld [vmem:[%s5868_s6 + $0x190] sm:$0xf]  ;;  %v275_v31 = vld [vmem:[%s5868_s6 + $0x19c] sm:$0xf] }
 0x261   : > { %v4392_v46 = vadd.f32 %v6560_v55, %v4260_v33  ;;  %v1223_v3 = vshrl.u32 %v272_v61, 16  ;;  %v1226_v57 = vshll.u32 %v272_v61, 16  ;;  %v1256_v38 = vshrl.u32 %v275_v31, 16 }
 0x262   : > { %5614 = vmatmul.msk.bf16.gmra.mxu2 %vm1950_vm1, %v6745_v34 }
 0x263   : > { %vm4520_vm9 = vcmp.gt.f32.partialorder %v4392_v46, 0.0  ;;  %v4648_v26 = vmul.f32 0.2, %v4392_v46  ;;  %5683 = vmatmul.msk.bf16.gmra.mxu3 %vm1950_vm1, %v6742_v25  ;;  %5536 = vmatmul.msk.bf16.gmra.mxu1 %vm1950_vm1, %v6694_v18  ;;  %v1236_v18 = vshrl.u32 %v273_v58, 16  ;;  %v1225_v11 = vrot.slane %v1223_v3, 4 }
 0x264   : > { %v1228_v2 = vrot.slane %v1226_v57, 5 }
 0x265   : > { %v4776_v53 = vsel %vm4520_vm9, %v4392_v46, %v4648_v26  ;;  %v2298_v45 = vpop.f32.mrf.mxu0  ;;  %v3506_v49 = vpop.f32.mrf.mxu2  ;;  %v1238_v4 = vrot.slane %v1236_v18, 4  ;;  %v1252_v46 = vshll.u32 %v275_v31, 16 }
 0x266   : > { %v4904_v47 = vpack.c.bf16 %v4776_v53, %v4776_v53  ;;  %v4025_v60 = vpop.f32.mrf.mxu3  ;;  %v3148_v5 = vadd.f32 %v3147_v14, %v2298_v45  ;;  %v1229_v17 = vor.u32 %v1228_v2, %v1225_v11  ;;  %v1248_v53 = vrot.slane %v1246_v36, 4 }
 0x267   : > { %v4261_v1 = vadd.f32 %v4025_v60, %v3737_v51  ;;  %v1239_v29 = vor.u32 %v1238_v4, %v1234_v12  ;;  %v1254_v45 = vrot.slane %v1252_v46, 5  ;;  %v276_v60 = vld [vmem:[%s5868_s6 + $0x1a0] sm:$0x1] }
 0x268   : > { %5033 = vst.msk [vmem:[%s6041_s14 + $0xdc] sm:$0xf] %vm4977_vm6, %v4904_v47  ;;  %v3152_v63 = vpop.f32.mrf.mxu1  ;;  %v3738_v19 = vadd.f32 %v3503_v30, %v3148_v5  ;;  %v1230_v27 = vrot.slane %v1229_v17, 4  ;;  %v1249_v18 = vor.u32 %v1248_v53, %v1244_v28  ;;  %v6827_v53 = vld [vmem:[%s5868_s6 + $0x1a4] sm:$0xff] }
 0x269   : > { %v4393_v59 = vadd.f32 %v6560_v55, %v4261_v1 }
 0x26a   : > { %v1235_v37 = vsel %vm5887_vm4, %v1230_v27, %v1234_v12  ;;  %v1250_v12 = vrot.slane %v1249_v18, 4 }
 0x26b   : > { %vm4521_vm10 = vcmp.gt.f32.partialorder %v4393_v59, 0.0  ;;  %v4649_v0 = vmul.f32 0.2, %v4393_v59  ;;  %v1833_v61 = vunpack.c.l.b16 %v1235_v37  ;;  %v279_v37 = vld [vmem:[%s5868_s6 + $0x1ac] sm:$0xf] }
 0x26d   : > { %v4777_v16 = vsel %vm4521_vm10, %v4393_v59, %v4649_v0  ;;  %v2301_v20 = vpop.f32.mrf.mxu0  ;;  %v3508_v10 = vpop.f32.mrf.mxu2  ;;  %v1262_v59 = vshll.u32 %v276_v60, 16 }
 0x26e   : > { %v4905_v9 = vpack.c.bf16 %v4777_v16, %v4777_v16  ;;  %v4027_v22 = vpop.f32.mrf.mxu3  ;;  %v3151_v14 = vadd.f32 %v3150_v48, %v2301_v20 }
 0x26f   : > { %v4262_v24 = vadd.f32 %v4027_v22, %v3738_v19  ;;  %v1264_v4 = vrot.slane %v1262_v59, 5 }
 0x270   : > { %5034 = vst.msk [vmem:[%s6041_s14 + $0xe0] sm:$0xf] %vm4977_vm6, %v4905_v9  ;;  %5212 = vmatmul.msk.bf16.gmra.mxu0 %vm1950_vm1, %v6717_v43  ;;  %v3155_v56 = vpop.f32.mrf.mxu1  ;;  %v3739_v35 = vadd.f32 %v3506_v49, %v3151_v14  ;;  %v1240_v43 = vrot.slane %v1239_v29, 4  ;;  %v1258_v49 = vrot.slane %v1256_v38, 4  ;;  %v278_v9 = vld [vmem:[%s5868_s6 + $0x1a8] sm:$0xf]  ;;  %v1255_v14 = vsel %vm5887_vm4, %v1250_v12, %v1254_v45 }
 0x271   : > { %v4394_v32 = vadd.f32 %v6560_v55, %v4262_v24 }
 0x272   : > { %5615 = vmatmul.msk.bf16.gmra.mxu2 %vm1950_vm1, %v6771_v15  ;;  %v1259_v0 = vor.u32 %v1258_v49, %v1254_v45 }
 0x273   : > { %vm4522_vm11 = vcmp.gt.f32.partialorder %v4394_v32, 0.0  ;;  %v4650_v23 = vmul.f32 0.2, %v4394_v32  ;;  %5684 = vmatmul.msk.bf16.gmra.mxu3 %vm1950_vm1, %v6768_v6  ;;  %5537 = vmatmul.msk.bf16.gmra.mxu1 %vm1950_vm1, %v6720_v62  ;;  %v1245_v62 = vsel %vm5887_vm4, %v1240_v43, %v1244_v28  ;;  %v1835_v43 = vunpack.c.l.b16 %v1255_v14 }
 0x274   : > { %v1834_v47 = vunpack.c.l.b16 %v1245_v62  ;;  %v1260_v20 = vrot.slane %v1259_v0, 4  ;;  %v1290_v0 = vshrl.u32 %v279_v37, 16 }
 0x275   : > { %v4778_v30 = vsel %vm4522_vm11, %v4394_v32, %v4650_v23  ;;  %v2303_v39 = vpop.f32.mrf.mxu0  ;;  %v3511_v44 = vpop.f32.mrf.mxu2  ;;  %v6820_v23 = vld [vmem:[%s7501_s2] ss:$0 sm:$0xff] }
 0x276   : > { %v4906_v40 = vpack.c.bf16 %v4778_v30, %v4778_v30  ;;  %v4030_v33 = vpop.f32.mrf.mxu3  ;;  %v3153_v51 = vadd.f32 %v3152_v63, %v2303_v39  ;;  %v6793_v13 = vpack.c.b16 %v1834_v47, %v1833_v61  ;;  %v1265_v29 = vsel %vm5887_vm4, %v1260_v20, %v1264_v4 }
 0x277   : > { %v4263_v48 = vadd.f32 %v4030_v33, %v3739_v35  ;;  %v1836_v28 = vunpack.c.l.b16 %v1265_v29  ;;  %v1286_v47 = vshll.u32 %v279_v37, 16 }
 0x278   : > { %5035 = vst.msk [vmem:[%s6041_s14 + $0xe4] sm:$0xf] %vm4977_vm6, %v4906_v40  ;;  %v3157_v42 = vpop.f32.mrf.mxu1  ;;  %v3740_v1 = vadd.f32 %v3508_v10, %v3153_v51 }
 0x279   : > { %v4395_v26 = vadd.f32 %v6560_v55, %v4263_v48  ;;  %v6824_v61 = vpack.c.b16 %v1836_v28, %v1835_v43  ;;  %v6852_v28 = vld [vmem:[%s5868_s6 + $0x1ac] sm:$0xff] }
 0x27b   : > { %vm4523_vm12 = vcmp.gt.f32.partialorder %v4395_v26, 0.0  ;;  %v4651_v58 = vmul.f32 0.2, %v4395_v26 }
 0x27d   : > { %v4779_v50 = vsel %vm4523_vm12, %v4395_v26, %v4651_v58  ;;  %v2306_v52 = vpop.f32.mrf.mxu0  ;;  %v3513_v54 = vpop.f32.mrf.mxu2 }
 0x27e   : > { %v4907_v3 = vpack.c.bf16 %v4779_v50, %v4779_v50  ;;  %v4032_v57 = vpop.f32.mrf.mxu3  ;;  %v3156_v63 = vadd.f32 %v3155_v56, %v2306_v52  ;;  %v1276_v56 = vshll.u32 %v278_v9, 16 }
 0x27f   : > { %v4264_v5 = vadd.f32 %v4032_v57, %v3740_v1  ;;  %v1288_v57 = vrot.slane %v1286_v47, 5 }
 0x280   : > { %5036 = vst.msk [vmem:[%s6041_s14 + $0xe8] sm:$0xf] %vm4977_vm6, %v4907_v3  ;;  %5213 = vmatmul.msk.bf16.gmra.mxu0 %vm1950_vm1, %v6742_v25  ;;  %v3160_v2 = vpop.f32.mrf.mxu1  ;;  %v3741_v19 = vadd.f32 %v3511_v44, %v3156_v63  ;;  %v277_v25 = vld [vmem:[%s5868_s6 + $0x1a4] sm:$0xf]  ;;  %v1278_v33 = vrot.slane %v1276_v56, 5 }
 0x281   : > { %v4396_v11 = vadd.f32 %v6560_v55, %v4264_v5  ;;  %v1267_v21 = vshrl.u32 %v277_v25, 16  ;;  %v1270_v32 = vshll.u32 %v277_v25, 16  ;;  %v280_v3 = vld [vmem:[%s5868_s6 + $0x1b0] sm:$0xf] }
 0x282   : > { %5616 = vmatmul.msk.bf16.gmra.mxu2 %vm1950_vm1, %v6796_v7  ;;  %v1300_v4 = vshrl.u32 %v280_v3, 16 }
 0x283   : > { %vm4524_vm13 = vcmp.gt.f32.partialorder %v4396_v11, 0.0  ;;  %v4652_v16 = vmul.f32 0.2, %v4396_v11  ;;  %5685 = vmatmul.msk.bf16.gmra.mxu3 %vm1950_vm1, %v6793_v13  ;;  %5538 = vmatmul.msk.bf16.gmra.mxu1 %vm1950_vm1, %v6745_v34  ;;  %v1280_v34 = vshrl.u32 %v278_v9, 16  ;;  %v1269_v39 = vrot.slane %v1267_v21, 4 }
 0x284   : > { %v1272_v40 = vrot.slane %v1270_v32, 5 }
 0x285   : > { %v4780_v8 = vsel %vm4524_vm13, %v4396_v11, %v4652_v16  ;;  %v2308_v55 = vpop.f32.mrf.mxu0  ;;  %v3516_v24 = vpop.f32.mrf.mxu2  ;;  %v1282_v44 = vrot.slane %v1280_v34, 4  ;;  %v1296_v11 = vshll.u32 %v280_v3, 16 }
 0x286   : > { %v4908_v22 = vpack.c.bf16 %v4780_v8, %v4780_v8  ;;  %v4035_v10 = vpop.f32.mrf.mxu3  ;;  %v3158_v27 = vadd.f32 %v3157_v42, %v2308_v55  ;;  %v1273_v45 = vor.u32 %v1272_v40, %v1269_v39  ;;  %v1292_v8 = vrot.slane %v1290_v0, 4 }
 0x287   : > { %v4265_v17 = vadd.f32 %v4035_v10, %v3741_v19  ;;  %v1283_v58 = vor.u32 %v1282_v44, %v1278_v33  ;;  %v1298_v55 = vrot.slane %v1296_v11, 5  ;;  %v281_v10 = vld [vmem:[%s5868_s6 + $0x1b4] sm:$0x1] }
 0x288   : > { %5037 = vst.msk [vmem:[%s6041_s14 + $0xec] sm:$0xf] %vm4977_vm6, %v4908_v22  ;;  %v3162_v31 = vpop.f32.mrf.mxu1  ;;  %v3742_v46 = vadd.f32 %v3513_v54, %v3158_v27  ;;  %v1274_v52 = vrot.slane %v1273_v45, 4  ;;  %v1293_v34 = vor.u32 %v1292_v8, %v1288_v57  ;;  %v6878_v8 = vld [vmem:[%s5868_s6 + $0x1b8] sm:$0xff] }
 0x289   : > { %v4397_v35 = vadd.f32 %v6820_v23, %v4265_v17 }
 0x28a   : > { %v1279_v12 = vsel %vm5887_vm4, %v1274_v52, %v1278_v33  ;;  %v1294_v33 = vrot.slane %v1293_v34, 4 }
 0x28b   : > { %vm4525_vm14 = vcmp.gt.f32.partialorder %v4397_v35, 0.0  ;;  %v4653_v30 = vmul.f32 0.2, %v4397_v35  ;;  %v1837_v25 = vunpack.c.l.b16 %v1279_v12  ;;  %v284_v12 = vld [vmem:[%s5868_s6 + $0x1c0] sm:$0xf] }
 0x28c   : > { %v1299_v45 = vsel %vm5887_vm4, %v1294_v33, %v1298_v55 }
 0x28d   : > { %v4781_v36 = vsel %vm4525_vm14, %v4397_v35, %v4653_v30  ;;  %v2311_v48 = vpop.f32.mrf.mxu0  ;;  %v3518_v26 = vpop.f32.mrf.mxu2  ;;  %v1306_v35 = vshll.u32 %v281_v10, 16 }
 0x28e   : > { %v4909_v38 = vpack.c.bf16 %v4781_v36, %v4781_v36  ;;  %v4037_v62 = vpop.f32.mrf.mxu3  ;;  %v3161_v42 = vadd.f32 %v3160_v2, %v2311_v48 }
 0x28f   : > { %v4266_v51 = vadd.f32 %v4037_v62, %v3742_v46  ;;  %v1308_v44 = vrot.slane %v1306_v35, 5  ;;  %v283_v62 = vld [vmem:[%s5868_s6 + $0x1bc] sm:$0xf] }
 0x290   : > { %5038 = vst.msk [vmem:[%s6041_s14 + $0xf0] sm:$0xf] %vm4977_vm6, %v4909_v38  ;;  %5214 = vmatmul.msk.bf16.gmra.mxu0 %vm1950_vm1, %v6768_v6  ;;  %v3165_v49 = vpop.f32.mrf.mxu1  ;;  %v3743_v1 = vadd.f32 %v3516_v24, %v3161_v42  ;;  %v1284_v6 = vrot.slane %v1283_v58, 4  ;;  %v1302_v24 = vrot.slane %v1300_v4, 4 }
 0x291   : > { %v4398_v60 = vadd.f32 %v6820_v23, %v4266_v51 }
 0x292   : > { %5617 = vmatmul.msk.bf16.gmra.mxu2 %vm1950_vm1, %v6827_v53  ;;  %v1303_v30 = vor.u32 %v1302_v24, %v1298_v55 }
 0x293   : > { %vm4526_vm15 = vcmp.gt.f32.partialorder %v4398_v60, 0.0  ;;  %v4654_v50 = vmul.f32 0.2, %v4398_v60  ;;  %5686 = vmatmul.msk.bf16.gmra.mxu3 %vm1950_vm1, %v6824_v61  ;;  %5539 = vmatmul.msk.bf16.gmra.mxu1 %vm1950_vm1, %v6771_v15  ;;  %v1289_v15 = vsel %vm5887_vm4, %v1284_v6, %v1288_v57  ;;  %v1839_v6 = vunpack.c.l.b16 %v1299_v45 }
 0x294   : > { %v1838_v22 = vunpack.c.l.b16 %v1289_v15  ;;  %v1304_v48 = vrot.slane %v1303_v30, 4  ;;  %v1334_v30 = vshrl.u32 %v284_v12, 16 }
 0x295   : > { %v4782_v54 = vsel %vm4526_vm15, %v4398_v60, %v4654_v50  ;;  %v2313_v18 = vpop.f32.mrf.mxu0  ;;  %v3521_v63 = vpop.f32.mrf.mxu2  ;;  %v1320_v50 = vshll.u32 %v283_v62, 16 }
 0x296   : > { %v4910_v59 = vpack.c.bf16 %v4782_v54, %v4782_v54  ;;  %v4040_v5 = vpop.f32.mrf.mxu3  ;;  %v3163_v19 = vadd.f32 %v3162_v31, %v2313_v18  ;;  %v6849_v43 = vpack.c.b16 %v1838_v22, %v1837_v25  ;;  %v1309_v47 = vsel %vm5887_vm4, %v1304_v48, %v1308_v44 }
 0x297   : > { %v4267_v2 = vadd.f32 %v4040_v5, %v3743_v1  ;;  %v1840_v57 = vunpack.c.l.b16 %v1309_v47  ;;  %v1322_v5 = vrot.slane %v1320_v50, 5  ;;  %v1330_v22 = vshll.u32 %v284_v12, 16 }
 0x298   : > { %5039 = vst.msk [vmem:[%s6041_s14 + $0xf4] sm:$0xf] %vm4977_vm6, %v4910_v59  ;;  %v3167_v20 = vpop.f32.mrf.mxu1  ;;  %v3744_v17 = vadd.f32 %v3518_v26, %v3163_v19 }
 0x299   : > { %v4399_v16 = vadd.f32 %v6820_v23, %v4267_v2  ;;  %v6875_v25 = vpack.c.b16 %v1840_v57, %v1839_v6  ;;  %v6903_v57 = vld [vmem:[%s5868_s6 + $0x1c0] sm:$0xff] }
 0x29b   : > { %vm4527_vm0 = vcmp.gt.f32.partialorder %v4399_v16, 0.0  ;;  %v4655_v9 = vmul.f32 0.2, %v4399_v16 }
 0x29d   : > { %v4783_v14 = vsel %vm4527_vm0, %v4399_v16, %v4655_v9  ;;  %v2316_v29 = vpop.f32.mrf.mxu0  ;;  %v3523_v56 = vpop.f32.mrf.mxu2 }
 0x29e   : > { %v4911_v21 = vpack.c.bf16 %v4783_v14, %v4783_v14  ;;  %v4042_v32 = vpop.f32.mrf.mxu3  ;;  %v3166_v31 = vadd.f32 %v3165_v49, %v2316_v29 }
 0x29f   : > { %v4268_v27 = vadd.f32 %v4042_v32, %v3744_v17  ;;  %v1332_v32 = vrot.slane %v1330_v22, 5 }
 0x2a0   : > { %5040 = vst.msk [vmem:[%s6041_s14 + $0xf8] sm:$0xf] %vm4977_vm6, %v4911_v21  ;;  %5215 = vmatmul.msk.bf16.gmra.mxu0 %vm1950_vm1, %v6793_v13  ;;  %v3170_v40 = vpop.f32.mrf.mxu1  ;;  %v3745_v46 = vadd.f32 %v3521_v63, %v3166_v31  ;;  %v282_v13 = vld [vmem:[%s5868_s6 + $0x1b8] sm:$0xf]  ;;  %v285_v21 = vld [vmem:[%s5868_s6 + $0x1c4] sm:$0xf] }
 0x2a1   : > { %v4400_v39 = vadd.f32 %v6820_v23, %v4268_v27  ;;  %v1311_v60 = vshrl.u32 %v282_v13, 16  ;;  %v1314_v49 = vshll.u32 %v282_v13, 16  ;;  %v1344_v44 = vshrl.u32 %v285_v21, 16 }
 0x2a2   : > { %5618 = vmatmul.msk.bf16.gmra.mxu2 %vm1950_vm1, %v6852_v28 }
 0x2a3   : > { %vm4528_vm2 = vcmp.gt.f32.partialorder %v4400_v39, 0.0  ;;  %v4656_v36 = vmul.f32 0.2, %v4400_v39  ;;  %5687 = vmatmul.msk.bf16.gmra.mxu3 %vm1950_vm1, %v6849_v43  ;;  %5540 = vmatmul.msk.bf16.gmra.mxu1 %vm1950_vm1, %v6796_v7  ;;  %v1324_v7 = vshrl.u32 %v283_v62, 16  ;;  %v1313_v18 = vrot.slane %v1311_v60, 4 }
 0x2a4   : > { %v1316_v59 = vrot.slane %v1314_v49, 5 }
 0x2a5   : > { %v4784_v37 = vsel %vm4528_vm2, %v4400_v39, %v4656_v36  ;;  %v2318_v38 = vpop.f32.mrf.mxu0  ;;  %v3526_v42 = vpop.f32.mrf.mxu2  ;;  %v1326_v63 = vrot.slane %v1324_v7, 4  ;;  %v1340_v39 = vshll.u32 %v285_v21, 16 }
 0x2a6   : > { %v4912_v26 = vpack.c.bf16 %v4784_v37, %v4784_v37  ;;  %v4045_v51 = vpop.f32.mrf.mxu3  ;;  %v3168_v52 = vadd.f32 %v3167_v20, %v2318_v38  ;;  %v1317_v55 = vor.u32 %v1316_v59, %v1313_v18  ;;  %v1336_v37 = vrot.slane %v1334_v30, 4 }
 0x2a7   : > { %v4269_v58 = vadd.f32 %v4045_v51, %v3745_v46  ;;  %v1327_v9 = vor.u32 %v1326_v63, %v1322_v5  ;;  %v1342_v38 = vrot.slane %v1340_v39, 5  ;;  %v286_v51 = vld [vmem:[%s5868_s6 + $0x1c8] sm:$0x1] }
 0x2a8   : > { %5041 = vst.msk [vmem:[%s6041_s14 + $0xfc] sm:$0xf] %vm4977_vm6, %v4912_v26  ;;  %v3172_v3 = vpop.f32.mrf.mxu1  ;;  %v3746_v11 = vadd.f32 %v3523_v56, %v3168_v52  ;;  %v1318_v29 = vrot.slane %v1317_v55, 4  ;;  %v1337_v7 = vor.u32 %v1336_v37, %v1332_v32  ;;  %v6929_v37 = vld [vmem:[%s5868_s6 + $0x1cc] sm:$0xff] }
 0x2a9   : > { %v4401_v1 = vadd.f32 %v6820_v23, %v4269_v58 }
 0x2aa   : > { %v1323_v33 = vsel %vm5887_vm4, %v1318_v29, %v1322_v5  ;;  %v1338_v5 = vrot.slane %v1337_v7, 4 }
 0x2ab   : > { %vm4529_vm3 = vcmp.gt.f32.partialorder %v4401_v1, 0.0  ;;  %v4657_v54 = vmul.f32 0.2, %v4401_v1  ;;  %v1841_v13 = vunpack.c.l.b16 %v1323_v33  ;;  %v289_v33 = vld [vmem:[%s5868_s6 + $0x1d4] sm:$0xf] }
 0x2ac   : > { %v1343_v55 = vsel %vm5887_vm4, %v1338_v5, %v1342_v38 }
 0x2ad   : > { %v4785_v0 = vsel %vm4529_vm3, %v4401_v1, %v4657_v54  ;;  %v2321_v2 = vpop.f32.mrf.mxu0  ;;  %v3528_v16 = vpop.f32.mrf.mxu2  ;;  %v1350_v1 = vshll.u32 %v286_v51, 16 }
 0x2ae   : > { %v4913_v4 = vpack.c.bf16 %v4785_v0, %v4785_v0  ;;  %v4047_v15 = vpop.f32.mrf.mxu3  ;;  %v3171_v20 = vadd.f32 %v3170_v40, %v2321_v2 }
 0x2af   : > { %v4270_v19 = vadd.f32 %v4047_v15, %v3746_v11  ;;  %v1352_v63 = vrot.slane %v1350_v1, 5  ;;  %v288_v15 = vld [vmem:[%s5868_s6 + $0x1d0] sm:$0xf] }
 0x2b0   : > { %5042 = vst.msk [vmem:[%s6041_s14 + $0x100] sm:$0xf] %vm4977_vm6, %v4913_v4  ;;  %5216 = vmatmul.msk.bf16.gmra.mxu0 %vm1950_vm1, %v6824_v61  ;;  %v3175_v24 = vpop.f32.mrf.mxu1  ;;  %v3747_v17 = vadd.f32 %v3526_v42, %v3171_v20  ;;  %v1328_v61 = vrot.slane %v1327_v9, 4  ;;  %v1346_v42 = vrot.slane %v1344_v44, 4 }
 0x2b1   : > { %v4402_v10 = vadd.f32 %v6820_v23, %v4270_v19 }
 0x2b2   : > { %5619 = vmatmul.msk.bf16.gmra.mxu2 %vm1950_vm1, %v6878_v8  ;;  %v1347_v54 = vor.u32 %v1346_v42, %v1342_v38 }
 0x2b3   : > { %vm4530_vm5 = vcmp.gt.f32.partialorder %v4402_v10, 0.0  ;;  %v4658_v14 = vmul.f32 0.2, %v4402_v10  ;;  %5688 = vmatmul.msk.bf16.gmra.mxu3 %vm1950_vm1, %v6875_v25  ;;  %5541 = vmatmul.msk.bf16.gmra.mxu1 %vm1950_vm1, %v6827_v53  ;;  %v1333_v53 = vsel %vm5887_vm4, %v1328_v61, %v1332_v32  ;;  %v1843_v61 = vunpack.c.l.b16 %v1343_v55 }
 0x2b4   : > { %v1842_v26 = vunpack.c.l.b16 %v1333_v53  ;;  %v1348_v2 = vrot.slane %v1347_v54, 4  ;;  %v1378_v54 = vshrl.u32 %v289_v33, 16 }
 0x2b5   : > { %v4786_v56 = vsel %vm4530_vm5, %v4402_v10, %v4658_v14  ;;  %v2323_v34 = vpop.f32.mrf.mxu0  ;;  %v3531_v31 = vpop.f32.mrf.mxu2  ;;  %v1364_v14 = vshll.u32 %v288_v15, 16 }
 0x2b6   : > { %v4914_v35 = vpack.c.bf16 %v4786_v56, %v4786_v56  ;;  %v4050_v27 = vpop.f32.mrf.mxu3  ;;  %v3173_v46 = vadd.f32 %v3172_v3, %v2323_v34  ;;  %v6900_v6 = vpack.c.b16 %v1842_v26, %v1841_v13  ;;  %v1353_v22 = vsel %vm5887_vm4, %v1348_v2, %v1352_v63 }
 0x2b7   : > { %v4271_v40 = vadd.f32 %v4050_v27, %v3747_v17  ;;  %v1844_v32 = vunpack.c.l.b16 %v1353_v22  ;;  %v1366_v27 = vrot.slane %v1364_v14, 5  ;;  %v1374_v26 = vshll.u32 %v289_v33, 16 }
 0x2b8   : > { %5043 = vst.msk [vmem:[%s6041_s14 + $0x104] sm:$0xf] %vm4977_vm6, %v4914_v35  ;;  %v3177_v48 = vpop.f32.mrf.mxu1  ;;  %v3748_v58 = vadd.f32 %v3528_v16, %v3173_v46 }
 0x2b9   : > { %v4403_v36 = vadd.f32 %v6820_v23, %v4271_v40  ;;  %v6926_v13 = vpack.c.b16 %v1844_v32, %v1843_v61  ;;  %v6954_v32 = vld [vmem:[%s5868_s6 + $0x1d4] sm:$0xff] }
 0x2bb   : > { %vm4531_vm7 = vcmp.gt.f32.partialorder %v4403_v36, 0.0  ;;  %v4659_v62 = vmul.f32 0.2, %v4403_v36 }
 0x2bd   : > { %v4787_v45 = vsel %vm4531_vm7, %v4403_v36, %v4659_v62  ;;  %v2326_v47 = vpop.f32.mrf.mxu0  ;;  %v3533_v50 = vpop.f32.mrf.mxu2 }
 0x2be   : > { %v4915_v60 = vpack.c.bf16 %v4787_v45, %v4787_v45  ;;  %v4052_v49 = vpop.f32.mrf.mxu3  ;;  %v3176_v3 = vadd.f32 %v3175_v24, %v2326_v47 }
 0x2bf   : > { %v4272_v52 = vadd.f32 %v4052_v49, %v3748_v58  ;;  %v1376_v49 = vrot.slane %v1374_v26, 5 }
 0x2c0   : > { %5044 = vst.msk [vmem:[%s6041_s14 + $0x108] sm:$0xf] %vm4977_vm6, %v4915_v60  ;;  %5217 = vmatmul.msk.bf16.gmra.mxu0 %vm1950_vm1, %v6849_v43  ;;  %v3180_v59 = vpop.f32.mrf.mxu1  ;;  %v3749_v11 = vadd.f32 %v3531_v31, %v3176_v3  ;;  %v287_v43 = vld [vmem:[%s5868_s6 + $0x1cc] sm:$0xf]  ;;  %v290_v60 = vld [vmem:[%s5868_s6 + $0x1d8] sm:$0xf] }
 0x2c1   : > { %v4404_v18 = vadd.f32 %v6820_v23, %v4272_v52  ;;  %v1355_v10 = vshrl.u32 %v287_v43, 16  ;;  %v1358_v24 = vshll.u32 %v287_v43, 16  ;;  %v1388_v63 = vshrl.u32 %v290_v60, 16 }
 0x2c2   : > { %5620 = vmatmul.msk.bf16.gmra.mxu2 %vm1950_vm1, %v6903_v57 }
 0x2c3   : > { %vm4532_vm8 = vcmp.gt.f32.partialorder %v4404_v18, 0.0  ;;  %v4660_v0 = vmul.f32 0.2, %v4404_v18  ;;  %5689 = vmatmul.msk.bf16.gmra.mxu3 %vm1950_vm1, %v6900_v6  ;;  %5542 = vmatmul.msk.bf16.gmra.mxu1 %vm1950_vm1, %v6852_v28  ;;  %v1368_v28 = vshrl.u32 %v288_v15, 16  ;;  %v1357_v34 = vrot.slane %v1355_v10, 4 }
 0x2c4   : > { %v1360_v35 = vrot.slane %v1358_v24, 5 }
 0x2c5   : > { %v4788_v12 = vsel %vm4532_vm8, %v4404_v18, %v4660_v0  ;;  %v2328_v4 = vpop.f32.mrf.mxu0  ;;  %v3536_v20 = vpop.f32.mrf.mxu2  ;;  %v1370_v31 = vrot.slane %v1368_v28, 4  ;;  %v1384_v18 = vshll.u32 %v290_v60, 16 }
 0x2c6   : > { %v4916_v16 = vpack.c.bf16 %v4788_v12, %v4788_v12  ;;  %v4055_v19 = vpop.f32.mrf.mxu3  ;;  %v3178_v29 = vadd.f32 %v3177_v48, %v2328_v4  ;;  %v1361_v38 = vor.u32 %v1360_v35, %v1357_v34  ;;  %v1380_v12 = vrot.slane %v1378_v54, 4 }
 0x2c7   : > { %v4273_v9 = vadd.f32 %v4055_v19, %v3749_v11  ;;  %v1371_v62 = vor.u32 %v1370_v31, %v1366_v27  ;;  %v1386_v4 = vrot.slane %v1384_v18, 5  ;;  %v291_v19 = vld [vmem:[%s5868_s6 + $0x1dc] sm:$0x1] }
 0x2c8   : > { %5045 = vst.msk [vmem:[%s6041_s14 + $0x10c] sm:$0xf] %vm4977_vm6, %v4916_v16  ;;  %v3182_v21 = vpop.f32.mrf.mxu1  ;;  %v3750_v39 = vadd.f32 %v3533_v50, %v3178_v29  ;;  %v1362_v47 = vrot.slane %v1361_v38, 4  ;;  %v1381_v28 = vor.u32 %v1380_v12, %v1376_v49  ;;  %v6980_v12 = vld [vmem:[%s5868_s6 + $0x1e0] sm:$0xff] }
 0x2c9   : > { %v4405_v17 = vadd.f32 %v6820_v23, %v4273_v9 }
 0x2ca   : > { %v1367_v5 = vsel %vm5887_vm4, %v1362_v47, %v1366_v27  ;;  %v1382_v27 = vrot.slane %v1381_v28, 4 }
 0x2cb   : > { %vm4533_vm9 = vcmp.gt.f32.partialorder %v4405_v17, 0.0  ;;  %v4661_v56 = vmul.f32 0.2, %v4405_v17  ;;  %v1845_v43 = vunpack.c.l.b16 %v1367_v5  ;;  %v294_v5 = vld [vmem:[%s5868_s6 + $0x1e8] sm:$0xf] }
 0x2cc   : > { %v1387_v38 = vsel %vm5887_vm4, %v1382_v27, %v1386_v4 }
 0x2cd   : > { %v4789_v30 = vsel %vm4533_vm9, %v4405_v17, %v4661_v56  ;;  %v2331_v40 = vpop.f32.mrf.mxu0  ;;  %v3538_v36 = vpop.f32.mrf.mxu2  ;;  %v1394_v17 = vshll.u32 %v291_v19, 16 }
 0x2ce   : > { %v4917_v44 = vpack.c.bf16 %v4789_v30, %v4789_v30  ;;  %v4057_v53 = vpop.f32.mrf.mxu3  ;;  %v3181_v48 = vadd.f32 %v3180_v59, %v2331_v40 }
 0x2cf   : > { %v4274_v46 = vadd.f32 %v4057_v53, %v3750_v39  ;;  %v1396_v31 = vrot.slane %v1394_v17, 5  ;;  %v293_v53 = vld [vmem:[%s5868_s6 + $0x1e4] sm:$0xf] }
 0x2d0   : > { %5046 = vst.msk [vmem:[%s6041_s14 + $0x110] sm:$0xf] %vm4977_vm6, %v4917_v44  ;;  %5218 = vmatmul.msk.bf16.gmra.mxu0 %vm1950_vm1, %v6875_v25  ;;  %v3185_v42 = vpop.f32.mrf.mxu1  ;;  %v3751_v58 = vadd.f32 %v3536_v20, %v3181_v48  ;;  %v1372_v25 = vrot.slane %v1371_v62, 4  ;;  %v1390_v20 = vrot.slane %v1388_v63, 4 }
 0x2d1   : > { %v4406_v51 = vadd.f32 %v6820_v23, %v4274_v46 }
 0x2d2   : > { %5621 = vmatmul.msk.bf16.gmra.mxu2 %vm1950_vm1, %v6929_v37  ;;  %v1391_v56 = vor.u32 %v1390_v20, %v1386_v4 }
 0x2d3   : > { %vm4534_vm10 = vcmp.gt.f32.partialorder %v4406_v51, 0.0  ;;  %v4662_v45 = vmul.f32 0.2, %v4406_v51  ;;  %5690 = vmatmul.msk.bf16.gmra.mxu3 %vm1950_vm1, %v6926_v13  ;;  %5543 = vmatmul.msk.bf16.gmra.mxu1 %vm1950_vm1, %v6878_v8  ;;  %v1377_v8 = vsel %vm5887_vm4, %v1372_v25, %v1376_v49  ;;  %v1847_v25 = vunpack.c.l.b16 %v1387_v38 }
 0x2d4   : > { %v1846_v16 = vunpack.c.l.b16 %v1377_v8  ;;  %v1392_v40 = vrot.slane %v1391_v56, 4  ;;  %v1422_v56 = vshrl.u32 %v294_v5, 16 }
 0x2d5   : > { %v4790_v50 = vsel %vm4534_vm10, %v4406_v51, %v4662_v45  ;;  %v2333_v7 = vpop.f32.mrf.mxu0  ;;  %v3541_v3 = vpop.f32.mrf.mxu2  ;;  %v1408_v45 = vshll.u32 %v293_v53, 16 }
 0x2d6   : > { %v4918_v1 = vpack.c.bf16 %v4790_v50, %v4790_v50  ;;  %v4060_v52 = vpop.f32.mrf.mxu3  ;;  %v3183_v11 = vadd.f32 %v3182_v21, %v2333_v7  ;;  %v6951_v61 = vpack.c.b16 %v1846_v16, %v1845_v43  ;;  %v1397_v26 = vsel %vm5887_vm4, %v1392_v40, %v1396_v31 }
 0x2d7   : > { %v4275_v59 = vadd.f32 %v4060_v52, %v3751_v58  ;;  %v1848_v49 = vunpack.c.l.b16 %v1397_v26  ;;  %v1410_v52 = vrot.slane %v1408_v45, 5  ;;  %v1418_v16 = vshll.u32 %v294_v5, 16 }
 0x2d8   : > { %5047 = vst.msk [vmem:[%s6041_s14 + $0x114] sm:$0xf] %vm4977_vm6, %v4918_v1  ;;  %v3187_v2 = vpop.f32.mrf.mxu1  ;;  %v3752_v9 = vadd.f32 %v3538_v36, %v3183_v11 }
 0x2d9   : > { %v4407_v0 = vadd.f32 %v6820_v23, %v4275_v59  ;;  %v6977_v43 = vpack.c.b16 %v1848_v49, %v1847_v25  ;;  %v7005_v49 = vld [vmem:[%s5868_s6 + $0x1e8] sm:$0xff] }
 0x2db   : > { %vm4535_vm11 = vcmp.gt.f32.partialorder %v4407_v0, 0.0  ;;  %v4663_v15 = vmul.f32 0.2, %v4407_v0 }
 0x2dd   : > { %v4791_v55 = vsel %vm4535_vm11, %v4407_v0, %v4663_v15  ;;  %v2336_v22 = vpop.f32.mrf.mxu0  ;;  %v3543_v14 = vpop.f32.mrf.mxu2 }
 0x2de   : > { %v4919_v10 = vpack.c.bf16 %v4791_v55, %v4791_v55  ;;  %v4062_v24 = vpop.f32.mrf.mxu3  ;;  %v3186_v21 = vadd.f32 %v3185_v42, %v2336_v22 }
 0x2df   : > { %v4276_v29 = vadd.f32 %v4062_v24, %v3752_v9  ;;  %v1420_v24 = vrot.slane %v1418_v16, 5 }
 0x2e0   : > { %5048 = vst.msk [vmem:[%s6041_s14 + $0x118] sm:$0xf] %vm4977_vm6, %v4919_v10  ;;  %5219 = vmatmul.msk.bf16.gmra.mxu0 %vm1950_vm1, %v6900_v6  ;;  %v3190_v35 = vpop.f32.mrf.mxu1  ;;  %v3753_v39 = vadd.f32 %v3541_v3, %v3186_v21  ;;  %v292_v6 = vld [vmem:[%s5868_s6 + $0x1e0] sm:$0xf]  ;;  %v295_v10 = vld [vmem:[%s5868_s6 + $0x1ec] sm:$0xf] }
 0x2e1   : > { %v4408_v34 = vadd.f32 %v6820_v23, %v4276_v29  ;;  %v1399_v51 = vshrl.u32 %v292_v6, 16  ;;  %v1402_v42 = vshll.u32 %v292_v6, 16  ;;  %v1432_v31 = vshrl.u32 %v295_v10, 16 }
 0x2e2   : > { %5622 = vmatmul.msk.bf16.gmra.mxu2 %vm1950_vm1, %v6954_v32 }
 0x2e3   : > { %vm4536_vm12 = vcmp.gt.f32.partialorder %v4408_v34, 0.0  ;;  %v4664_v30 = vmul.f32 0.2, %v4408_v34  ;;  %5691 = vmatmul.msk.bf16.gmra.mxu3 %vm1950_vm1, %v6951_v61  ;;  %5544 = vmatmul.msk.bf16.gmra.mxu1 %vm1950_vm1, %v6903_v57  ;;  %v1412_v57 = vshrl.u32 %v293_v53, 16  ;;  %v1401_v7 = vrot.slane %v1399_v51, 4 }
 0x2e4   : > { %v1404_v1 = vrot.slane %v1402_v42, 5 }
 0x2e5   : > { %v4792_v33 = vsel %vm4536_vm12, %v4408_v34, %v4664_v30  ;;  %v2338_v44 = vpop.f32.mrf.mxu0  ;;  %v3546_v48 = vpop.f32.mrf.mxu2  ;;  %v1414_v3 = vrot.slane %v1412_v57, 4  ;;  %v1428_v34 = vshll.u32 %v295_v10, 16 }
 0x2e6   : > { %v4920_v36 = vpack.c.bf16 %v4792_v33, %v4792_v33  ;;  %v4065_v46 = vpop.f32.mrf.mxu3  ;;  %v3188_v47 = vadd.f32 %v3187_v2, %v2338_v44  ;;  %v1405_v4 = vor.u32 %v1404_v1, %v1401_v7  ;;  %v1424_v33 = vrot.slane %v1422_v56, 4 }
 0x2e7   : > { %v4277_v62 = vadd.f32 %v4065_v46, %v3753_v39  ;;  %v1415_v15 = vor.u32 %v1414_v3, %v1410_v52  ;;  %v1430_v44 = vrot.slane %v1428_v34, 5  ;;  %v296_v46 = vld [vmem:[%s5868_s6 + $0x1f0] sm:$0x1] }
 0x2e8   : > { %5049 = vst.msk [vmem:[%s6041_s14 + $0x11c] sm:$0xf] %vm4977_vm6, %v4920_v36  ;;  %v3192_v60 = vpop.f32.mrf.mxu1  ;;  %v3754_v18 = vadd.f32 %v3543_v14, %v3188_v47  ;;  %v1406_v22 = vrot.slane %v1405_v4, 4  ;;  %v1425_v57 = vor.u32 %v1424_v33, %v1420_v24  ;;  %v7031_v33 = vld [vmem:[%s5868_s6 + $0x1f4] sm:$0xff] }
 0x2e9   : > { %v4409_v58 = vadd.f32 %v6820_v23, %v4277_v62 }
 0x2ea   : > { %v1411_v27 = vsel %vm5887_vm4, %v1406_v22, %v1410_v52  ;;  %v1426_v52 = vrot.slane %v1425_v57, 4 }
 0x2eb   : > { %vm4537_vm13 = vcmp.gt.f32.partialorder %v4409_v58, 0.0  ;;  %v4665_v50 = vmul.f32 0.2, %v4409_v58  ;;  %v1849_v6 = vunpack.c.l.b16 %v1411_v27  ;;  %v299_v27 = vld [vmem:[%s5868_s6 + $0x1fc] sm:$0xf] }
 0x2ec   : > { %v1431_v4 = vsel %vm5887_vm4, %v1426_v52, %v1430_v44 }
 0x2ed   : > { %v4793_v54 = vsel %vm4537_vm13, %v4409_v58, %v4665_v50  ;;  %v2341_v59 = vpop.f32.mrf.mxu0  ;;  %v3548_v0 = vpop.f32.mrf.mxu2  ;;  %v1438_v58 = vshll.u32 %v296_v46, 16 }
 0x2ee   : > { %v4921_v63 = vpack.c.bf16 %v4793_v54, %v4793_v54  ;;  %v4067_v8 = vpop.f32.mrf.mxu3  ;;  %v3191_v2 = vadd.f32 %v3190_v35, %v2341_v59 }
 0x2ef   : > { %v4278_v11 = vadd.f32 %v4067_v8, %v3754_v18  ;;  %v1440_v3 = vrot.slane %v1438_v58, 5  ;;  %v298_v8 = vld [vmem:[%s5868_s6 + $0x1f8] sm:$0xf] }
 0x2f0   : > { %5050 = vst.msk [vmem:[%s6041_s14 + $0x120] sm:$0xf] %vm4977_vm6, %v4921_v63  ;;  %5220 = vmatmul.msk.bf16.gmra.mxu0 %vm1950_vm1, %v6926_v13  ;;  %v3195_v20 = vpop.f32.mrf.mxu1  ;;  %v3755_v9 = vadd.f32 %v3546_v48, %v3191_v2  ;;  %v1416_v13 = vrot.slane %v1415_v15, 4  ;;  %v1434_v48 = vrot.slane %v1432_v31, 4 }
 0x2f1   : > { %v4410_v19 = vadd.f32 %v6820_v23, %v4278_v11 }
 0x2f2   : > { %5623 = vmatmul.msk.bf16.gmra.mxu2 %vm1950_vm1, %v6980_v12  ;;  %v1435_v50 = vor.u32 %v1434_v48, %v1430_v44 }
 0x2f3   : > { %vm4538_vm14 = vcmp.gt.f32.partialorder %v4410_v19, 0.0  ;;  %v4666_v55 = vmul.f32 0.2, %v4410_v19  ;;  %5692 = vmatmul.msk.bf16.gmra.mxu3 %vm1950_vm1, %v6977_v43  ;;  %5545 = vmatmul.msk.bf16.gmra.mxu1 %vm1950_vm1, %v6929_v37  ;;  %v1421_v37 = vsel %vm5887_vm4, %v1416_v13, %v1420_v24  ;;  %v1851_v13 = vunpack.c.l.b16 %v1431_v4 }
 0x2f4   : > { %v1850_v36 = vunpack.c.l.b16 %v1421_v37  ;;  %v1436_v59 = vrot.slane %v1435_v50, 4  ;;  %v1466_v50 = vshrl.u32 %v299_v27, 16 }
 0x2f5   : > { %v4794_v14 = vsel %vm4538_vm14, %v4410_v19, %v4666_v55  ;;  %v2343_v28 = vpop.f32.mrf.mxu0  ;;  %v3551_v21 = vpop.f32.mrf.mxu2  ;;  %v1452_v55 = vshll.u32 %v298_v8, 16 }
 0x2f6   : > { %v4922_v17 = vpack.c.bf16 %v4794_v14, %v4794_v14  ;;  %v4070_v29 = vpop.f32.mrf.mxu3  ;;  %v3193_v39 = vadd.f32 %v3192_v60, %v2343_v28  ;;  %v7002_v25 = vpack.c.b16 %v1850_v36, %v1849_v6  ;;  %v1441_v16 = vsel %vm5887_vm4, %v1436_v59, %v1440_v3 }
 0x2f7   : > { %v4279_v35 = vadd.f32 %v4070_v29, %v3755_v9  ;;  %v1852_v24 = vunpack.c.l.b16 %v1441_v16  ;;  %v1454_v29 = vrot.slane %v1452_v55, 5  ;;  %v1462_v36 = vshll.u32 %v299_v27, 16 }
 0x2f8   : > { %5051 = vst.msk [vmem:[%s6041_s14 + $0x124] sm:$0xf] %vm4977_vm6, %v4922_v17  ;;  %v3197_v40 = vpop.f32.mrf.mxu1  ;;  %v3756_v62 = vadd.f32 %v3548_v0, %v3193_v39 }
 0x2f9   : > { %v4411_v30 = vadd.f32 %v6820_v23, %v4279_v35  ;;  %v7028_v6 = vpack.c.b16 %v1852_v24, %v1851_v13  ;;  %v7056_v24 = vld [vmem:[%s5868_s6 + $0x1fc] sm:$0xff] }
 0x2fb   : > { %vm4539_vm15 = vcmp.gt.f32.partialorder %v4411_v30, 0.0  ;;  %v4667_v53 = vmul.f32 0.2, %v4411_v30 }
 0x2fd   : > { %v4795_v38 = vsel %vm4539_vm15, %v4411_v30, %v4667_v53  ;;  %v2346_v26 = vpop.f32.mrf.mxu0  ;;  %v3553_v45 = vpop.f32.mrf.mxu2 }
 0x2fe   : > { %v4923_v51 = vpack.c.bf16 %v4795_v38, %v4795_v38  ;;  %v4072_v42 = vpop.f32.mrf.mxu3  ;;  %v3196_v60 = vadd.f32 %v3195_v20, %v2346_v26 }
 0x2ff   : > { %v4280_v47 = vadd.f32 %v4072_v42, %v3756_v62  ;;  %v1464_v42 = vrot.slane %v1462_v36, 5 }
 0x300   : > { %5052 = vst.msk [vmem:[%s6041_s14 + $0x128] sm:$0xf] %vm4977_vm6, %v4923_v51  ;;  %5221 = vmatmul.msk.bf16.gmra.mxu0 %vm1950_vm1, %v6951_v61  ;;  %v3200_v1 = vpop.f32.mrf.mxu1  ;;  %v3757_v18 = vadd.f32 %v3551_v21, %v3196_v60  ;;  %v297_v61 = vld [vmem:[%s5868_s6 + $0x1f4] sm:$0xf]  ;;  %v300_v51 = vld [vmem:[%s5868_s6 + $0x200] sm:$0xf] }
 0x301   : > { %v4412_v7 = vadd.f32 %v6820_v23, %v4280_v47  ;;  %v1443_v19 = vshrl.u32 %v297_v61, 16  ;;  %v1446_v20 = vshll.u32 %v297_v61, 16  ;;  %v1476_v3 = vshrl.u32 %v300_v51, 16 }
 0x302   : > { %5624 = vmatmul.msk.bf16.gmra.mxu2 %vm1950_vm1, %v7005_v49 }
 0x303   : > { %vm4540_vm0 = vcmp.gt.f32.partialorder %v4412_v7, 0.0  ;;  %v4668_v54 = vmul.f32 0.2, %v4412_v7  ;;  %5693 = vmatmul.msk.bf16.gmra.mxu3 %vm1950_vm1, %v7002_v25  ;;  %5546 = vmatmul.msk.bf16.gmra.mxu1 %vm1950_vm1, %v6954_v32  ;;  %v1456_v32 = vshrl.u32 %v298_v8, 16  ;;  %v1445_v28 = vrot.slane %v1443_v19, 4 }
 0x304   : > { %v1448_v17 = vrot.slane %v1446_v20, 5 }
 0x305   : > { %v4796_v5 = vsel %vm4540_vm0, %v4412_v7, %v4668_v54  ;;  %v2348_v63 = vpop.f32.mrf.mxu0  ;;  %v3556_v2 = vpop.f32.mrf.mxu2  ;;  %v1458_v21 = vrot.slane %v1456_v32, 4  ;;  %v1472_v7 = vshll.u32 %v300_v51, 16 }
 0x306   : > { %v4924_v0 = vpack.c.bf16 %v4796_v5, %v4796_v5  ;;  %v4075_v11 = vpop.f32.mrf.mxu3  ;;  %v3198_v22 = vadd.f32 %v3197_v40, %v2348_v63  ;;  %v1449_v44 = vor.u32 %v1448_v17, %v1445_v28  ;;  %v1468_v5 = vrot.slane %v1466_v50, 4 }
 0x307   : > { %v4281_v15 = vadd.f32 %v4075_v11, %v3757_v18  ;;  %v1459_v53 = vor.u32 %v1458_v21, %v1454_v29  ;;  %v1474_v63 = vrot.slane %v1472_v7, 5  ;;  %v301_v11 = vld [vmem:[%s5868_s6 + $0x204] sm:$0x1] }
 0x308   : > { %5053 = vst.msk [vmem:[%s6041_s14 + $0x12c] sm:$0xf] %vm4977_vm6, %v4924_v0  ;;  %v3202_v10 = vpop.f32.mrf.mxu1  ;;  %v3758_v34 = vadd.f32 %v3553_v45, %v3198_v22  ;;  %v1450_v26 = vrot.slane %v1449_v44, 4  ;;  %v1469_v32 = vor.u32 %v1468_v5, %v1464_v42  ;;  %v7087_v5 = vld [vmem:[%s5868_s6 + $0x208] sm:$0xff] }
 0x309   : > { %v4413_v9 = vadd.f32 %v6820_v23, %v4281_v15 }
 0x30a   : > { %v1455_v52 = vsel %vm5887_vm4, %v1450_v26, %v1454_v29  ;;  %v1470_v29 = vrot.slane %v1469_v32, 4 }
 0x30b   : > { %vm4541_vm2 = vcmp.gt.f32.partialorder %v4413_v9, 0.0  ;;  %v4669_v14 = vmul.f32 0.2, %v4413_v9  ;;  %v1853_v61 = vunpack.c.l.b16 %v1455_v52  ;;  %v304_v52 = vld [vmem:[%s5868_s6 + $0x210] sm:$0xf] }
 0x30d   : > { %v4797_v56 = vsel %vm4541_vm2, %v4413_v9, %v4669_v14  ;;  %v2351_v35 = vpop.f32.mrf.mxu0  ;;  %v3558_v30 = vpop.f32.mrf.mxu2  ;;  %v1482_v9 = vshll.u32 %v301_v11, 16 }
 0x30e   : > { %v4925_v31 = vpack.c.bf16 %v4797_v56, %v4797_v56  ;;  %v4077_v37 = vpop.f32.mrf.mxu3  ;;  %v3201_v40 = vadd.f32 %v3200_v1, %v2351_v35 }
 0x30f   : > { %v4282_v39 = vadd.f32 %v4077_v37, %v3758_v34  ;;  %v1484_v21 = vrot.slane %v1482_v9, 5 }
 0x310   : > { %5054 = vst.msk [vmem:[%s6041_s14 + $0x130] sm:$0xf] %vm4977_vm6, %v4925_v31  ;;  %5222 = vmatmul.msk.bf16.gmra.mxu0 %vm1950_vm1, %v6977_v43  ;;  %v3205_v48 = vpop.f32.mrf.mxu1  ;;  %v3759_v62 = vadd.f32 %v3556_v2, %v3201_v40  ;;  %v1460_v43 = vrot.slane %v1459_v53, 4  ;;  %v1478_v2 = vrot.slane %v1476_v3, 4  ;;  %v303_v31 = vld [vmem:[%s5868_s6 + $0x20c] sm:$0xf]  ;;  %v1475_v40 = vsel %vm5887_vm4, %v1470_v29, %v1474_v63 }
 0x311   : > { %v4414_v46 = vadd.f32 %v6820_v23, %v4282_v39 }
 0x312   : > { %5625 = vmatmul.msk.bf16.gmra.mxu2 %vm1950_vm1, %v7031_v33  ;;  %v1479_v14 = vor.u32 %v1478_v2, %v1474_v63 }
 0x313   : > { %vm4542_vm3 = vcmp.gt.f32.partialorder %v4414_v46, 0.0  ;;  %v4670_v38 = vmul.f32 0.2, %v4414_v46  ;;  %5694 = vmatmul.msk.bf16.gmra.mxu3 %vm1950_vm1, %v7028_v6  ;;  %5547 = vmatmul.msk.bf16.gmra.mxu1 %vm1950_vm1, %v6980_v12  ;;  %v1465_v12 = vsel %vm5887_vm4, %v1460_v43, %v1464_v42  ;;  %v1855_v43 = vunpack.c.l.b16 %v1475_v40 }
 0x314   : > { %v1854_v0 = vunpack.c.l.b16 %v1465_v12  ;;  %v1480_v35 = vrot.slane %v1479_v14, 4  ;;  %v1510_v14 = vshrl.u32 %v304_v52, 16 }
 0x315   : > { %v4798_v45 = vsel %vm4542_vm3, %v4414_v46, %v4670_v38  ;;  %v2353_v57 = vpop.f32.mrf.mxu0  ;;  %v3561_v60 = vpop.f32.mrf.mxu2  ;;  %v7080_v38 = vld [vmem:[%s7501_s2] ss:$0 sm:$0xff] }
 0x316   : > { %v4926_v58 = vpack.c.bf16 %v4798_v45, %v4798_v45  ;;  %v4080_v47 = vpop.f32.mrf.mxu3  ;;  %v3203_v18 = vadd.f32 %v3202_v10, %v2353_v57  ;;  %v7053_v13 = vpack.c.b16 %v1854_v0, %v1853_v61  ;;  %v1485_v53 = vsel %vm5887_vm4, %v1480_v35, %v1484_v21 }
 0x317   : > { %v4283_v1 = vadd.f32 %v4080_v47, %v3759_v62  ;;  %v1856_v42 = vunpack.c.l.b16 %v1485_v53  ;;  %v1506_v0 = vshll.u32 %v304_v52, 16 }
 0x318   : > { %5055 = vst.msk [vmem:[%s6041_s14 + $0x134] sm:$0xf] %vm4977_vm6, %v4926_v58  ;;  %v3207_v59 = vpop.f32.mrf.mxu1  ;;  %v3760_v15 = vadd.f32 %v3558_v30, %v3203_v18 }
 0x319   : > { %v4415_v54 = vadd.f32 %v6820_v23, %v4283_v1  ;;  %v7084_v61 = vpack.c.b16 %v1856_v42, %v1855_v43  ;;  %v7112_v42 = vld [vmem:[%s5868_s6 + $0x210] sm:$0xff] }
 0x31b   : > { %vm4543_vm5 = vcmp.gt.f32.partialorder %v4415_v54, 0.0  ;;  %v4671_v8 = vmul.f32 0.2, %v4415_v54 }
 0x31d   : > { %v4799_v4 = vsel %vm4543_vm5, %v4415_v54, %v4671_v8  ;;  %v2356_v16 = vpop.f32.mrf.mxu0  ;;  %v3563_v55 = vpop.f32.mrf.mxu2 }
 0x31e   : > { %v4927_v19 = vpack.c.bf16 %v4799_v4, %v4799_v4  ;;  %v4082_v20 = vpop.f32.mrf.mxu3  ;;  %v3206_v10 = vadd.f32 %v3205_v48, %v2356_v16  ;;  %v1496_v48 = vshll.u32 %v303_v31, 16 }
 0x31f   : > { %v4284_v22 = vadd.f32 %v4082_v20, %v3760_v15  ;;  %v1508_v20 = vrot.slane %v1506_v0, 5 }
 0x320   : > { %5056 = vst.msk [vmem:[%s6041_s14 + $0x138] sm:$0xf] %vm4977_vm6, %v4927_v19  ;;  %5223 = vmatmul.msk.bf16.gmra.mxu0 %vm1950_vm1, %v7002_v25  ;;  %v3210_v17 = vpop.f32.mrf.mxu1  ;;  %v3761_v34 = vadd.f32 %v3561_v60, %v3206_v10  ;;  %v302_v25 = vld [vmem:[%s5868_s6 + $0x208] sm:$0xf]  ;;  %v1498_v47 = vrot.slane %v1496_v48, 5 }
 0x321   : > { %v4416_v28 = vadd.f32 %v6820_v23, %v4284_v22  ;;  %v1487_v36 = vshrl.u32 %v302_v25, 16  ;;  %v1490_v46 = vshll.u32 %v302_v25, 16  ;;  %v305_v19 = vld [vmem:[%s5868_s6 + $0x214] sm:$0xf] }
 0x322   : > { %5626 = vmatmul.msk.bf16.gmra.mxu2 %vm1950_vm1, %v7056_v24  ;;  %v1520_v21 = vshrl.u32 %v305_v19, 16 }
 0x323   : > { %vm4544_vm7 = vcmp.gt.f32.partialorder %v4416_v28, 0.0  ;;  %v4672_v56 = vmul.f32 0.2, %v4416_v28  ;;  %5695 = vmatmul.msk.bf16.gmra.mxu3 %vm1950_vm1, %v7053_v13  ;;  %5548 = vmatmul.msk.bf16.gmra.mxu1 %vm1950_vm1, %v7005_v49  ;;  %v1500_v49 = vshrl.u32 %v303_v31, 16  ;;  %v1489_v57 = vrot.slane %v1487_v36, 4 }
 0x324   : > { %v1492_v58 = vrot.slane %v1490_v46, 5 }
 0x325   : > { %v4800_v27 = vsel %vm4544_vm7, %v4416_v28, %v4672_v56  ;;  %v2358_v23 = vpop.f32.mrf.mxu0  ;;  %v3566_v39 = vpop.f32.mrf.mxu2  ;;  %v1502_v60 = vrot.slane %v1500_v49, 4  ;;  %v1516_v28 = vshll.u32 %v305_v19, 16 }
 0x326   : > { %v4928_v37 = vpack.c.bf16 %v4800_v27, %v4800_v27  ;;  %v4085_v30 = vpop.f32.mrf.mxu3  ;;  %v3208_v26 = vadd.f32 %v3207_v59, %v2358_v23  ;;  %v1493_v63 = vor.u32 %v1492_v58, %v1489_v57  ;;  %v1512_v27 = vrot.slane %v1510_v14, 4 }
 0x327   : > { %v4285_v44 = vadd.f32 %v4085_v30, %v3761_v34  ;;  %v1503_v8 = vor.u32 %v1502_v60, %v1498_v47  ;;  %v1518_v23 = vrot.slane %v1516_v28, 5  ;;  %v306_v30 = vld [vmem:[%s5868_s6 + $0x218] sm:$0x1] }
 0x328   : > { %5057 = vst.msk [vmem:[%s6041_s14 + $0x13c] sm:$0xf] %vm4977_vm6, %v4928_v37  ;;  %v3212_v51 = vpop.f32.mrf.mxu1  ;;  %v3762_v7 = vadd.f32 %v3563_v55, %v3208_v26  ;;  %v1494_v16 = vrot.slane %v1493_v63, 4  ;;  %v1513_v49 = vor.u32 %v1512_v27, %v1508_v20  ;;  %v7138_v27 = vld [vmem:[%s5868_s6 + $0x21c] sm:$0xff] }
 0x329   : > { %v4417_v62 = vadd.f32 %v7080_v38, %v4285_v44 }
 0x32a   : > { %v1499_v29 = vsel %vm5887_vm4, %v1494_v16, %v1498_v47  ;;  %v1514_v47 = vrot.slane %v1513_v49, 4 }
 0x32b   : > { %vm4545_vm8 = vcmp.gt.f32.partialorder %v4417_v62, 0.0  ;;  %v4673_v45 = vmul.f32 0.2, %v4417_v62  ;;  %v1857_v25 = vunpack.c.l.b16 %v1499_v29  ;;  %v309_v29 = vld [vmem:[%s5868_s6 + $0x224] sm:$0xf] }
 0x32c   : > { %v1519_v63 = vsel %vm5887_vm4, %v1514_v47, %v1518_v23 }
 0x32d   : > { %v4801_v50 = vsel %vm4545_vm8, %v4417_v62, %v4673_v45  ;;  %v2361_v1 = vpop.f32.mrf.mxu0  ;;  %v3568_v54 = vpop.f32.mrf.mxu2  ;;  %v1526_v62 = vshll.u32 %v306_v30, 16 }
 0x32e   : > { %v4929_v3 = vpack.c.bf16 %v4801_v50, %v4801_v50  ;;  %v4087_v12 = vpop.f32.mrf.mxu3  ;;  %v3211_v59 = vadd.f32 %v3210_v17, %v2361_v1 }
 0x32f   : > { %v4286_v18 = vadd.f32 %v4087_v12, %v3762_v7  ;;  %v1528_v60 = vrot.slane %v1526_v62, 5  ;;  %v308_v12 = vld [vmem:[%s5868_s6 + $0x220] sm:$0xf] }
 0x330   : > { %5058 = vst.msk [vmem:[%s6041_s14 + $0x140] sm:$0xf] %vm4977_vm6, %v4929_v3  ;;  %5224 = vmatmul.msk.bf16.gmra.mxu0 %vm1950_vm1, %v7028_v6  ;;  %v3215_v2 = vpop.f32.mrf.mxu1  ;;  %v3763_v15 = vadd.f32 %v3566_v39, %v3211_v59  ;;  %v1504_v6 = vrot.slane %v1503_v8, 4  ;;  %v1522_v39 = vrot.slane %v1520_v21, 4 }
 0x331   : > { %v4418_v11 = vadd.f32 %v7080_v38, %v4286_v18 }
 0x332   : > { %5627 = vmatmul.msk.bf16.gmra.mxu2 %vm1950_vm1, %v7087_v5  ;;  %v1523_v45 = vor.u32 %v1522_v39, %v1518_v23 }
 0x333   : > { %vm4546_vm9 = vcmp.gt.f32.partialorder %v4418_v11, 0.0  ;;  %v4674_v4 = vmul.f32 0.2, %v4418_v11  ;;  %5696 = vmatmul.msk.bf16.gmra.mxu3 %vm1950_vm1, %v7084_v61  ;;  %5549 = vmatmul.msk.bf16.gmra.mxu1 %vm1950_vm1, %v7031_v33  ;;  %v1509_v33 = vsel %vm5887_vm4, %v1504_v6, %v1508_v20  ;;  %v1859_v6 = vunpack.c.l.b16 %v1519_v63 }
 0x334   : > { %v1858_v37 = vunpack.c.l.b16 %v1509_v33  ;;  %v1524_v1 = vrot.slane %v1523_v45, 4  ;;  %v1554_v45 = vshrl.u32 %v309_v29, 16 }
 0x335   : > { %v4802_v55 = vsel %vm4546_vm9, %v4418_v11, %v4674_v4  ;;  %v2363_v32 = vpop.f32.mrf.mxu0  ;;  %v3571_v10 = vpop.f32.mrf.mxu2  ;;  %v1540_v4 = vshll.u32 %v308_v12, 16 }
 0x336   : > { %v4930_v9 = vpack.c.bf16 %v4802_v55, %v4802_v55  ;;  %v4090_v22 = vpop.f32.mrf.mxu3  ;;  %v3213_v34 = vadd.f32 %v3212_v51, %v2363_v32  ;;  %v7109_v43 = vpack.c.b16 %v1858_v37, %v1857_v25  ;;  %v1529_v0 = vsel %vm5887_vm4, %v1524_v1, %v1528_v60 }
 0x337   : > { %v4287_v17 = vadd.f32 %v4090_v22, %v3763_v15  ;;  %v1860_v20 = vunpack.c.l.b16 %v1529_v0  ;;  %v1542_v22 = vrot.slane %v1540_v4, 5  ;;  %v1550_v37 = vshll.u32 %v309_v29, 16 }
 0x338   : > { %5059 = vst.msk [vmem:[%s6041_s14 + $0x144] sm:$0xf] %vm4977_vm6, %v4930_v9  ;;  %v3217_v35 = vpop.f32.mrf.mxu1  ;;  %v3764_v44 = vadd.f32 %v3568_v54, %v3213_v34 }
 0x339   : > { %v4419_v56 = vadd.f32 %v7080_v38, %v4287_v17  ;;  %v7135_v25 = vpack.c.b16 %v1860_v20, %v1859_v6  ;;  %v7163_v20 = vld [vmem:[%s5868_s6 + $0x224] sm:$0xff] }
 0x33b   : > { %vm4547_vm10 = vcmp.gt.f32.partialorder %v4419_v56, 0.0  ;;  %v4675_v31 = vmul.f32 0.2, %v4419_v56 }
 0x33d   : > { %v4803_v40 = vsel %vm4547_vm10, %v4419_v56, %v4675_v31  ;;  %v2366_v53 = vpop.f32.mrf.mxu0  ;;  %v3573_v48 = vpop.f32.mrf.mxu2 }
 0x33e   : > { %v4931_v36 = vpack.c.bf16 %v4803_v40, %v4803_v40  ;;  %v4092_v46 = vpop.f32.mrf.mxu3  ;;  %v3216_v51 = vadd.f32 %v3215_v2, %v2366_v53 }
 0x33f   : > { %v4288_v26 = vadd.f32 %v4092_v46, %v3764_v44  ;;  %v1552_v46 = vrot.slane %v1550_v37, 5 }
 0x340   : > { %5060 = vst.msk [vmem:[%s6041_s14 + $0x148] sm:$0xf] %vm4977_vm6, %v4931_v36  ;;  %5225 = vmatmul.msk.bf16.gmra.mxu0 %vm1950_vm1, %v7053_v13  ;;  %v3220_v58 = vpop.f32.mrf.mxu1  ;;  %v3765_v7 = vadd.f32 %v3571_v10, %v3216_v51  ;;  %v307_v13 = vld [vmem:[%s5868_s6 + $0x21c] sm:$0xf]  ;;  %v310_v36 = vld [vmem:[%s5868_s6 + $0x228] sm:$0xf] }
 0x341   : > { %v4420_v57 = vadd.f32 %v7080_v38, %v4288_v26  ;;  %v1531_v11 = vshrl.u32 %v307_v13, 16  ;;  %v1534_v2 = vshll.u32 %v307_v13, 16  ;;  %v1564_v60 = vshrl.u32 %v310_v36, 16 }
 0x342   : > { %5628 = vmatmul.msk.bf16.gmra.mxu2 %vm1950_vm1, %v7112_v42 }
 0x343   : > { %vm4548_vm11 = vcmp.gt.f32.partialorder %v4420_v57, 0.0  ;;  %v4676_v50 = vmul.f32 0.2, %v4420_v57  ;;  %5697 = vmatmul.msk.bf16.gmra.mxu3 %vm1950_vm1, %v7109_v43  ;;  %5550 = vmatmul.msk.bf16.gmra.mxu1 %vm1950_vm1, %v7056_v24  ;;  %v1544_v24 = vshrl.u32 %v308_v12, 16  ;;  %v1533_v32 = vrot.slane %v1531_v11, 4 }
 0x344   : > { %v1536_v9 = vrot.slane %v1534_v2, 5 }
 0x345   : > { %v4804_v52 = vsel %vm4548_vm11, %v4420_v57, %v4676_v50  ;;  %v2368_v3 = vpop.f32.mrf.mxu0  ;;  %v3576_v59 = vpop.f32.mrf.mxu2  ;;  %v1546_v10 = vrot.slane %v1544_v24, 4  ;;  %v1560_v57 = vshll.u32 %v310_v36, 16 }
 0x346   : > { %v4932_v54 = vpack.c.bf16 %v4804_v52, %v4804_v52  ;;  %v4095_v18 = vpop.f32.mrf.mxu3  ;;  %v3218_v16 = vadd.f32 %v3217_v35, %v2368_v3  ;;  %v1537_v23 = vor.u32 %v1536_v9, %v1533_v32  ;;  %v1556_v52 = vrot.slane %v1554_v45, 4 }
 0x347   : > { %v4289_v8 = vadd.f32 %v4095_v18, %v3765_v7  ;;  %v1547_v31 = vor.u32 %v1546_v10, %v1542_v22  ;;  %v1562_v3 = vrot.slane %v1560_v57, 5  ;;  %v311_v18 = vld [vmem:[%s5868_s6 + $0x22c] sm:$0x1] }
 0x348   : > { %5061 = vst.msk [vmem:[%s6041_s14 + $0x14c] sm:$0xf] %vm4977_vm6, %v4932_v54  ;;  %v3222_v19 = vpop.f32.mrf.mxu1  ;;  %v3766_v28 = vadd.f32 %v3573_v48, %v3218_v16  ;;  %v1538_v53 = vrot.slane %v1537_v23, 4  ;;  %v1557_v24 = vor.u32 %v1556_v52, %v1552_v46  ;;  %v7189_v52 = vld [vmem:[%s5868_s6 + $0x230] sm:$0xff] }
 0x349   : > { %v4421_v15 = vadd.f32 %v7080_v38, %v4289_v8 }
 0x34a   : > { %v1543_v47 = vsel %vm5887_vm4, %v1538_v53, %v1542_v22  ;;  %v1558_v22 = vrot.slane %v1557_v24, 4 }
 0x34b   : > { %vm4549_vm12 = vcmp.gt.f32.partialorder %v4421_v15, 0.0  ;;  %v4677_v55 = vmul.f32 0.2, %v4421_v15  ;;  %v1861_v13 = vunpack.c.l.b16 %v1543_v47  ;;  %v314_v47 = vld [vmem:[%s5868_s6 + $0x238] sm:$0xf] }
 0x34c   : > { %v1563_v23 = vsel %vm5887_vm4, %v1558_v22, %v1562_v3 }
 0x34d   : > { %v4805_v14 = vsel %vm4549_vm12, %v4421_v15, %v4677_v55  ;;  %v2371_v17 = vpop.f32.mrf.mxu0  ;;  %v3578_v56 = vpop.f32.mrf.mxu2  ;;  %v1570_v15 = vshll.u32 %v311_v18, 16 }
 0x34e   : > { %v4933_v21 = vpack.c.bf16 %v4805_v14, %v4805_v14  ;;  %v4097_v33 = vpop.f32.mrf.mxu3  ;;  %v3221_v35 = vadd.f32 %v3220_v58, %v2371_v17 }
 0x34f   : > { %v4290_v34 = vadd.f32 %v4097_v33, %v3766_v28  ;;  %v1572_v10 = vrot.slane %v1570_v15, 5  ;;  %v313_v33 = vld [vmem:[%s5868_s6 + $0x234] sm:$0xf] }
 0x350   : > { %5062 = vst.msk [vmem:[%s6041_s14 + $0x150] sm:$0xf] %vm4977_vm6, %v4933_v21  ;;  %5226 = vmatmul.msk.bf16.gmra.mxu0 %vm1950_vm1, %v7084_v61  ;;  %v3225_v39 = vpop.f32.mrf.mxu1  ;;  %v3767_v44 = vadd.f32 %v3576_v59, %v3221_v35  ;;  %v1548_v61 = vrot.slane %v1547_v31, 4  ;;  %v1566_v59 = vrot.slane %v1564_v60, 4 }
 0x351   : > { %v4422_v30 = vadd.f32 %v7080_v38, %v4290_v34 }
 0x352   : > { %5629 = vmatmul.msk.bf16.gmra.mxu2 %vm1950_vm1, %v7138_v27  ;;  %v1567_v55 = vor.u32 %v1566_v59, %v1562_v3 }
 0x353   : > { %vm4550_vm13 = vcmp.gt.f32.partialorder %v4422_v30, 0.0  ;;  %v4678_v40 = vmul.f32 0.2, %v4422_v30  ;;  %5698 = vmatmul.msk.bf16.gmra.mxu3 %vm1950_vm1, %v7135_v25  ;;  %5551 = vmatmul.msk.bf16.gmra.mxu1 %vm1950_vm1, %v7087_v5  ;;  %v1553_v5 = vsel %vm5887_vm4, %v1548_v61, %v1552_v46  ;;  %v1863_v61 = vunpack.c.l.b16 %v1563_v23 }
 0x354   : > { %v1862_v54 = vunpack.c.l.b16 %v1553_v5  ;;  %v1568_v17 = vrot.slane %v1567_v55, 4  ;;  %v1598_v55 = vshrl.u32 %v314_v47, 16 }
 0x355   : > { %v4806_v48 = vsel %vm4550_vm13, %v4422_v30, %v4678_v40  ;;  %v2373_v49 = vpop.f32.mrf.mxu0  ;;  %v3581_v51 = vpop.f32.mrf.mxu2  ;;  %v1584_v40 = vshll.u32 %v313_v33, 16 }
 0x356   : > { %v4934_v62 = vpack.c.bf16 %v4806_v48, %v4806_v48  ;;  %v4100_v26 = vpop.f32.mrf.mxu3  ;;  %v3223_v7 = vadd.f32 %v3222_v19, %v2373_v49  ;;  %v7160_v6 = vpack.c.b16 %v1862_v54, %v1861_v13  ;;  %v1573_v37 = vsel %vm5887_vm4, %v1568_v17, %v1572_v10 }
 0x357   : > { %v4291_v58 = vadd.f32 %v4100_v26, %v3767_v44  ;;  %v1864_v46 = vunpack.c.l.b16 %v1573_v37  ;;  %v1586_v26 = vrot.slane %v1584_v40, 5  ;;  %v1594_v54 = vshll.u32 %v314_v47, 16 }
 0x358   : > { %5063 = vst.msk [vmem:[%s6041_s14 + $0x154] sm:$0xf] %vm4977_vm6, %v4934_v62  ;;  %v3227_v1 = vpop.f32.mrf.mxu1  ;;  %v3768_v8 = vadd.f32 %v3578_v56, %v3223_v7 }
 0x359   : > { %v4423_v50 = vadd.f32 %v7080_v38, %v4291_v58  ;;  %v7186_v13 = vpack.c.b16 %v1864_v46, %v1863_v61  ;;  %v7214_v46 = vld [vmem:[%s5868_s6 + $0x238] sm:$0xff] }
 0x35b   : > { %vm4551_vm14 = vcmp.gt.f32.partialorder %v4423_v50, 0.0  ;;  %v4679_v12 = vmul.f32 0.2, %v4423_v50 }
 0x35d   : > { %v4807_v63 = vsel %vm4551_vm14, %v4423_v50, %v4679_v12  ;;  %v2376_v0 = vpop.f32.mrf.mxu0  ;;  %v3583_v4 = vpop.f32.mrf.mxu2 }
 0x35e   : > { %v4935_v11 = vpack.c.bf16 %v4807_v63, %v4807_v63  ;;  %v4102_v2 = vpop.f32.mrf.mxu3  ;;  %v3226_v19 = vadd.f32 %v3225_v39, %v2376_v0 }
 0x35f   : > { %v4292_v16 = vadd.f32 %v4102_v2, %v3768_v8  ;;  %v1596_v2 = vrot.slane %v1594_v54, 5 }
 0x360   : > { %5064 = vst.msk [vmem:[%s6041_s14 + $0x158] sm:$0xf] %vm4977_vm6, %v4935_v11  ;;  %5227 = vmatmul.msk.bf16.gmra.mxu0 %vm1950_vm1, %v7109_v43  ;;  %v3230_v9 = vpop.f32.mrf.mxu1  ;;  %v3769_v28 = vadd.f32 %v3581_v51, %v3226_v19  ;;  %v312_v43 = vld [vmem:[%s5868_s6 + $0x230] sm:$0xf]  ;;  %v315_v11 = vld [vmem:[%s5868_s6 + $0x23c] sm:$0xf] }
 0x361   : > { %v4424_v32 = vadd.f32 %v7080_v38, %v4292_v16  ;;  %v1575_v30 = vshrl.u32 %v312_v43, 16  ;;  %v1578_v39 = vshll.u32 %v312_v43, 16  ;;  %v1608_v10 = vshrl.u32 %v315_v11, 16 }
 0x362   : > { %5630 = vmatmul.msk.bf16.gmra.mxu2 %vm1950_vm1, %v7163_v20 }
 0x363   : > { %vm4552_vm15 = vcmp.gt.f32.partialorder %v4424_v32, 0.0  ;;  %v4680_v14 = vmul.f32 0.2, %v4424_v32  ;;  %5699 = vmatmul.msk.bf16.gmra.mxu3 %vm1950_vm1, %v7160_v6  ;;  %5552 = vmatmul.msk.bf16.gmra.mxu1 %vm1950_vm1, %v7112_v42  ;;  %v1588_v42 = vshrl.u32 %v313_v33, 16  ;;  %v1577_v49 = vrot.slane %v1575_v30, 4 }
 0x364   : > { %v1580_v62 = vrot.slane %v1578_v39, 5 }
 0x365   : > { %v4808_v29 = vsel %vm4552_vm15, %v4424_v32, %v4680_v14  ;;  %v2378_v21 = vpop.f32.mrf.mxu0  ;;  %v3586_v35 = vpop.f32.mrf.mxu2  ;;  %v1590_v51 = vrot.slane %v1588_v42, 4  ;;  %v1604_v32 = vshll.u32 %v315_v11, 16 }
 0x366   : > { %v4936_v56 = vpack.c.bf16 %v4808_v29, %v4808_v29  ;;  %v4105_v34 = vpop.f32.mrf.mxu3  ;;  %v3228_v53 = vadd.f32 %v3227_v1, %v2378_v21  ;;  %v1581_v3 = vor.u32 %v1580_v62, %v1577_v49  ;;  %v1600_v29 = vrot.slane %v1598_v55, 4 }
 0x367   : > { %v4293_v31 = vadd.f32 %v4105_v34, %v3769_v28  ;;  %v1591_v12 = vor.u32 %v1590_v51, %v1586_v26  ;;  %v1606_v21 = vrot.slane %v1604_v32, 5  ;;  %v316_v34 = vld [vmem:[%s5868_s6 + $0x240] sm:$0x1] }
 0x368   : > { %5065 = vst.msk [vmem:[%s6041_s14 + $0x15c] sm:$0xf] %vm4977_vm6, %v4936_v56  ;;  %v3232_v36 = vpop.f32.mrf.mxu1  ;;  %v3770_v57 = vadd.f32 %v3583_v4, %v3228_v53  ;;  %v1582_v0 = vrot.slane %v1581_v3, 4  ;;  %v1601_v42 = vor.u32 %v1600_v29, %v1596_v2  ;;  %v7240_v29 = vld [vmem:[%s5868_s6 + $0x244] sm:$0xff] }
 0x369   : > { %v4425_v44 = vadd.f32 %v7080_v38, %v4293_v31 }
 0x36a   : > { %v1587_v22 = vsel %vm5887_vm4, %v1582_v0, %v1586_v26  ;;  %v1602_v26 = vrot.slane %v1601_v42, 4 }
 0x36b   : > { %vm4553_vm0 = vcmp.gt.f32.partialorder %v4425_v44, 0.0  ;;  %v4681_v48 = vmul.f32 0.2, %v4425_v44  ;;  %v1865_v43 = vunpack.c.l.b16 %v1587_v22  ;;  %v319_v22 = vld [vmem:[%s5868_s6 + $0x24c] sm:$0xf] }
 0x36c   : > { %v1607_v3 = vsel %vm5887_vm4, %v1602_v26, %v1606_v21 }
 0x36d   : > { %v4809_v45 = vsel %vm4553_vm0, %v4425_v44, %v4681_v48  ;;  %v2381_v58 = vpop.f32.mrf.mxu0  ;;  %v3588_v50 = vpop.f32.mrf.mxu2  ;;  %v1614_v44 = vshll.u32 %v316_v34, 16 }
 0x36e   : > { %v4937_v60 = vpack.c.bf16 %v4809_v45, %v4809_v45  ;;  %v4107_v5 = vpop.f32.mrf.mxu3  ;;  %v3231_v1 = vadd.f32 %v3230_v9, %v2381_v58 }
 0x36f   : > { %v4294_v7 = vadd.f32 %v4107_v5, %v3770_v57  ;;  %v1616_v51 = vrot.slane %v1614_v44, 5  ;;  %v318_v5 = vld [vmem:[%s5868_s6 + $0x248] sm:$0xf] }
 0x370   : > { %5066 = vst.msk [vmem:[%s6041_s14 + $0x160] sm:$0xf] %vm4977_vm6, %v4937_v60  ;;  %5228 = vmatmul.msk.bf16.gmra.mxu0 %vm1950_vm1, %v7135_v25  ;;  %v3235_v59 = vpop.f32.mrf.mxu1  ;;  %v3771_v8 = vadd.f32 %v3586_v35, %v3231_v1  ;;  %v1592_v25 = vrot.slane %v1591_v12, 4  ;;  %v1610_v35 = vrot.slane %v1608_v10, 4 }
 0x371   : > { %v4426_v18 = vadd.f32 %v7080_v38, %v4294_v7 }
 0x372   : > { %5631 = vmatmul.msk.bf16.gmra.mxu2 %vm1950_vm1, %v7189_v52  ;;  %v1611_v48 = vor.u32 %v1610_v35, %v1606_v21 }
 0x373   : > { %vm4554_vm2 = vcmp.gt.f32.partialorder %v4426_v18, 0.0  ;;  %v4682_v63 = vmul.f32 0.2, %v4426_v18  ;;  %5700 = vmatmul.msk.bf16.gmra.mxu3 %vm1950_vm1, %v7186_v13  ;;  %5553 = vmatmul.msk.bf16.gmra.mxu1 %vm1950_vm1, %v7138_v27  ;;  %v1597_v27 = vsel %vm5887_vm4, %v1592_v25, %v1596_v2  ;;  %v1867_v25 = vunpack.c.l.b16 %v1607_v3 }
 0x374   : > { %v1866_v56 = vunpack.c.l.b16 %v1597_v27  ;;  %v1612_v58 = vrot.slane %v1611_v48, 4  ;;  %v1642_v48 = vshrl.u32 %v319_v22, 16 }
 0x375   : > { %v4810_v4 = vsel %vm4554_vm2, %v4426_v18, %v4682_v63  ;;  %v2383_v24 = vpop.f32.mrf.mxu0  ;;  %v3591_v19 = vpop.f32.mrf.mxu2  ;;  %v1628_v63 = vshll.u32 %v318_v5, 16 }
 0x376   : > { %v4938_v15 = vpack.c.bf16 %v4810_v4, %v4810_v4  ;;  %v4110_v16 = vpop.f32.mrf.mxu3  ;;  %v3233_v28 = vadd.f32 %v3232_v36, %v2383_v24  ;;  %v7211_v61 = vpack.c.b16 %v1866_v56, %v1865_v43  ;;  %v1617_v54 = vsel %vm5887_vm4, %v1612_v58, %v1616_v51 }
 0x377   : > { %v4295_v9 = vadd.f32 %v4110_v16, %v3771_v8  ;;  %v1868_v2 = vunpack.c.l.b16 %v1617_v54  ;;  %v1630_v16 = vrot.slane %v1628_v63, 5  ;;  %v1638_v56 = vshll.u32 %v319_v22, 16 }
 0x378   : > { %5067 = vst.msk [vmem:[%s6041_s14 + $0x164] sm:$0xf] %vm4977_vm6, %v4938_v15  ;;  %v3237_v17 = vpop.f32.mrf.mxu1  ;;  %v3772_v31 = vadd.f32 %v3588_v50, %v3233_v28 }
 0x379   : > { %v4427_v14 = vadd.f32 %v7080_v38, %v4295_v9  ;;  %v7237_v43 = vpack.c.b16 %v1868_v2, %v1867_v25  ;;  %v7265_v2 = vld [vmem:[%s5868_s6 + $0x24c] sm:$0xff] }
 0x37b   : > { %vm4555_vm3 = vcmp.gt.f32.partialorder %v4427_v14, 0.0  ;;  %v4683_v33 = vmul.f32 0.2, %v4427_v14 }
 0x37d   : > { %v4811_v23 = vsel %vm4555_vm3, %v4427_v14, %v4683_v33  ;;  %v2386_v37 = vpop.f32.mrf.mxu0  ;;  %v3593_v40 = vpop.f32.mrf.mxu2 }
 0x37e   : > { %v4939_v30 = vpack.c.bf16 %v4811_v23, %v4811_v23  ;;  %v4112_v39 = vpop.f32.mrf.mxu3  ;;  %v3236_v36 = vadd.f32 %v3235_v59, %v2386_v37 }
 0x37f   : > { %v4296_v53 = vadd.f32 %v4112_v39, %v3772_v31  ;;  %v1640_v39 = vrot.slane %v1638_v56, 5 }
 0x380   : > { %5068 = vst.msk [vmem:[%s6041_s14 + $0x168] sm:$0xf] %vm4977_vm6, %v4939_v30  ;;  %5229 = vmatmul.msk.bf16.gmra.mxu0 %vm1950_vm1, %v7160_v6  ;;  %v3240_v62 = vpop.f32.mrf.mxu1  ;;  %v3773_v57 = vadd.f32 %v3591_v19, %v3236_v36  ;;  %v317_v6 = vld [vmem:[%s5868_s6 + $0x244] sm:$0xf]  ;;  %v320_v30 = vld [vmem:[%s5868_s6 + $0x250] sm:$0xf] }
 0x381   : > { %v4428_v49 = vadd.f32 %v7080_v38, %v4296_v53  ;;  %v1619_v18 = vshrl.u32 %v317_v6, 16  ;;  %v1622_v59 = vshll.u32 %v317_v6, 16  ;;  %v1652_v51 = vshrl.u32 %v320_v30, 16 }
 0x382   : > { %5632 = vmatmul.msk.bf16.gmra.mxu2 %vm1950_vm1, %v7214_v46 }
 0x383   : > { %vm4556_vm5 = vcmp.gt.f32.partialorder %v4428_v49, 0.0  ;;  %v4684_v45 = vmul.f32 0.2, %v4428_v49  ;;  %5701 = vmatmul.msk.bf16.gmra.mxu3 %vm1950_vm1, %v7211_v61  ;;  %5554 = vmatmul.msk.bf16.gmra.mxu1 %vm1950_vm1, %v7163_v20  ;;  %v1632_v20 = vshrl.u32 %v318_v5, 16  ;;  %v1621_v24 = vrot.slane %v1619_v18, 4 }
 0x384   : > { %v1624_v15 = vrot.slane %v1622_v59, 5 }
 0x385   : > { %v4812_v47 = vsel %vm4556_vm5, %v4428_v49, %v4684_v45  ;;  %v2388_v60 = vpop.f32.mrf.mxu0  ;;  %v3596_v1 = vpop.f32.mrf.mxu2  ;;  %v1634_v19 = vrot.slane %v1632_v20, 4  ;;  %v1648_v49 = vshll.u32 %v320_v30, 16 }
 0x386   : > { %v4940_v50 = vpack.c.bf16 %v4812_v47, %v4812_v47  ;;  %v4115_v7 = vpop.f32.mrf.mxu3  ;;  %v3238_v0 = vadd.f32 %v3237_v17, %v2388_v60  ;;  %v1625_v21 = vor.u32 %v1624_v15, %v1621_v24  ;;  %v1644_v47 = vrot.slane %v1642_v48, 4 }
 0x387   : > { %v4297_v12 = vadd.f32 %v4115_v7, %v3773_v57  ;;  %v1635_v33 = vor.u32 %v1634_v19, %v1630_v16  ;;  %v1650_v60 = vrot.slane %v1648_v49, 5  ;;  %v321_v7 = vld [vmem:[%s5868_s6 + $0x254] sm:$0x1] }
 0x388   : > { %5069 = vst.msk [vmem:[%s6041_s14 + $0x16c] sm:$0xf] %vm4977_vm6, %v4940_v50  ;;  %v3242_v11 = vpop.f32.mrf.mxu1  ;;  %v3774_v32 = vadd.f32 %v3593_v40, %v3238_v0  ;;  %v1626_v37 = vrot.slane %v1625_v21, 4  ;;  %v1645_v20 = vor.u32 %v1644_v47, %v1640_v39  ;;  %v7291_v47 = vld [vmem:[%s5868_s6 + $0x258] sm:$0xff] }
 0x389   : > { %v4429_v8 = vadd.f32 %v7080_v38, %v4297_v12 }
 0x38a   : > { %v1631_v26 = vsel %vm5887_vm4, %v1626_v37, %v1630_v16  ;;  %v1646_v16 = vrot.slane %v1645_v20, 4 }
 0x38b   : > { %vm4557_vm7 = vcmp.gt.f32.partialorder %v4429_v8, 0.0  ;;  %v4685_v4 = vmul.f32 0.2, %v4429_v8  ;;  %v1869_v6 = vunpack.c.l.b16 %v1631_v26  ;;  %v324_v26 = vld [vmem:[%s5868_s6 + $0x260] sm:$0xf] }
 0x38c   : > { %v1651_v21 = vsel %vm5887_vm4, %v1646_v16, %v1650_v60 }
 0x38d   : > { %v4813_v55 = vsel %vm4557_vm7, %v4429_v8, %v4685_v4  ;;  %v2391_v9 = vpop.f32.mrf.mxu0  ;;  %v3598_v14 = vpop.f32.mrf.mxu2  ;;  %v1658_v8 = vshll.u32 %v321_v7, 16 }
 0x38e   : > { %v4941_v10 = vpack.c.bf16 %v4813_v55, %v4813_v55  ;;  %v4117_v27 = vpop.f32.mrf.mxu3  ;;  %v3241_v17 = vadd.f32 %v3240_v62, %v2391_v9 }
 0x38f   : > { %v4298_v28 = vadd.f32 %v4117_v27, %v3774_v32  ;;  %v1660_v19 = vrot.slane %v1658_v8, 5  ;;  %v323_v27 = vld [vmem:[%s5868_s6 + $0x25c] sm:$0xf] }
 0x390   : > { %5070 = vst.msk [vmem:[%s6041_s14 + $0x170] sm:$0xf] %vm4977_vm6, %v4941_v10  ;;  %5230 = vmatmul.msk.bf16.gmra.mxu0 %vm1950_vm1, %v7186_v13  ;;  %v3245_v35 = vpop.f32.mrf.mxu1  ;;  %v3775_v31 = vadd.f32 %v3596_v1, %v3241_v17  ;;  %v1636_v13 = vrot.slane %v1635_v33, 4  ;;  %v1654_v1 = vrot.slane %v1652_v51, 4 }
 0x391   : > { %v4430_v34 = vadd.f32 %v7080_v38, %v4298_v28 }
 0x392   : > { %5633 = vmatmul.msk.bf16.gmra.mxu2 %vm1950_vm1, %v7240_v29  ;;  %v1655_v4 = vor.u32 %v1654_v1, %v1650_v60 }
 0x393   : > { %vm4558_vm8 = vcmp.gt.f32.partialorder %v4430_v34, 0.0  ;;  %v4686_v23 = vmul.f32 0.2, %v4430_v34  ;;  %5702 = vmatmul.msk.bf16.gmra.mxu3 %vm1950_vm1, %v7237_v43  ;;  %5555 = vmatmul.msk.bf16.gmra.mxu1 %vm1950_vm1, %v7189_v52  ;;  %v1641_v52 = vsel %vm5887_vm4, %v1636_v13, %v1640_v39  ;;  %v1871_v13 = vunpack.c.l.b16 %v1651_v21 }
 0x394   : > { %v1870_v50 = vunpack.c.l.b16 %v1641_v52  ;;  %v1656_v9 = vrot.slane %v1655_v4, 4  ;;  %v1686_v4 = vshrl.u32 %v324_v26, 16 }
 0x395   : > { %v4814_v40 = vsel %vm4558_vm8, %v4430_v34, %v4686_v23  ;;  %v2393_v42 = vpop.f32.mrf.mxu0  ;;  %v3601_v36 = vpop.f32.mrf.mxu2  ;;  %v1672_v23 = vshll.u32 %v323_v27, 16 }
 0x396   : > { %v4942_v44 = vpack.c.bf16 %v4814_v40, %v4814_v40  ;;  %v4120_v53 = vpop.f32.mrf.mxu3  ;;  %v3243_v57 = vadd.f32 %v3242_v11, %v2393_v42  ;;  %v7262_v25 = vpack.c.b16 %v1870_v50, %v1869_v6  ;;  %v1661_v56 = vsel %vm5887_vm4, %v1656_v9, %v1660_v19 }
 0x397   : > { %v4299_v62 = vadd.f32 %v4120_v53, %v3775_v31  ;;  %v1872_v39 = vunpack.c.l.b16 %v1661_v56  ;;  %v1674_v53 = vrot.slane %v1672_v23, 5  ;;  %v1682_v50 = vshll.u32 %v324_v26, 16 }
 0x398   : > { %5071 = vst.msk [vmem:[%s6041_s14 + $0x174] sm:$0xf] %vm4977_vm6, %v4942_v44  ;;  %v3247_v58 = vpop.f32.mrf.mxu1  ;;  %v3776_v12 = vadd.f32 %v3598_v14, %v3243_v57 }
 0x399   : > { %v4431_v45 = vadd.f32 %v7080_v38, %v4299_v62  ;;  %v7288_v6 = vpack.c.b16 %v1872_v39, %v1871_v13  ;;  %v7316_v39 = vld [vmem:[%s5868_s6 + $0x260] sm:$0xff] }
 0x39b   : > { %vm4559_vm9 = vcmp.gt.f32.partialorder %v4431_v45, 0.0  ;;  %v4687_v5 = vmul.f32 0.2, %v4431_v45 }
 0x39d   : > { %v4815_v3 = vsel %vm4559_vm9, %v4431_v45, %v4687_v5  ;;  %v2396_v54 = vpop.f32.mrf.mxu0  ;;  %v3603_v63 = vpop.f32.mrf.mxu2 }
 0x39e   : > { %v4943_v18 = vpack.c.bf16 %v4815_v3, %v4815_v3  ;;  %v4122_v59 = vpop.f32.mrf.mxu3  ;;  %v3246_v11 = vadd.f32 %v3245_v35, %v2396_v54 }
 0x39f   : > { %v4300_v0 = vadd.f32 %v4122_v59, %v3776_v12  ;;  %v1684_v59 = vrot.slane %v1682_v50, 5 }
 0x3a0   : > { %5072 = vst.msk [vmem:[%s6041_s14 + $0x178] sm:$0xf] %vm4977_vm6, %v4943_v18  ;;  %5231 = vmatmul.msk.bf16.gmra.mxu0 %vm1950_vm1, %v7211_v61  ;;  %v3250_v15 = vpop.f32.mrf.mxu1  ;;  %v3777_v32 = vadd.f32 %v3601_v36, %v3246_v11  ;;  %v322_v61 = vld [vmem:[%s5868_s6 + $0x258] sm:$0xf]  ;;  %v325_v18 = vld [vmem:[%s5868_s6 + $0x264] sm:$0xf] }
 0x3a1   : > { %v4432_v24 = vadd.f32 %v7080_v38, %v4300_v0  ;;  %v1663_v34 = vshrl.u32 %v322_v61, 16  ;;  %v1666_v35 = vshll.u32 %v322_v61, 16  ;;  %v1696_v19 = vshrl.u32 %v325_v18, 16 }
 0x3a2   : > { %5634 = vmatmul.msk.bf16.gmra.mxu2 %vm1950_vm1, %v7265_v2 }
 0x3a3   : > { %vm4560_vm10 = vcmp.gt.f32.partialorder %v4432_v24, 0.0  ;;  %v4688_v55 = vmul.f32 0.2, %v4432_v24  ;;  %5703 = vmatmul.msk.bf16.gmra.mxu3 %vm1950_vm1, %v7262_v25  ;;  %5556 = vmatmul.msk.bf16.gmra.mxu1 %vm1950_vm1, %v7214_v46  ;;  %v1676_v46 = vshrl.u32 %v323_v27, 16  ;;  %v1665_v42 = vrot.slane %v1663_v34, 4 }
 0x3a4   : > { %v1668_v44 = vrot.slane %v1666_v35, 5 }
 0x3a5   : > { %v4816_v22 = vsel %vm4560_vm10, %v4432_v24, %v4688_v55  ;;  %v2398_v10 = vpop.f32.mrf.mxu0  ;;  %v3606_v17 = vpop.f32.mrf.mxu2  ;;  %v1678_v36 = vrot.slane %v1676_v46, 4  ;;  %v1692_v24 = vshll.u32 %v325_v18, 16 }
 0x3a6   : > { %v4944_v14 = vpack.c.bf16 %v4816_v22, %v4816_v22  ;;  %v4125_v28 = vpop.f32.mrf.mxu3  ;;  %v3248_v37 = vadd.f32 %v3247_v58, %v2398_v10  ;;  %v1669_v60 = vor.u32 %v1668_v44, %v1665_v42  ;;  %v1688_v22 = vrot.slane %v1686_v4, 4 }
 0x3a7   : > { %v4301_v33 = vadd.f32 %v4125_v28, %v3777_v32  ;;  %v1679_v5 = vor.u32 %v1678_v36, %v1674_v53  ;;  %v1694_v10 = vrot.slane %v1692_v24, 5  ;;  %v326_v28 = vld [vmem:[%s5868_s6 + $0x268] sm:$0x1] }
 0x3a8   : > { %5073 = vst.msk [vmem:[%s6041_s14 + $0x17c] sm:$0xf] %vm4977_vm6, %v4944_v14  ;;  %v3252_v30 = vpop.f32.mrf.mxu1  ;;  %v3778_v49 = vadd.f32 %v3603_v63, %v3248_v37  ;;  %v1670_v54 = vrot.slane %v1669_v60, 4  ;;  %v1689_v46 = vor.u32 %v1688_v22, %v1684_v59  ;;  %v7347_v22 = vld [vmem:[%s5868_s6 + $0x26c] sm:$0xff] }
 0x3a9   : > { %v4433_v31 = vadd.f32 %v7080_v38, %v4301_v33 }
 0x3aa   : > { %v1675_v16 = vsel %vm5887_vm4, %v1670_v54, %v1674_v53  ;;  %v1690_v53 = vrot.slane %v1689_v46, 4 }
 0x3ab   : > { %vm4561_vm11 = vcmp.gt.f32.partialorder %v4433_v31, 0.0  ;;  %v4689_v40 = vmul.f32 0.2, %v4433_v31  ;;  %v1873_v61 = vunpack.c.l.b16 %v1675_v16  ;;  %v329_v16 = vld [vmem:[%s5868_s6 + $0x274] sm:$0xf] }
 0x3ad   : > { %v4817_v48 = vsel %vm4561_vm11, %v4433_v31, %v4689_v40  ;;  %v2401_v62 = vpop.f32.mrf.mxu0  ;;  %v3608_v45 = vpop.f32.mrf.mxu2  ;;  %v1702_v31 = vshll.u32 %v326_v28, 16 }
 0x3ae   : > { %v4945_v51 = vpack.c.bf16 %v4817_v48, %v4817_v48  ;;  %v4127_v52 = vpop.f32.mrf.mxu3  ;;  %v3251_v58 = vadd.f32 %v3250_v15, %v2401_v62 }
 0x3af   : > { %v4302_v57 = vadd.f32 %v4127_v52, %v3778_v49  ;;  %v1704_v36 = vrot.slane %v1702_v31, 5 }
 0x3b0   : > { %5074 = vst.msk [vmem:[%s6041_s14 + $0x180] sm:$0xf] %vm4977_vm6, %v4945_v51  ;;  %5232 = vmatmul.msk.bf16.gmra.mxu0 %vm1950_vm1, %v7237_v43  ;;  %v3255_v1 = vpop.f32.mrf.mxu1  ;;  %v3779_v12 = vadd.f32 %v3606_v17, %v3251_v58  ;;  %v1680_v43 = vrot.slane %v1679_v5, 4  ;;  %v1698_v17 = vrot.slane %v1696_v19, 4  ;;  %v328_v51 = vld [vmem:[%s5868_s6 + $0x270] sm:$0xf]  ;;  %v1695_v58 = vsel %vm5887_vm4, %v1690_v53, %v1694_v10 }
 0x3b1   : > { %v4434_v7 = vadd.f32 %v7080_v38, %v4302_v57 }
 0x3b2   : > { %5635 = vmatmul.msk.bf16.gmra.mxu2 %vm1950_vm1, %v7291_v47  ;;  %v1699_v40 = vor.u32 %v1698_v17, %v1694_v10 }
 0x3b3   : > { %vm4562_vm12 = vcmp.gt.f32.partialorder %v4434_v7, 0.0  ;;  %v4690_v3 = vmul.f32 0.2, %v4434_v7  ;;  %5704 = vmatmul.msk.bf16.gmra.mxu3 %vm1950_vm1, %v7288_v6  ;;  %5557 = vmatmul.msk.bf16.gmra.mxu1 %vm1950_vm1, %v7240_v29  ;;  %v1685_v29 = vsel %vm5887_vm4, %v1680_v43, %v1684_v59  ;;  %v1875_v43 = vunpack.c.l.b16 %v1695_v58 }
 0x3b4   : > { %v1874_v14 = vunpack.c.l.b16 %v1685_v29  ;;  %v1700_v62 = vrot.slane %v1699_v40, 4  ;;  %v1730_v40 = vshrl.u32 %v329_v16, 16 }
 0x3b5   : > { %v4818_v63 = vsel %vm4562_vm12, %v4434_v7, %v4690_v3  ;;  %v2403_v20 = vpop.f32.mrf.mxu0  ;;  %v3611_v11 = vpop.f32.mrf.mxu2  ;;  %v7340_v3 = vld [vmem:[%s7501_s2] ss:$0 sm:$0xff] }
 0x3b6   : > { %v4946_v8 = vpack.c.bf16 %v4818_v63, %v4818_v63  ;;  %v4130_v0 = vpop.f32.mrf.mxu3  ;;  %v3253_v32 = vadd.f32 %v3252_v30, %v2403_v20  ;;  %v7313_v13 = vpack.c.b16 %v1874_v14, %v1873_v61  ;;  %v1705_v5 = vsel %vm5887_vm4, %v1700_v62, %v1704_v36 }
 0x3b7   : > { %v4303_v15 = vadd.f32 %v4130_v0, %v3779_v12  ;;  %v1876_v59 = vunpack.c.l.b16 %v1705_v5  ;;  %v1726_v14 = vshll.u32 %v329_v16, 16 }
 0x3b8   : > { %5075 = vst.msk [vmem:[%s6041_s14 + $0x184] sm:$0xf] %vm4977_vm6, %v4946_v8  ;;  %v3257_v9 = vpop.f32.mrf.mxu1  ;;  %v3780_v33 = vadd.f32 %v3608_v45, %v3253_v32 }
 0x3b9   : > { %v4435_v55 = vadd.f32 %v7080_v38, %v4303_v15  ;;  %v7344_v61 = vpack.c.b16 %v1876_v59, %v1875_v43  ;;  %v7372_v59 = vld [vmem:[%s5868_s6 + $0x274] sm:$0xff] }
 0x3bb   : > { %vm4563_vm13 = vcmp.gt.f32.partialorder %v4435_v55, 0.0  ;;  %v4691_v27 = vmul.f32 0.2, %v4435_v55 }
 0x3bd   : > { %v4819_v21 = vsel %vm4563_vm13, %v4435_v55, %v4691_v27  ;;  %v2406_v56 = vpop.f32.mrf.mxu0  ;;  %v3613_v23 = vpop.f32.mrf.mxu2 }
 0x3be   : > { %v4947_v34 = vpack.c.bf16 %v4819_v21, %v4819_v21  ;;  %v4132_v35 = vpop.f32.mrf.mxu3  ;;  %v3256_v30 = vadd.f32 %v3255_v1, %v2406_v56  ;;  %v1716_v1 = vshll.u32 %v328_v51, 16 }
 0x3bf   : > { %v4304_v37 = vadd.f32 %v4132_v35, %v3780_v33  ;;  %v1728_v35 = vrot.slane %v1726_v14, 5 }
 0x3c0   : > { %5076 = vst.msk [vmem:[%s6041_s14 + $0x188] sm:$0xf] %vm4977_vm6, %v4947_v34  ;;  %5233 = vmatmul.msk.bf16.gmra.mxu0 %vm1950_vm1, %v7262_v25  ;;  %v3260_v44 = vpop.f32.mrf.mxu1  ;;  %v3781_v49 = vadd.f32 %v3611_v11, %v3256_v30  ;;  %v327_v25 = vld [vmem:[%s5868_s6 + $0x26c] sm:$0xf]  ;;  %v1718_v0 = vrot.slane %v1716_v1, 5 }
 0x3c1   : > { %v4436_v42 = vadd.f32 %v7080_v38, %v4304_v37  ;;  %v1707_v50 = vshrl.u32 %v327_v25, 16  ;;  %v1710_v7 = vshll.u32 %v327_v25, 16  ;;  %v330_v34 = vld [vmem:[%s5868_s6 + $0x278] sm:$0xf] }
 0x3c2   : > { %5636 = vmatmul.msk.bf16.gmra.mxu2 %vm1950_vm1, %v7316_v39  ;;  %v1740_v36 = vshrl.u32 %v330_v34, 16 }
 0x3c3   : > { %vm4564_vm14 = vcmp.gt.f32.partialorder %v4436_v42, 0.0  ;;  %v4692_v48 = vmul.f32 0.2, %v4436_v42  ;;  %5705 = vmatmul.msk.bf16.gmra.mxu3 %vm1950_vm1, %v7313_v13  ;;  %5558 = vmatmul.msk.bf16.gmra.mxu1 %vm1950_vm1, %v7265_v2  ;;  %v1720_v2 = vshrl.u32 %v328_v51, 16  ;;  %v1709_v20 = vrot.slane %v1707_v50, 4 }
 0x3c4   : > { %v1712_v8 = vrot.slane %v1710_v7, 5 }
 0x3c5   : > { %v4820_v26 = vsel %vm4564_vm14, %v4436_v42, %v4692_v48  ;;  %v2408_v38 = vpop.f32.mrf.mxu0  ;;  %v3616_v57 = vpop.f32.mrf.mxu2  ;;  %v1722_v11 = vrot.slane %v1720_v2, 4  ;;  %v1736_v42 = vshll.u32 %v330_v34, 16 }
 0x3c6   : > { %v4948_v52 = vpack.c.bf16 %v4820_v26, %v4820_v26  ;;  %v4135_v45 = vpop.f32.mrf.mxu3  ;;  %v3258_v54 = vadd.f32 %v3257_v9, %v2408_v38  ;;  %v1713_v10 = vor.u32 %v1712_v8, %v1709_v20  ;;  %v1732_v26 = vrot.slane %v1730_v40, 4 }
 0x3c7   : > { %v4305_v60 = vadd.f32 %v4135_v45, %v3781_v49  ;;  %v1723_v27 = vor.u32 %v1722_v11, %v1718_v0  ;;  %v1738_v38 = vrot.slane %v1736_v42, 5  ;;  %v331_v45 = vld [vmem:[%s5868_s6 + $0x27c] sm:$0x1] }
 0x3c8   : > { %5077 = vst.msk [vmem:[%s6041_s14 + $0x18c] sm:$0xf] %vm4977_vm6, %v4948_v52  ;;  %v3262_v18 = vpop.f32.mrf.mxu1  ;;  %v3782_v24 = vadd.f32 %v3613_v23, %v3258_v54  ;;  %v1714_v56 = vrot.slane %v1713_v10, 4  ;;  %v1733_v2 = vor.u32 %v1732_v26, %v1728_v35  ;;  %v5778_v26 = vld [vmem:[%s5868_s6 + $0x280] sm:$0xff] }
 0x3c9   : > { %v4437_v12 = vadd.f32 %v7340_v3, %v4305_v60 }
 0x3ca   : > { %v1719_v53 = vsel %vm5887_vm4, %v1714_v56, %v1718_v0  ;;  %v1734_v0 = vrot.slane %v1733_v2, 4  ;;  %v335_v2 = vld [vmem:[%s5868_s6 + $0x28c] sm:$0xf] }
 0x3cb   : > { %vm4565_vm15 = vcmp.gt.f32.partialorder %v4437_v12, 0.0  ;;  %v4693_v63 = vmul.f32 0.2, %v4437_v12  ;;  %v1877_v25 = vunpack.c.l.b16 %v1719_v53  ;;  %v334_v53 = vld [vmem:[%s5868_s6 + $0x288] sm:$0xf] }
 0x3cc   : > { %v1739_v10 = vsel %vm5887_vm4, %v1734_v0, %v1738_v38  ;;  %v3833_v0 = vshrl.u32 %v334_v53, 16 }
 0x3cd   : > { %v4821_v4 = vsel %vm4565_vm15, %v4437_v12, %v4693_v63  ;;  %v2411_v15 = vpop.f32.mrf.mxu0  ;;  %v3618_v55 = vpop.f32.mrf.mxu2  ;;  %v1746_v12 = vshll.u32 %v331_v45, 16 }
 0x3ce   : > { %v4949_v19 = vpack.c.bf16 %v4821_v4, %v4821_v4  ;;  %v4137_v29 = vpop.f32.mrf.mxu3  ;;  %v3261_v9 = vadd.f32 %v3260_v44, %v2411_v15 }
 0x3cf   : > { %v4306_v32 = vadd.f32 %v4137_v29, %v3782_v24  ;;  %v1748_v11 = vrot.slane %v1746_v12, 5  ;;  %v333_v29 = vld [vmem:[%s5868_s6 + $0x284] sm:$0xf] }
 0x3d0   : > { %5078 = vst.msk [vmem:[%s6041_s14 + $0x190] sm:$0xf] %vm4977_vm6, %v4949_v19  ;;  %5234 = vmatmul.msk.bf16.gmra.mxu0 %vm1950_vm1, %v7288_v6  ;;  %v3265_v17 = vpop.f32.mrf.mxu1  ;;  %v3783_v33 = vadd.f32 %v3616_v57, %v3261_v9  ;;  %v1724_v6 = vrot.slane %v1723_v27, 4  ;;  %v1742_v57 = vrot.slane %v1740_v36, 4 }
 0x3d1   : > { %v4438_v28 = vadd.f32 %v7340_v3, %v4306_v32 }
 0x3d2   : > { %5637 = vmatmul.msk.bf16.gmra.mxu2 %vm1950_vm1, %v7347_v22  ;;  %v1743_v63 = vor.u32 %v1742_v57, %v1738_v38 }
 0x3d3   : > { %vm4566_vm0 = vcmp.gt.f32.partialorder %v4438_v28, 0.0  ;;  %v4694_v21 = vmul.f32 0.2, %v4438_v28  ;;  %5706 = vmatmul.msk.bf16.gmra.mxu3 %vm1950_vm1, %v7344_v61  ;;  %5559 = vmatmul.msk.bf16.gmra.mxu1 %vm1950_vm1, %v7291_v47  ;;  %v1729_v47 = vsel %vm5887_vm4, %v1724_v6, %v1728_v35  ;;  %v1879_v6 = vunpack.c.l.b16 %v1739_v10 }
 0x3d4   : > { %v1878_v52 = vunpack.c.l.b16 %v1729_v47  ;;  %v1744_v15 = vrot.slane %v1743_v63, 4 }
 0x3d5   : > { %v4822_v23 = vsel %vm4566_vm0, %v4438_v28, %v4694_v21  ;;  %v2413_v46 = vpop.f32.mrf.mxu0  ;;  %v3621_v30 = vpop.f32.mrf.mxu2  ;;  %v3819_v21 = vshll.u32 %v333_v29, 16 }
 0x3d6   : > { %v4950_v31 = vpack.c.bf16 %v4822_v23, %v4822_v23  ;;  %v4140_v37 = vpop.f32.mrf.mxu3  ;;  %v3263_v49 = vadd.f32 %v3262_v18, %v2413_v46  ;;  %v7369_v43 = vpack.c.b16 %v1878_v52, %v1877_v25  ;;  %v1749_v14 = vsel %vm5887_vm4, %v1744_v15, %v1748_v11 }
 0x3d7   : > { %v4307_v44 = vadd.f32 %v4140_v37, %v3783_v33  ;;  %v1880_v35 = vunpack.c.l.b16 %v1749_v14  ;;  %v3821_v37 = vrot.slane %v3819_v21, 5  ;;  %v3829_v52 = vshll.u32 %v334_v53, 16  ;;  %v336_v14 = vld [vmem:[%s5868_s6 + $0x290] sm:$0x1] }
 0x3d8   : > { %5079 = vst.msk [vmem:[%s6041_s14 + $0x194] sm:$0xf] %vm4977_vm6, %v4950_v31  ;;  %v3267_v62 = vpop.f32.mrf.mxu1  ;;  %v3784_v60 = vadd.f32 %v3618_v55, %v3263_v49  ;;  %v3843_v11 = vshrl.u32 %v335_v2, 16 }
 0x3d9   : > { %v4439_v48 = vadd.f32 %v7340_v3, %v4307_v44  ;;  %v7395_v25 = vpack.c.b16 %v1880_v35, %v1879_v6 }
 0x3db   : > { %vm4567_vm2 = vcmp.gt.f32.partialorder %v4439_v48, 0.0  ;;  %v4695_v51 = vmul.f32 0.2, %v4439_v48 }
 0x3dd   : > { %v4823_v58 = vsel %vm4567_vm2, %v4439_v48, %v4695_v51  ;;  %v2416_v5 = vpop.f32.mrf.mxu0  ;;  %v3623_v1 = vpop.f32.mrf.mxu2 }
 0x3de   : > { %v4951_v50 = vpack.c.bf16 %v4823_v58, %v4823_v58  ;;  %v4142_v7 = vpop.f32.mrf.mxu3  ;;  %v3266_v18 = vadd.f32 %v3265_v17, %v2416_v5 }
 0x3df   : > { %v4308_v54 = vadd.f32 %v4142_v7, %v3784_v60 }
 0x3e0   : > { %5080 = vst.msk [vmem:[%s6041_s14 + $0x198] sm:$0xf] %vm4977_vm6, %v4951_v50  ;;  %5235 = vmatmul.msk.bf16.gmra.mxu0 %vm1950_vm1, %v7313_v13  ;;  %v3270_v8 = vpop.f32.mrf.mxu1  ;;  %v3785_v24 = vadd.f32 %v3621_v30, %v3266_v18  ;;  %v332_v13 = vld [vmem:[%s5868_s6 + $0x280] sm:$0xf]  ;;  %v3831_v50 = vrot.slane %v3829_v52, 5 }
 0x3e1   : > { %v4440_v20 = vadd.f32 %v7340_v3, %v4308_v54  ;;  %v3810_v28 = vshrl.u32 %v332_v13, 16  ;;  %v3813_v17 = vshll.u32 %v332_v13, 16 }
 0x3e2   : > { %5638 = vmatmul.msk.bf16.gmra.mxu2 %vm1950_vm1, %v7372_v59 }
 0x3e3   : > { %vm4568_vm3 = vcmp.gt.f32.partialorder %v4440_v20, 0.0  ;;  %v4696_v4 = vmul.f32 0.2, %v4440_v20  ;;  %5707 = vmatmul.msk.bf16.gmra.mxu3 %vm1950_vm1, %v7369_v43  ;;  %5560 = vmatmul.msk.bf16.gmra.mxu1 %vm1950_vm1, %v7316_v39  ;;  %v3823_v39 = vshrl.u32 %v333_v29, 16  ;;  %v3812_v46 = vrot.slane %v3810_v28, 4 }
 0x3e4   : > { %v3815_v31 = vrot.slane %v3813_v17, 5  ;;  %v3835_v29 = vrot.slane %v3833_v0, 4 }
 0x3e5   : > { %v4824_v16 = vsel %vm4568_vm3, %v4440_v20, %v4696_v4  ;;  %v2418_v19 = vpop.f32.mrf.mxu0  ;;  %v3626_v9 = vpop.f32.mrf.mxu2  ;;  %v3825_v30 = vrot.slane %v3823_v39, 4 }
 0x3e6   : > { %v4952_v55 = vpack.c.bf16 %v4824_v16, %v4824_v16  ;;  %v4145_v32 = vpop.f32.mrf.mxu3  ;;  %v3268_v56 = vadd.f32 %v3267_v62, %v2418_v19  ;;  %v3816_v38 = vor.u32 %v3815_v31, %v3812_v46  ;;  %v3836_v6 = vor.u32 %v3835_v29, %v3831_v50 }
 0x3e7   : > { %v4309_v27 = vadd.f32 %v4145_v32, %v3785_v24  ;;  %v3826_v51 = vor.u32 %v3825_v30, %v3821_v37  ;;  %v3845_v32 = vrot.slane %v3843_v11, 4 }
 0x3e8   : > { %5081 = vst.msk [vmem:[%s6041_s14 + $0x19c] sm:$0xf] %vm4977_vm6, %v4952_v55  ;;  %v3272_v34 = vpop.f32.mrf.mxu1  ;;  %v3786_v42 = vadd.f32 %v3623_v1, %v3268_v56  ;;  %v3817_v5 = vrot.slane %v3816_v38, 4 }
 0x3e9   : > { %v4441_v33 = vadd.f32 %v7340_v3, %v4309_v27 }
 0x3ea   : > { %v3822_v20 = vsel %vm5887_vm4, %v3817_v5, %v3821_v37 }
 0x3eb   : > { %vm4569_vm5 = vcmp.gt.f32.partialorder %v4441_v33, 0.0  ;;  %v4697_v23 = vmul.f32 0.2, %v4441_v33  ;;  %v3856_v16 = vunpack.c.l.b16 %v3822_v20 }
 0x3ed   : > { %v4825_v40 = vsel %vm4569_vm5, %v4441_v33, %v4697_v23  ;;  %v2421_v44 = vpop.f32.mrf.mxu0  ;;  %v3628_v48 = vpop.f32.mrf.mxu2  ;;  %v3849_v23 = vshll.u32 %v336_v14, 16 }
 0x3ee   : > { %v4953_v36 = vpack.c.bf16 %v4825_v40, %v4825_v40  ;;  %v4147_v47 = vpop.f32.mrf.mxu3  ;;  %v3271_v62 = vadd.f32 %v3270_v8, %v2421_v44  ;;  %v3837_v40 = vrot.slane %v3836_v6, 4 }
 0x3ef   : > { %v4310_v49 = vadd.f32 %v4147_v47, %v3786_v42 }
 0x3f0   : > { %5082 = vst.msk [vmem:[%s6041_s14 + $0x1a0] sm:$0xf] %vm4977_vm6, %v4953_v36  ;;  %5236 = vmatmul.msk.bf16.gmra.mxu0 %vm1950_vm1, %v7344_v61  ;;  %v3275_v57 = vpop.f32.mrf.mxu1  ;;  %v3787_v60 = vadd.f32 %v3626_v9, %v3271_v62  ;;  %v3827_v61 = vrot.slane %v3826_v51, 4 }
 0x3f1   : > { %v4442_v45 = vadd.f32 %v7340_v3, %v4310_v49 }
 0x3f2   : > { %5639 = vmatmul.msk.bf16.gmra.mxu2 %vm1950_vm1, %v5778_v26  ;;  %v3832_v8 = vsel %vm5887_vm4, %v3827_v61, %v3831_v50 }
 0x3f3   : > { %vm4570_vm7 = vcmp.gt.f32.partialorder %v4442_v45, 0.0  ;;  %v4698_v58 = vmul.f32 0.2, %v4442_v45  ;;  %5708 = vmatmul.msk.bf16.gmra.mxu3 %vm1950_vm1, %v7395_v25  ;;  %5561 = vmatmul.msk.bf16.gmra.mxu1 %vm1950_vm1, %v7347_v22  ;;  %v3839_v22 = vshll.u32 %v335_v2, 16  ;;  %v3857_v19 = vunpack.c.l.b16 %v3832_v8 }
 0x3f5   : > { %v4826_v7 = vsel %vm4570_vm7, %v4442_v45, %v4698_v58  ;;  %v2423_v1 = vpop.f32.mrf.mxu0  ;;  %v3631_v18 = vpop.f32.mrf.mxu2  ;;  %v3841_v55 = vrot.slane %v3839_v22, 5  ;;  %v3860_v56 = vpack.c.b16 %v3857_v19, %v3856_v16 }
 0x3f6   : > { %v4954_v12 = vpack.c.bf16 %v4826_v7, %v4826_v7  ;;  %v4150_v54 = vpop.f32.mrf.mxu3  ;;  %v3273_v24 = vadd.f32 %v3272_v34, %v2423_v1  ;;  %v5779_v34 = vld [vmem:[%s5868_s6 + $0x288] sm:$0xff] }
 0x3f7   : > { %v4311_v63 = vadd.f32 %v4150_v54, %v3787_v60  ;;  %v3846_v35 = vor.u32 %v3845_v32, %v3841_v55  ;;  %v3842_v62 = vsel %vm5887_vm4, %v3837_v40, %v3841_v55 }
 0x3f8   : > { %5083 = vst.msk [vmem:[%s6041_s14 + $0x1a4] sm:$0xf] %vm4977_vm6, %v4954_v12  ;;  %v3277_v15 = vpop.f32.mrf.mxu1  ;;  %v3788_v10 = vadd.f32 %v3628_v48, %v3273_v24  ;;  %v3858_v45 = vunpack.c.l.b16 %v3842_v62 }
 0x3f9   : > { %v4443_v4 = vadd.f32 %v7340_v3, %v4311_v63  ;;  %v3847_v42 = vrot.slane %v3846_v35, 4 }
 0x3fb   : > { %vm4571_vm8 = vcmp.gt.f32.partialorder %v4443_v4, 0.0  ;;  %v4699_v13 = vmul.f32 0.2, %v4443_v4 }
 0x3fd   : > { %v4827_v9 = vsel %vm4571_vm8, %v4443_v4, %v4699_v13  ;;  %v2426_v27 = vpop.f32.mrf.mxu0  ;;  %v3633_v21 = vpop.f32.mrf.mxu2 }
 0x3fe   : > { %v4955_v28 = vpack.c.bf16 %v4827_v9, %v4827_v9  ;;  %v4152_v17 = vpop.f32.mrf.mxu3  ;;  %v3276_v33 = vadd.f32 %v3275_v57, %v2426_v27 }
 0x3ff   : > { %v4312_v39 = vadd.f32 %v4152_v17, %v3788_v10 }
 0x400   : > { %5084 = vst.msk [vmem:[%s6041_s14 + $0x1a8] sm:$0xf] %vm4977_vm6, %v4955_v28  ;;  %5237 = vmatmul.msk.bf16.gmra.mxu0 %vm1950_vm1, %v7369_v43  ;;  %v3280_v31 = vpop.f32.mrf.mxu1  ;;  %v3789_v30 = vadd.f32 %v3631_v18, %v3276_v33  ;;  %v3851_v43 = vrot.slane %v3849_v23, 5 }
 0x401   : > { %v4444_v46 = vadd.f32 %v7340_v3, %v4312_v39 }
 0x402   : > { %5640 = vmatmul.msk.bf16.gmra.mxu2 %vm1950_vm1, %v5779_v34  ;;  %v3852_v26 = vsel %vm5887_vm4, %v3847_v42, %v3851_v43 }
 0x403   : > { %vm4572_vm9 = vcmp.gt.f32.partialorder %v4444_v46, 0.0  ;;  %v4700_v37 = vmul.f32 0.2, %v4444_v46  ;;  %5709 = vmatmul.msk.bf16.gmra.mxu3 %vm1950_vm1, %v3860_v56  ;;  %5562 = vmatmul.msk.bf16.gmra.mxu1 %vm1950_vm1, %v7372_v59  ;;  %v3859_v57 = vunpack.c.l.b16 %v3852_v26 }
 0x405   : > { %v4828_v44 = vsel %vm4572_vm9, %v4444_v46, %v4700_v37  ;;  %v2428_v53 = vpop.f32.mrf.mxu0  ;;  %v3636_v48 = vpop.f32.mrf.mxu2  ;;  %v3861_v41 = vpack.c.b16 %v3859_v57, %v3858_v45 }
 0x406   : > { %v4956_v36 = vpack.c.bf16 %v4828_v44, %v4828_v44  ;;  %v4155_v47 = vpop.f32.mrf.mxu3  ;;  %v3278_v59 = vadd.f32 %v3277_v15, %v2428_v53 }
 0x407   : > { %v4313_v49 = vadd.f32 %v4155_v47, %v3789_v30 }
 0x408   : > { %5085 = vst.msk [vmem:[%s6041_s14 + $0x1ac] sm:$0xf] %vm4977_vm6, %v4956_v36  ;;  %v3282_v51 = vpop.f32.mrf.mxu1  ;;  %v3790_v60 = vadd.f32 %v3633_v21, %v3278_v59 }
 0x409   : > { %v4445_v38 = vadd.f32 %v7340_v3, %v4313_v49 }
 0x40b   : > { %vm4573_vm10 = vcmp.gt.f32.partialorder %v4445_v38, 0.0  ;;  %v4701_v52 = vmul.f32 0.2, %v4445_v38 }
 0x40d   : > { %v4829_v58 = vsel %vm4573_vm10, %v4445_v38, %v4701_v52  ;;  %v2431_v5 = vpop.f32.mrf.mxu0  ;;  %v3638_v7 = vpop.f32.mrf.mxu2 }
 0x40e   : > { %v4957_v61 = vpack.c.bf16 %v4829_v58, %v4829_v58  ;;  %v4157_v50 = vpop.f32.mrf.mxu3  ;;  %v3281_v2 = vadd.f32 %v3280_v31, %v2431_v5 }
 0x40f   : > { %v4314_v1 = vadd.f32 %v4157_v50, %v3790_v60 }
 0x410   : > { %5086 = vst.msk [vmem:[%s6041_s14 + $0x1b0] sm:$0xf] %vm4977_vm6, %v4957_v61  ;;  %5238 = vmatmul.msk.bf16.gmra.mxu0 %vm1950_vm1, %v7395_v25  ;;  %v3285_v54 = vpop.f32.mrf.mxu1  ;;  %v3791_v63 = vadd.f32 %v3636_v48, %v3281_v2 }
 0x411   : > { %v4446_v12 = vadd.f32 %v7340_v3, %v4314_v1 }
 0x413   : > { %vm4574_vm4 = vcmp.gt.f32.partialorder %v4446_v12, 0.0  ;;  %v4702_v18 = vmul.f32 0.2, %v4446_v12  ;;  %5710 = vmatmul.msk.bf16.gmra.mxu3 %vm1950_vm1, %v3861_v41 }
 0x415   : > { %v4830_v20 = vsel %vm4574_vm4, %v4446_v12, %v4702_v18  ;;  %v2433_v8 = vpop.f32.mrf.mxu0  ;;  %v3641_v11 = vpop.f32.mrf.mxu2 }
 0x416   : > { %v4958_v0 = vpack.c.bf16 %v4830_v20, %v4830_v20  ;;  %v4160_v22 = vpop.f32.mrf.mxu3  ;;  %v3283_v25 = vadd.f32 %v3282_v51, %v2433_v8 }
 0x417   : > { %v4315_v4 = vadd.f32 %v4160_v22, %v3791_v63 }
 0x418   : > { %5087 = vst.msk [vmem:[%s6041_s14 + $0x1b4] sm:$0xf] %vm4977_vm6, %v4958_v0  ;;  %v3287_v15 = vpop.f32.mrf.mxu1  ;;  %v3792_v19 = vadd.f32 %v3638_v7, %v3283_v25 }
 0x419   : > { %v4447_v24 = vadd.f32 %v7340_v3, %v4315_v4 }
 0x41b   : > { %vm4575_vm11 = vcmp.gt.f32.partialorder %v4447_v24, 0.0  ;;  %v4703_v13 = vmul.f32 0.2, %v4447_v24 }
 0x41d   : > { %v4831_v16 = vsel %vm4575_vm11, %v4447_v24, %v4703_v13  ;;  %v2436_v29 = vpop.f32.mrf.mxu0  ;;  %v3643_v9 = vpop.f32.mrf.mxu2 }
 0x41e   : > { %v4959_v55 = vpack.c.bf16 %v4831_v16, %v4831_v16  ;;  %v4162_v32 = vpop.f32.mrf.mxu3  ;;  %v3286_v27 = vadd.f32 %v3285_v54, %v2436_v29 }
 0x41f   : > { %v4316_v10 = vadd.f32 %v4162_v32, %v3792_v19 }
 0x420   : > { %5088 = vst.msk [vmem:[%s6041_s14 + $0x1b8] sm:$0xf] %vm4977_vm6, %v4959_v55  ;;  %v3290_v28 = vpop.f32.mrf.mxu1  ;;  %v3793_v21 = vadd.f32 %v3641_v11, %v3286_v27 }
 0x421   : > { %v4448_v14 = vadd.f32 %v7340_v3, %v4316_v10 }
 0x423   : > { %vm4576_vm1 = vcmp.gt.f32.partialorder %v4448_v14, 0.0  ;;  %v4704_v17 = vmul.f32 0.2, %v4448_v14 }
 0x425   : > { %v4832_v39 = vsel %vm4576_vm1, %v4448_v14, %v4704_v17  ;;  %v2438_v33 = vpop.f32.mrf.mxu0  ;;  %v3646_v6 = vpop.f32.mrf.mxu2 }
 0x426   : > { %v4960_v56 = vpack.c.bf16 %v4832_v39, %v4832_v39  ;;  %v4165_v34 = vpop.f32.mrf.mxu3  ;;  %v3288_v46 = vadd.f32 %v3287_v15, %v2438_v33 }
 0x427   : > { %v4317_v35 = vadd.f32 %v4165_v34, %v3793_v21 }
 0x428   : > { %5089 = vst.msk [vmem:[%s6041_s14 + $0x1bc] sm:$0xf] %vm4977_vm6, %v4960_v56  ;;  %v3292_v31 = vpop.f32.mrf.mxu1  ;;  %v3794_v40 = vadd.f32 %v3643_v9, %v3288_v46 }
 0x429   : > { %v4449_v23 = vadd.f32 %v7340_v3, %v4317_v35 }
 0x42b   : > { %vm4577_vm12 = vcmp.gt.f32.partialorder %v4449_v23, 0.0  ;;  %v4705_v37 = vmul.f32 0.2, %v4449_v23 }
 0x42d   : > { %v4833_v30 = vsel %vm4577_vm12, %v4449_v23, %v4705_v37  ;;  %v2441_v42 = vpop.f32.mrf.mxu0  ;;  %v3648_v53 = vpop.f32.mrf.mxu2 }
 0x42e   : > { %v4961_v43 = vpack.c.bf16 %v4833_v30, %v4833_v30  ;;  %v4167_v44 = vpop.f32.mrf.mxu3  ;;  %v3291_v47 = vadd.f32 %v3290_v28, %v2441_v42 }
 0x42f   : > { %v4318_v36 = vadd.f32 %v4167_v44, %v3794_v40 }
 0x430   : > { %5090 = vst.msk [vmem:[%s6041_s14 + $0x1c0] sm:$0xf] %vm4977_vm6, %v4961_v43  ;;  %v3295_v49 = vpop.f32.mrf.mxu1  ;;  %v3795_v26 = vadd.f32 %v3646_v6, %v3291_v47 }
 0x431   : > { %v4450_v48 = vadd.f32 %v7340_v3, %v4318_v36 }
 0x433   : > { %vm4578_vm13 = vcmp.gt.f32.partialorder %v4450_v48, 0.0  ;;  %v4706_v62 = vmul.f32 0.2, %v4450_v48 }
 0x435   : > { %v4834_v38 = vsel %vm4578_vm13, %v4450_v48, %v4706_v62  ;;  %v2443_v59 = vpop.f32.mrf.mxu0  ;;  %v3651_v45 = vpop.f32.mrf.mxu2 }
 0x436   : > { %v4962_v51 = vpack.c.bf16 %v4834_v38, %v4834_v38  ;;  %v4170_v52 = vpop.f32.mrf.mxu3  ;;  %v3293_v60 = vadd.f32 %v3292_v31, %v2443_v59 }
 0x437   : > { %v4319_v57 = vadd.f32 %v4170_v52, %v3795_v26 }
 0x438   : > { %5091 = vst.msk [vmem:[%s6041_s14 + $0x1c4] sm:$0xf] %vm4977_vm6, %v4962_v51  ;;  %v3297_v5 = vpop.f32.mrf.mxu1  ;;  %v3796_v7 = vadd.f32 %v3648_v53, %v3293_v60 }
 0x439   : > { %v4451_v58 = vadd.f32 %v7340_v3, %v4319_v57 }
 0x43b   : > { %vm4579_vm14 = vcmp.gt.f32.partialorder %v4451_v58, 0.0  ;;  %v4707_v61 = vmul.f32 0.2, %v4451_v58 }
 0x43d   : > { %v4835_v50 = vsel %vm4579_vm14, %v4451_v58, %v4707_v61  ;;  %v2446_v1 = vpop.f32.mrf.mxu0  ;;  %v3653_v12 = vpop.f32.mrf.mxu2 }
 0x43e   : > { %v4963_v2 = vpack.c.bf16 %v4835_v50, %v4835_v50  ;;  %v4172_v41 = vpop.f32.mrf.mxu3  ;;  %v3296_v18 = vadd.f32 %v3295_v49, %v2446_v1 }
 0x43f   : > { %v4320_v54 = vadd.f32 %v4172_v41, %v3796_v7 }
 0x440   : > { %5092 = vst.msk [vmem:[%s6041_s14 + $0x1c8] sm:$0xf] %vm4977_vm6, %v4963_v2  ;;  %v3300_v20 = vpop.f32.mrf.mxu1  ;;  %v3797_v0 = vadd.f32 %v3651_v45, %v3296_v18 }
 0x441   : > { %v4452_v63 = vadd.f32 %v7340_v3, %v4320_v54 }
 0x443   : > { %vm4580_vm15 = vcmp.gt.f32.partialorder %v4452_v63, 0.0  ;;  %v4708_v8 = vmul.f32 0.2, %v4452_v63 }
 0x445   : > { %v4836_v22 = vsel %vm4580_vm15, %v4452_v63, %v4708_v8  ;;  %v2448_v11 = vpop.f32.mrf.mxu0  ;;  %v3656_v25 = vpop.f32.mrf.mxu2 }
 0x446   : > { %v4964_v4 = vpack.c.bf16 %v4836_v22, %v4836_v22  ;;  %v4175_v24 = vpop.f32.mrf.mxu3  ;;  %v3298_v16 = vadd.f32 %v3297_v5, %v2448_v11 }
 0x447   : > { %v4321_v15 = vadd.f32 %v4175_v24, %v3797_v0 }
 0x448   : > { %5093 = vst.msk [vmem:[%s6041_s14 + $0x1cc] sm:$0xf] %vm4977_vm6, %v4964_v4  ;;  %v3302_v19 = vpop.f32.mrf.mxu1  ;;  %v3798_v32 = vadd.f32 %v3653_v12, %v3298_v16 }
 0x449   : > { %v4453_v13 = vadd.f32 %v7340_v3, %v4321_v15 }
 0x44b   : > { %vm4581_vm0 = vcmp.gt.f32.partialorder %v4453_v13, 0.0  ;;  %v4709_v29 = vmul.f32 0.2, %v4453_v13 }
 0x44d   : > { %v4837_v55 = vsel %vm4581_vm0, %v4453_v13, %v4709_v29  ;;  %v2451_v9 = vpop.f32.mrf.mxu0  ;;  %v3658_v14 = vpop.f32.mrf.mxu2 }
 0x44e   : > { %v4965_v10 = vpack.c.bf16 %v4837_v55, %v4837_v55  ;;  %v4177_v27 = vpop.f32.mrf.mxu3  ;;  %v3301_v17 = vadd.f32 %v3300_v20, %v2451_v9 }
 0x44f   : > { %v4322_v28 = vadd.f32 %v4177_v27, %v3798_v32 }
 0x450   : > { %5094 = vst.msk [vmem:[%s6041_s14 + $0x1d0] sm:$0xf] %vm4977_vm6, %v4965_v10  ;;  %v3305_v39 = vpop.f32.mrf.mxu1  ;;  %v3799_v56 = vadd.f32 %v3656_v25, %v3301_v17 }
 0x451   : > { %v4454_v21 = vadd.f32 %v7340_v3, %v4322_v28 }
 0x453   : > { %vm4582_vm2 = vcmp.gt.f32.partialorder %v4454_v21, 0.0  ;;  %v4710_v33 = vmul.f32 0.2, %v4454_v21 }
 0x455   : > { %v4838_v34 = vsel %vm4582_vm2, %v4454_v21, %v4710_v33  ;;  %v2453_v6 = vpop.f32.mrf.mxu0  ;;  %v3661_v46 = vpop.f32.mrf.mxu2 }
 0x456   : > { %v4966_v35 = vpack.c.bf16 %v4838_v34, %v4838_v34  ;;  %v4180_v23 = vpop.f32.mrf.mxu3  ;;  %v3303_v30 = vadd.f32 %v3302_v19, %v2453_v6 }
 0x457   : > { %v4323_v31 = vadd.f32 %v4180_v23, %v3799_v56 }
 0x458   : > { %5095 = vst.msk [vmem:[%s6041_s14 + $0x1d4] sm:$0xf] %vm4977_vm6, %v4966_v35  ;;  %v3307_v42 = vpop.f32.mrf.mxu1  ;;  %v3800_v44 = vadd.f32 %v3658_v14, %v3303_v30 }
 0x459   : > { %v4455_v37 = vadd.f32 %v7340_v3, %v4323_v31 }
 0x45b   : > { %vm4583_vm3 = vcmp.gt.f32.partialorder %v4455_v37, 0.0  ;;  %v4711_v40 = vmul.f32 0.2, %v4455_v37 }
 0x45d   : > { %v4839_v43 = vsel %vm4583_vm3, %v4455_v37, %v4711_v40  ;;  %v2456_v53 = vpop.f32.mrf.mxu0  ;;  %v3663_v62 = vpop.f32.mrf.mxu2 }
 0x45e   : > { %v4967_v36 = vpack.c.bf16 %v4839_v43, %v4839_v43  ;;  %v4182_v47 = vpop.f32.mrf.mxu3  ;;  %v3306_v49 = vadd.f32 %v3305_v39, %v2456_v53 }
 0x45f   : > { %v4324_v48 = vadd.f32 %v4182_v47, %v3800_v44 }
 0x460   : > { %5096 = vst.msk [vmem:[%s6041_s14 + $0x1d8] sm:$0xf] %vm4977_vm6, %v4967_v36  ;;  %v3801_v59 = vadd.f32 %v3661_v46, %v3306_v49  ;;  %v3310_v58 = vpop.f32.mrf.mxu1 }
 0x461   : > { %v4456_v26 = vadd.f32 %v7340_v3, %v4324_v48 }
 0x463   : > { %vm4584_vm5 = vcmp.gt.f32.partialorder %v4456_v26, 0.0  ;;  %v4712_v38 = vmul.f32 0.2, %v4456_v26 }
 0x465   : > { %v4840_v51 = vsel %vm4584_vm5, %v4456_v26, %v4712_v38  ;;  %v2458_v52 = vpop.f32.mrf.mxu0  ;;  %v3666_v50 = vpop.f32.mrf.mxu2 }
 0x466   : > { %v4968_v45 = vpack.c.bf16 %v4840_v51, %v4840_v51  ;;  %v4185_v57 = vpop.f32.mrf.mxu3  ;;  %v3308_v61 = vadd.f32 %v3307_v42, %v2458_v52 }
 0x467   : > { %v4325_v60 = vadd.f32 %v4185_v57, %v3801_v59 }
 0x468   : > { %5097 = vst.msk [vmem:[%s6041_s14 + $0x1dc] sm:$0xf] %vm4977_vm6, %v4968_v45  ;;  %v3802_v2 = vadd.f32 %v3663_v62, %v3308_v61  ;;  %v3312_v20 = vpop.f32.mrf.mxu1 }
 0x469   : > { %v4457_v5 = vadd.f32 %v7340_v3, %v4325_v60 }
 0x46b   : > { %vm4585_vm7 = vcmp.gt.f32.partialorder %v4457_v5, 0.0  ;;  %v4713_v7 = vmul.f32 0.2, %v4457_v5 }
 0x46d   : > { %v4841_v1 = vsel %vm4585_vm7, %v4457_v5, %v4713_v7  ;;  %v2461_v41 = vpop.f32.mrf.mxu0  ;;  %v3668_v11 = vpop.f32.mrf.mxu2 }
 0x46e   : > { %v4969_v12 = vpack.c.bf16 %v4841_v1, %v4841_v1  ;;  %v4187_v54 = vpop.f32.mrf.mxu3  ;;  %v3311_v63 = vadd.f32 %v3310_v58, %v2461_v41 }
 0x46f   : > { %v4326_v18 = vadd.f32 %v4187_v54, %v3802_v2 }
 0x470   : > { %5098 = vst.msk [vmem:[%s6041_s14 + $0x1e0] sm:$0xf] %vm4977_vm6, %v4969_v12  ;;  %v3803_v22 = vadd.f32 %v3666_v50, %v3311_v63  ;;  %v3315_v29 = vpop.f32.mrf.mxu1 }
 0x471   : > { %v4458_v8 = vadd.f32 %v7340_v3, %v4326_v18 }
 0x473   : > { %vm4586_vm8 = vcmp.gt.f32.partialorder %v4458_v8, 0.0  ;;  %v4714_v0 = vmul.f32 0.2, %v4458_v8 }
 0x475   : > { %v4842_v4 = vsel %vm4586_vm8, %v4458_v8, %v4714_v0  ;;  %v2463_v24 = vpop.f32.mrf.mxu0  ;;  %v3671_v14 = vpop.f32.mrf.mxu2 }
 0x476   : > { %v4970_v25 = vpack.c.bf16 %v4842_v4, %v4842_v4  ;;  %v4190_v15 = vpop.f32.mrf.mxu3  ;;  %v3313_v19 = vadd.f32 %v3312_v20, %v2463_v24 }
 0x477   : > { %v4327_v13 = vadd.f32 %v4190_v15, %v3803_v22 }
 0x478   : > { %5099 = vst.msk [vmem:[%s6041_s14 + $0x1e4] sm:$0xf] %vm4977_vm6, %v4970_v25  ;;  %v3804_v9 = vadd.f32 %v3668_v11, %v3313_v19  ;;  %v3317_v34 = vpop.f32.mrf.mxu1 }
 0x479   : > { %v4459_v16 = vadd.f32 %v7340_v3, %v4327_v13 }
 0x47b   : > { %vm4587_vm9 = vcmp.gt.f32.partialorder %v4459_v16, 0.0  ;;  %v4715_v55 = vmul.f32 0.2, %v4459_v16 }
 0x47d   : > { %v4843_v32 = vsel %vm4587_vm9, %v4459_v16, %v4715_v55  ;;  %v2466_v10 = vpop.f32.mrf.mxu0  ;;  %v3673_v37 = vpop.f32.mrf.mxu2 }
 0x47e   : > { %v4971_v27 = vpack.c.bf16 %v4843_v32, %v4843_v32  ;;  %v4192_v28 = vpop.f32.mrf.mxu3  ;;  %v3316_v21 = vadd.f32 %v3315_v29, %v2466_v10 }
 0x47f   : > { %v4328_v17 = vadd.f32 %v4192_v28, %v3804_v9 }
 0x480   : > { %5100 = vst.msk [vmem:[%s6041_s14 + $0x1e8] sm:$0xf] %vm4977_vm6, %v4971_v27  ;;  %v3805_v56 = vadd.f32 %v3671_v14, %v3316_v21  ;;  %v3320_v47 = vpop.f32.mrf.mxu1 }
 0x481   : > { %v4460_v39 = vadd.f32 %v7340_v3, %v4328_v17 }
 0x483   : > { %vm4588_vm10 = vcmp.gt.f32.partialorder %v4460_v39, 0.0  ;;  %v4716_v33 = vmul.f32 0.2, %v4460_v39 }
 0x485   : > { %v4844_v6 = vsel %vm4588_vm10, %v4460_v39, %v4716_v33  ;;  %v2468_v35 = vpop.f32.mrf.mxu0  ;;  %v3676_v38 = vpop.f32.mrf.mxu2 }
 0x486   : > { %v4972_v23 = vpack.c.bf16 %v4844_v6, %v4844_v6  ;;  %v4195_v46 = vpop.f32.mrf.mxu3  ;;  %v3318_v40 = vadd.f32 %v3317_v34, %v2468_v35 }
 0x487   : > { %v4329_v31 = vadd.f32 %v4195_v46, %v3805_v56 }
 0x488   : > { %5101 = vst.msk [vmem:[%s6041_s14 + $0x1ec] sm:$0xf] %vm4977_vm6, %v4972_v23  ;;  %v3806_v44 = vadd.f32 %v3673_v37, %v3318_v40  ;;  %v3322_v5 = vpop.f32.mrf.mxu1 }
 0x489   : > { %v4461_v30 = vadd.f32 %v7340_v3, %v4329_v31 }
 0x48b   : > { %vm4589_vm4 = vcmp.gt.f32.partialorder %v4461_v30, 0.0  ;;  %v4717_v42 = vmul.f32 0.2, %v4461_v30 }
 0x48d   : > { %v4845_v43 = vsel %vm4589_vm4, %v4461_v30, %v4717_v42  ;;  %v2471_v53 = vpop.f32.mrf.mxu0  ;;  %v3678_v1 = vpop.f32.mrf.mxu2 }
 0x48e   : > { %v4973_v36 = vpack.c.bf16 %v4845_v43, %v4845_v43  ;;  %v4197_v48 = vpop.f32.mrf.mxu3  ;;  %v3321_v62 = vadd.f32 %v3320_v47, %v2471_v53 }
 0x48f   : > { %v4330_v49 = vadd.f32 %v4197_v48, %v3806_v44 }
 0x490   : > { %5102 = vst.msk [vmem:[%s6041_s14 + $0x1f0] sm:$0xf] %vm4977_vm6, %v4973_v36  ;;  %v3807_v51 = vadd.f32 %v3676_v38, %v3321_v62 }
 0x491   : > { %v4462_v26 = vadd.f32 %v7340_v3, %v4330_v49 }
 0x493   : > { %vm4590_vm11 = vcmp.gt.f32.partialorder %v4462_v26, 0.0  ;;  %v4718_v59 = vmul.f32 0.2, %v4462_v26 }
 0x495   : > { %v4846_v52 = vsel %vm4590_vm11, %v4462_v26, %v4718_v59  ;;  %v2473_v58 = vpop.f32.mrf.mxu0 }
 0x496   : > { %v4974_v45 = vpack.c.bf16 %v4846_v52, %v4846_v52  ;;  %v4200_v57 = vpop.f32.mrf.mxu3  ;;  %v3323_v50 = vadd.f32 %v3322_v5, %v2473_v58 }
 0x497   : > { %v4331_v60 = vadd.f32 %v4200_v57, %v3807_v51 }
 0x498   : > { %5103 = vst.msk [vmem:[%s6041_s14 + $0x1f4] sm:$0xf] %vm4977_vm6, %v4974_v45  ;;  %v3808_v41 = vadd.f32 %v3678_v1, %v3323_v50 }
 0x499   : > { %v4463_v61 = vadd.f32 %v7340_v3, %v4331_v60 }
 0x49b   : > { %vm4591_vm1 = vcmp.gt.f32.partialorder %v4463_v61, 0.0  ;;  %v4719_v7 = vmul.f32 0.2, %v4463_v61 }
 0x49d   : > { %v4847_v2 = vsel %vm4591_vm1, %v4463_v61, %v4719_v7 }
 0x49e   : > { %v4975_v12 = vpack.c.bf16 %v4847_v2, %v4847_v2  ;;  %v4202_v54 = vpop.f32.mrf.mxu3 }
 0x49f   : > { %v4332_v18 = vadd.f32 %v4202_v54, %v3808_v41 }
 0x4a0   : > { %5104 = vst.msk [vmem:[%s6041_s14 + $0x1f8] sm:$0xf] %vm4977_vm6, %v4975_v12 }
 0x4a1   : > { %v4464_v63 = vadd.f32 %v7340_v3, %v4332_v18 }
 0x4a3   : > { %vm4592_vm12 = vcmp.gt.f32.partialorder %v4464_v63, 0.0  ;;  %v4720_v20 = vmul.f32 0.2, %v4464_v63 }
 0x4a5   : > { %v4848_v8 = vsel %vm4592_vm12, %v4464_v63, %v4720_v20 }
 0x4a6   : > { %v4976_v0 = vpack.c.bf16 %v4848_v8, %v4848_v8 }
 0x4a8   : > { %5105 = vst.msk [vmem:[%s6041_s14 + $0x1fc] sm:$0xf] %vm4977_vm6, %v4976_v0 }
 0x4a9 PF: > { %s13_s12 = sadd.s32 1, %s5805_s12  }
 0x4aa   : > { %p10_p4 = scmp.ge.s32.totalorder %s13_s12, 4  }
 0x4ac   :  { %12 = sbr.rel (!%p10_p4) target bundleno = 1 (0x1), region = 65 }

</bundles_post_ra>
